<compile_context>
chip_gen: v7x
topology: tpu7x:2x2x1
jax: 0.10.0
libtpu: 0.0.40
codegen_flags: <defaults>
</compile_context>

<pallas_src>
import jax
import jax.numpy as jnp
from jax.experimental import pallas as pl
from jax.experimental.pallas import tpu as pltpu


def _lstm_kernel(x_ref, wih0_ref, b0_ref, wbig_ref, b1_ref, wfc_ref, bfc_ref,
                 out_ref):
    # Shapes (static at trace time):
    #   x     : (S, Bp, I)    time-major, batch padded to a multiple of 8
    #   wih0  : (I,  4*HP)    fused gates [i|f|g|o], layer-0 input weights
    #   b0    : (1,  4*HP)    b_ih0 + b_hh0
    #   wbig  : (2*HP, 8*HP)  block matrix [[whh0, wih1], [0, whh1]]
    #   b1    : (1,  4*HP)    b_ih1 + b_hh1
    #   wfc   : (1,  HP)
    #   bfc   : (1,  1)
    #   out   : (Bp, 1)
    S, Bp, I = x_ref.shape
    HP = wfc_ref.shape[1]
    G = 4 * HP

    # ---- Layer-0 input projection for ALL steps, hoisted off the recurrence.
    if I == 1:
        # Outer product == VPU broadcast multiply; no K=1 MXU pass.
        inproj = x_ref[...] * wih0_ref[...] + b0_ref[...]          # (S, Bp, G)
    else:
        x2d = x_ref[...].reshape(S * Bp, I)
        inproj = (jnp.dot(x2d, wih0_ref[...],
                          preferred_element_type=jnp.float32)
                  + b0_ref[...]).reshape(S, Bp, G)

    b1 = b1_ref[...]

    def gates_to_hc(pre, c_prev):
        # Gate order matches PyTorch: i, f, g, o.  HP=128 -> every slice below
        # is exactly one lane-tile-aligned (.,128) block.
        i_g = jax.nn.sigmoid(pre[:, 0 * HP:1 * HP])
        f_g = jax.nn.sigmoid(pre[:, 1 * HP:2 * HP])
        g_g = jnp.tanh(pre[:, 2 * HP:3 * HP])
        o_g = jax.nn.sigmoid(pre[:, 3 * HP:4 * HP])
        c_new = f_g * c_prev + i_g * g_g
        h_new = o_g * jnp.tanh(c_new)
        return h_new, c_new

    zeros = jnp.zeros((Bp, HP), jnp.float32)        # h0/c0 = torch.zeros(...)

    # Prologue: layer-0 step 0 (h0_{-1} = 0 so its recurrent term is zero).
    h0, c0 = gates_to_hc(inproj[0], zeros)
    h1, c1 = zeros, zeros

    # Skewed schedule: ONE MXU dot per step produces
    #   big[:, :G] = h0_t @ whh0                    (layer-0 recurrent, step t+1)
    #   big[:, G:] = h0_t @ wih1 + h1_{t-1} @ whh1  (layer-1 preactivation, step t)
    # Static unroll is fine at small S; for large S switch to
    # lax.fori_loop(..., unroll=2..4) to bound vreg live ranges.
    for t in range(S):
        lhs = jnp.concatenate([h0, h1], axis=1)                     # (Bp, 2*HP)
        big = jnp.dot(lhs, wbig_ref[...],
                      preferred_element_type=jnp.float32)           # (Bp, 8*HP)
        pre1 = big[:, G:] + b1
        if t + 1 < S:
            pre0_next = inproj[t + 1] + big[:, :G]
            # Layer-1 gates at t and layer-0 gates at t+1 are independent given
            # the dot -> one stacked (2*Bp, 4*HP) gate pass (full sublanes).
            h_st, c_st = gates_to_hc(
                jnp.concatenate([pre1, pre0_next], axis=0),
                jnp.concatenate([c1, c0], axis=0))
            h1, c1 = h_st[:Bp], c_st[:Bp]
            h0, c0 = h_st[Bp:], c_st[Bp:]
        else:
            h1, c1 = gates_to_hc(pre1, c1)

    # fc(out[:, -1, :]): N=1 -> skip the MXU (VPU multiply + lane reduce).
    out_ref[...] = (jnp.sum(h1 * wfc_ref[...], axis=-1, keepdims=True)
                    + bfc_ref[...]).astype(out_ref.dtype)


def stock_lstm_forward(x, kparams):
    """x: (B, S, I) float32 (batch_first, like PyTorch).  Returns (B, 1)."""
    B, S, I = x.shape
    Bp = max(8, ((B + 7) // 8) * 8)          # whole sublane tiles per step
    xt = jnp.transpose(x, (1, 0, 2)).astype(jnp.float32)        # (S, B, I)
    x_pad = jnp.pad(xt, ((0, 0), (0, Bp - B), (0, 0)))          # (S, Bp, I)

    vmem = pl.BlockSpec(memory_space=pltpu.MemorySpace.VMEM)
    out = pl.pallas_call(
        _lstm_kernel,
        out_shape=jax.ShapeDtypeStruct((Bp, 1), jnp.float32),
        in_specs=[vmem] * 7,
        out_specs=vmem,
    )(x_pad, kparams["wih0"], kparams["b0"], kparams["wbig"],
      kparams["b1"], kparams["wfc"], kparams["bfc"])
    return out[:B]


# ----------------------------------------------------------------------------
# Parameter construction (PyTorch-style init) + packing into fused/padded layout
# ----------------------------------------------------------------------------

def make_params(key, input_size=1, hidden_size=50):
    """Synthetic init mirroring nn.LSTM/nn.Linear U(-1/sqrt(H), 1/sqrt(H)).

    Stored gate-split, right-multiplication layout for the pure-JAX reference:
      wih*: (4, in_dim, H), whh*: (4, H, H), b* = b_ih + b_hh as (4, 1, H).
    Gate order matches PyTorch: i, f, g, o.
    """
    H, I = hidden_size, input_size
    stdv = 1.0 / jnp.sqrt(jnp.float32(H))
    ks = jax.random.split(key, 10)
    u = lambda k, shape: jax.random.uniform(k, shape, jnp.float32, -stdv, stdv)
    return {
        "wih0": u(ks[0], (4, I, H)),
        "whh0": u(ks[1], (4, H, H)),
        "b0":   u(ks[2], (4, 1, H)) + u(ks[3], (4, 1, H)),
        "wih1": u(ks[4], (4, H, H)),
        "whh1": u(ks[5], (4, H, H)),
        "b1":   u(ks[6], (4, 1, H)) + u(ks[7], (4, 1, H)),
        "wfc":  u(ks[8], (H, 1)),
        "bfc":  u(ks[9], (1, 1)),
    }


def pack_params(p, hidden_pad=128):
    """Fuse the 4 gates along lanes, pad H -> hidden_pad with zeros, and build
    the block recurrent matrix [[whh0, wih1], [0, whh1]] used by the skewed
    one-matmul-per-step schedule.

    Zero padding keeps padded h/c lanes identically zero through the
    recurrence, so results match the unpadded reference.  (Invariant: padded
    weight/bias rows & columns must stay exactly zero.)
    """
    HP = hidden_pad
    H = p["whh0"].shape[-1]
    I = p["wih0"].shape[1]

    def pack_w(w4, rows):
        in_dim = w4.shape[1]
        out = jnp.zeros((rows, 4 * HP), jnp.float32)
        for g in range(4):
            out = out.at[:in_dim, g * HP:g * HP + H].set(w4[g])
        return out

    def pack_b(b4):
        out = jnp.zeros((1, 4 * HP), jnp.float32)
        for g in range(4):
            out = out.at[:, g * HP:g * HP + H].set(b4[g])
        return out

    whh0 = pack_w(p["whh0"], HP)
    wih1 = pack_w(p["wih1"], HP)
    whh1 = pack_w(p["whh1"], HP)
    wbig = jnp.zeros((2 * HP, 8 * HP), jnp.float32)
    wbig = wbig.at[:HP, :4 * HP].set(whh0)
    wbig = wbig.at[:HP, 4 * HP:].set(wih1)
    wbig = wbig.at[HP:, 4 * HP:].set(whh1)

    wfc = jnp.zeros((1, HP), jnp.float32).at[:, :H].set(p["wfc"][:, 0])
    return {
        "wih0": pack_w(p["wih0"], I),
        "b0":   pack_b(p["b0"]),
        "wbig": wbig,
        "b1":   pack_b(p["b1"]),
        "wfc":  wfc,
        "bfc":  p["bfc"],
    }


def reference_forward(x, p):
    """Pure-JAX reference (lax.scan) matching nn.LSTM(batch_first)+fc semantics."""
    B = x.shape[0]
    H = p["whh0"].shape[-1]

    def cell(x_in, h, c, wih, whh, b):
        gates = [x_in @ wih[g] + h @ whh[g] + b[g] for g in range(4)]
        i = jax.nn.sigmoid(gates[0])
        f = jax.nn.sigmoid(gates[1])
        g_ = jnp.tanh(gates[2])
        o = jax.nn.sigmoid(gates[3])
        c_new = f * c + i * g_
        return o * jnp.tanh(c_new), c_new

    def step(carry, x_t):
        h0, c0, h1, c1 = carry
        h0, c0 = cell(x_t, h0, c0, p["wih0"], p["whh0"], p["b0"])
        h1, c1 = cell(h0, h1, c1, p["wih1"], p["whh1"], p["b1"])
        return (h0, c0, h1, c1), None

    init = tuple(jnp.zeros((B, H), jnp.float32) for _ in range(4))
    (h0, c0, h1, c1), _ = jax.lax.scan(step, init, jnp.transpose(x, (1, 0, 2)))
    return h1 @ p["wfc"] + p["bfc"]


if __name__ == "__main__":
    B, S, I, H = 4, 8, 1, 50   # module defaults: input_size=1, hidden=50, 2 layers
    HP = 128                   # padded hidden -> every gate slice = one lane tile

    key = jax.random.PRNGKey(0)
    k_x, k_p = jax.random.split(key)
    x = jax.random.normal(k_x, (B, S, I), jnp.float32)
    params = make_params(k_p, input_size=I, hidden_size=H)
    kparams = pack_params(params, hidden_pad=HP)

    out = jax.block_until_ready(stock_lstm_forward(x, kparams))
    ref = jax.block_until_ready(reference_forward(x, params))

    assert out.shape == (B, 1)
    assert jnp.allclose(out, ref, atol=1e-4, rtol=1e-4), (out, ref)
    print("KERNEL_OK")
</pallas_src>

<mosaic_0001>
module attributes {stable_mosaic.version = 11 : i64} {
  func.func @_lstm_kernel(%arg0: memref<8x8x1xf32, #tpu.memory_space<vmem>>, %arg1: memref<1x512xf32, #tpu.memory_space<vmem>>, %arg2: memref<1x512xf32, #tpu.memory_space<vmem>>, %arg3: memref<256x1024xf32, #tpu.memory_space<vmem>>, %arg4: memref<1x512xf32, #tpu.memory_space<vmem>>, %arg5: memref<1x128xf32, #tpu.memory_space<vmem>>, %arg6: memref<1x1xf32, #tpu.memory_space<vmem>>, %arg7: memref<8x1xf32, #tpu.memory_space<vmem>>) attributes {dimension_semantics = [], scalar_prefetch = 0 : i64, scratch_operands = 0 : i64, tpu.core_type = #tpu.core_type<tc>} {
    %c0 = arith.constant 0 : index
    %c0_0 = arith.constant 0 : index
    %c0_1 = arith.constant 0 : index
    %0 = vector.load %arg0[%c0, %c0_0, %c0_1] : memref<8x8x1xf32, #tpu.memory_space<vmem>>, vector<8x8x1xf32>
    %c0_2 = arith.constant 0 : index
    %c0_3 = arith.constant 0 : index
    %1 = vector.load %arg1[%c0_2, %c0_3] : memref<1x512xf32, #tpu.memory_space<vmem>>, vector<1x512xf32>
    %2 = vector.shape_cast %1 : vector<1x512xf32> to vector<1x1x512xf32>
    %3 = vector.broadcast %0 : vector<8x8x1xf32> to vector<8x8x512xf32>
    %4 = vector.broadcast %2 : vector<1x1x512xf32> to vector<8x8x512xf32>
    %5 = arith.mulf %3, %4 : vector<8x8x512xf32>
    %c0_4 = arith.constant 0 : index
    %c0_5 = arith.constant 0 : index
    %6 = vector.load %arg2[%c0_4, %c0_5] : memref<1x512xf32, #tpu.memory_space<vmem>>, vector<1x512xf32>
    %7 = vector.shape_cast %6 : vector<1x512xf32> to vector<1x1x512xf32>
    %8 = vector.broadcast %7 : vector<1x1x512xf32> to vector<8x8x512xf32>
    %9 = arith.addf %5, %8 : vector<8x8x512xf32>
    %c0_6 = arith.constant 0 : index
    %c0_7 = arith.constant 0 : index
    %10 = vector.load %arg4[%c0_6, %c0_7] : memref<1x512xf32, #tpu.memory_space<vmem>>, vector<1x512xf32>
    %cst = arith.constant 0.000000e+00 : f32
    %11 = vector.broadcast %cst : f32 to vector<8x128xf32>
    %12 = vector.extract_strided_slice %9 {offsets = [0, 0, 0], sizes = [1, 8, 512], strides = [1, 1, 1]} : vector<8x8x512xf32> to vector<1x8x512xf32>
    %13 = vector.shape_cast %12 : vector<1x8x512xf32> to vector<8x512xf32>
    %14 = vector.extract_strided_slice %13 {offsets = [0, 0], sizes = [8, 128], strides = [1, 1]} : vector<8x512xf32> to vector<8x128xf32>
    %15 = arith.negf %14 : vector<8x128xf32>
    %16 = math.exp %15 : vector<8x128xf32>
    %cst_8 = arith.constant 1.000000e+00 : f32
    %17 = vector.broadcast %cst_8 : f32 to vector<8x128xf32>
    %18 = arith.addf %17, %16 : vector<8x128xf32>
    %19 = arith.divf %17, %18 : vector<8x128xf32>
    %20 = vector.extract_strided_slice %13 {offsets = [0, 128], sizes = [8, 128], strides = [1, 1]} : vector<8x512xf32> to vector<8x128xf32>
    %21 = arith.negf %20 : vector<8x128xf32>
    %22 = math.exp %21 : vector<8x128xf32>
    %cst_9 = arith.constant 1.000000e+00 : f32
    %23 = vector.broadcast %cst_9 : f32 to vector<8x128xf32>
    %24 = arith.addf %23, %22 : vector<8x128xf32>
    %25 = arith.divf %23, %24 : vector<8x128xf32>
    %26 = vector.extract_strided_slice %13 {offsets = [0, 256], sizes = [8, 128], strides = [1, 1]} : vector<8x512xf32> to vector<8x128xf32>
    %27 = math.tanh %26 : vector<8x128xf32>
    %28 = vector.extract_strided_slice %13 {offsets = [0, 384], sizes = [8, 128], strides = [1, 1]} : vector<8x512xf32> to vector<8x128xf32>
    %29 = arith.negf %28 : vector<8x128xf32>
    %30 = math.exp %29 : vector<8x128xf32>
    %cst_10 = arith.constant 1.000000e+00 : f32
    %31 = vector.broadcast %cst_10 : f32 to vector<8x128xf32>
    %32 = arith.addf %31, %30 : vector<8x128xf32>
    %33 = arith.divf %31, %32 : vector<8x128xf32>
    %34 = arith.mulf %25, %11 : vector<8x128xf32>
    %35 = arith.mulf %19, %27 : vector<8x128xf32>
    %36 = arith.addf %34, %35 : vector<8x128xf32>
    %37 = math.tanh %36 : vector<8x128xf32>
    %38 = arith.mulf %33, %37 : vector<8x128xf32>
    %39 = tpu.concatenate %38, %11 in 1 : vector<8x128xf32>, vector<8x128xf32> -> vector<8x256xf32>
    %c0_11 = arith.constant 0 : index
    %c0_12 = arith.constant 0 : index
    %40 = vector.load %arg3[%c0_11, %c0_12] : memref<256x1024xf32, #tpu.memory_space<vmem>>, vector<256x1024xf32>
    %cst_13 = arith.constant dense<0.000000e+00> : vector<8x1024xf32>
    %41 = tpu.matmul %39, %40, %cst_13 {dimension_numbers = #tpu.dot_dimension_numbers<[1], [0], [0], [1], [0, 0, 1, 1], [], []>} : vector<8x256xf32>, vector<256x1024xf32>, vector<8x1024xf32> -> vector<8x1024xf32>
    %42 = vector.extract_strided_slice %41 {offsets = [0, 512], sizes = [8, 512], strides = [1, 1]} : vector<8x1024xf32> to vector<8x512xf32>
    %43 = vector.broadcast %10 : vector<1x512xf32> to vector<8x512xf32>
    %44 = arith.addf %42, %43 : vector<8x512xf32>
    %45 = vector.extract_strided_slice %9 {offsets = [1, 0, 0], sizes = [1, 8, 512], strides = [1, 1, 1]} : vector<8x8x512xf32> to vector<1x8x512xf32>
    %46 = vector.shape_cast %45 : vector<1x8x512xf32> to vector<8x512xf32>
    %47 = vector.extract_strided_slice %41 {offsets = [0, 0], sizes = [8, 512], strides = [1, 1]} : vector<8x1024xf32> to vector<8x512xf32>
    %48 = arith.addf %46, %47 : vector<8x512xf32>
    %49 = tpu.concatenate %44, %48 in 0 : vector<8x512xf32>, vector<8x512xf32> -> vector<16x512xf32>
    %50 = tpu.concatenate %11, %36 in 0 : vector<8x128xf32>, vector<8x128xf32> -> vector<16x128xf32>
    %51 = vector.extract_strided_slice %49 {offsets = [0, 0], sizes = [16, 128], strides = [1, 1]} : vector<16x512xf32> to vector<16x128xf32>
    %52 = arith.negf %51 : vector<16x128xf32>
    %53 = math.exp %52 : vector<16x128xf32>
    %cst_14 = arith.constant 1.000000e+00 : f32
    %54 = vector.broadcast %cst_14 : f32 to vector<16x128xf32>
    %55 = arith.addf %54, %53 : vector<16x128xf32>
    %56 = arith.divf %54, %55 : vector<16x128xf32>
    %57 = vector.extract_strided_slice %49 {offsets = [0, 128], sizes = [16, 128], strides = [1, 1]} : vector<16x512xf32> to vector<16x128xf32>
    %58 = arith.negf %57 : vector<16x128xf32>
    %59 = math.exp %58 : vector<16x128xf32>
    %cst_15 = arith.constant 1.000000e+00 : f32
    %60 = vector.broadcast %cst_15 : f32 to vector<16x128xf32>
    %61 = arith.addf %60, %59 : vector<16x128xf32>
    %62 = arith.divf %60, %61 : vector<16x128xf32>
    %63 = vector.extract_strided_slice %49 {offsets = [0, 256], sizes = [16, 128], strides = [1, 1]} : vector<16x512xf32> to vector<16x128xf32>
    %64 = math.tanh %63 : vector<16x128xf32>
    %65 = vector.extract_strided_slice %49 {offsets = [0, 384], sizes = [16, 128], strides = [1, 1]} : vector<16x512xf32> to vector<16x128xf32>
    %66 = arith.negf %65 : vector<16x128xf32>
    %67 = math.exp %66 : vector<16x128xf32>
    %cst_16 = arith.constant 1.000000e+00 : f32
    %68 = vector.broadcast %cst_16 : f32 to vector<16x128xf32>
    %69 = arith.addf %68, %67 : vector<16x128xf32>
    %70 = arith.divf %68, %69 : vector<16x128xf32>
    %71 = arith.mulf %62, %50 : vector<16x128xf32>
    %72 = arith.mulf %56, %64 : vector<16x128xf32>
    %73 = arith.addf %71, %72 : vector<16x128xf32>
    %74 = math.tanh %73 : vector<16x128xf32>
    %75 = arith.mulf %70, %74 : vector<16x128xf32>
    %76 = vector.extract_strided_slice %75 {offsets = [0, 0], sizes = [8, 128], strides = [1, 1]} : vector<16x128xf32> to vector<8x128xf32>
    %77 = vector.extract_strided_slice %73 {offsets = [0, 0], sizes = [8, 128], strides = [1, 1]} : vector<16x128xf32> to vector<8x128xf32>
    %78 = vector.extract_strided_slice %75 {offsets = [8, 0], sizes = [8, 128], strides = [1, 1]} : vector<16x128xf32> to vector<8x128xf32>
    %79 = vector.extract_strided_slice %73 {offsets = [8, 0], sizes = [8, 128], strides = [1, 1]} : vector<16x128xf32> to vector<8x128xf32>
    %80 = tpu.concatenate %78, %76 in 1 : vector<8x128xf32>, vector<8x128xf32> -> vector<8x256xf32>
    %c0_17 = arith.constant 0 : index
    %c0_18 = arith.constant 0 : index
    %81 = vector.load %arg3[%c0_17, %c0_18] : memref<256x1024xf32, #tpu.memory_space<vmem>>, vector<256x1024xf32>
    %cst_19 = arith.constant dense<0.000000e+00> : vector<8x1024xf32>
    %82 = tpu.matmul %80, %81, %cst_19 {dimension_numbers = #tpu.dot_dimension_numbers<[1], [0], [0], [1], [0, 0, 1, 1], [], []>} : vector<8x256xf32>, vector<256x1024xf32>, vector<8x1024xf32> -> vector<8x1024xf32>
    %83 = vector.extract_strided_slice %82 {offsets = [0, 512], sizes = [8, 512], strides = [1, 1]} : vector<8x1024xf32> to vector<8x512xf32>
    %84 = vector.broadcast %10 : vector<1x512xf32> to vector<8x512xf32>
    %85 = arith.addf %83, %84 : vector<8x512xf32>
    %86 = vector.extract_strided_slice %9 {offsets = [2, 0, 0], sizes = [1, 8, 512], strides = [1, 1, 1]} : vector<8x8x512xf32> to vector<1x8x512xf32>
    %87 = vector.shape_cast %86 : vector<1x8x512xf32> to vector<8x512xf32>
    %88 = vector.extract_strided_slice %82 {offsets = [0, 0], sizes = [8, 512], strides = [1, 1]} : vector<8x1024xf32> to vector<8x512xf32>
    %89 = arith.addf %87, %88 : vector<8x512xf32>
    %90 = tpu.concatenate %85, %89 in 0 : vector<8x512xf32>, vector<8x512xf32> -> vector<16x512xf32>
    %91 = tpu.concatenate %77, %79 in 0 : vector<8x128xf32>, vector<8x128xf32> -> vector<16x128xf32>
    %92 = vector.extract_strided_slice %90 {offsets = [0, 0], sizes = [16, 128], strides = [1, 1]} : vector<16x512xf32> to vector<16x128xf32>
    %93 = arith.negf %92 : vector<16x128xf32>
    %94 = math.exp %93 : vector<16x128xf32>
    %cst_20 = arith.constant 1.000000e+00 : f32
    %95 = vector.broadcast %cst_20 : f32 to vector<16x128xf32>
    %96 = arith.addf %95, %94 : vector<16x128xf32>
    %97 = arith.divf %95, %96 : vector<16x128xf32>
    %98 = vector.extract_strided_slice %90 {offsets = [0, 128], sizes = [16, 128], strides = [1, 1]} : vector<16x512xf32> to vector<16x128xf32>
    %99 = arith.negf %98 : vector<16x128xf32>
    %100 = math.exp %99 : vector<16x128xf32>
    %cst_21 = arith.constant 1.000000e+00 : f32
    %101 = vector.broadcast %cst_21 : f32 to vector<16x128xf32>
    %102 = arith.addf %101, %100 : vector<16x128xf32>
    %103 = arith.divf %101, %102 : vector<16x128xf32>
    %104 = vector.extract_strided_slice %90 {offsets = [0, 256], sizes = [16, 128], strides = [1, 1]} : vector<16x512xf32> to vector<16x128xf32>
    %105 = math.tanh %104 : vector<16x128xf32>
    %106 = vector.extract_strided_slice %90 {offsets = [0, 384], sizes = [16, 128], strides = [1, 1]} : vector<16x512xf32> to vector<16x128xf32>
    %107 = arith.negf %106 : vector<16x128xf32>
    %108 = math.exp %107 : vector<16x128xf32>
    %cst_22 = arith.constant 1.000000e+00 : f32
    %109 = vector.broadcast %cst_22 : f32 to vector<16x128xf32>
    %110 = arith.addf %109, %108 : vector<16x128xf32>
    %111 = arith.divf %109, %110 : vector<16x128xf32>
    %112 = arith.mulf %103, %91 : vector<16x128xf32>
    %113 = arith.mulf %97, %105 : vector<16x128xf32>
    %114 = arith.addf %112, %113 : vector<16x128xf32>
    %115 = math.tanh %114 : vector<16x128xf32>
    %116 = arith.mulf %111, %115 : vector<16x128xf32>
    %117 = vector.extract_strided_slice %116 {offsets = [0, 0], sizes = [8, 128], strides = [1, 1]} : vector<16x128xf32> to vector<8x128xf32>
    %118 = vector.extract_strided_slice %114 {offsets = [0, 0], sizes = [8, 128], strides = [1, 1]} : vector<16x128xf32> to vector<8x128xf32>
    %119 = vector.extract_strided_slice %116 {offsets = [8, 0], sizes = [8, 128], strides = [1, 1]} : vector<16x128xf32> to vector<8x128xf32>
    %120 = vector.extract_strided_slice %114 {offsets = [8, 0], sizes = [8, 128], strides = [1, 1]} : vector<16x128xf32> to vector<8x128xf32>
    %121 = tpu.concatenate %119, %117 in 1 : vector<8x128xf32>, vector<8x128xf32> -> vector<8x256xf32>
    %c0_23 = arith.constant 0 : index
    %c0_24 = arith.constant 0 : index
    %122 = vector.load %arg3[%c0_23, %c0_24] : memref<256x1024xf32, #tpu.memory_space<vmem>>, vector<256x1024xf32>
    %cst_25 = arith.constant dense<0.000000e+00> : vector<8x1024xf32>
    %123 = tpu.matmul %121, %122, %cst_25 {dimension_numbers = #tpu.dot_dimension_numbers<[1], [0], [0], [1], [0, 0, 1, 1], [], []>} : vector<8x256xf32>, vector<256x1024xf32>, vector<8x1024xf32> -> vector<8x1024xf32>
    %124 = vector.extract_strided_slice %123 {offsets = [0, 512], sizes = [8, 512], strides = [1, 1]} : vector<8x1024xf32> to vector<8x512xf32>
    %125 = vector.broadcast %10 : vector<1x512xf32> to vector<8x512xf32>
    %126 = arith.addf %124, %125 : vector<8x512xf32>
    %127 = vector.extract_strided_slice %9 {offsets = [3, 0, 0], sizes = [1, 8, 512], strides = [1, 1, 1]} : vector<8x8x512xf32> to vector<1x8x512xf32>
    %128 = vector.shape_cast %127 : vector<1x8x512xf32> to vector<8x512xf32>
    %129 = vector.extract_strided_slice %123 {offsets = [0, 0], sizes = [8, 512], strides = [1, 1]} : vector<8x1024xf32> to vector<8x512xf32>
    %130 = arith.addf %128, %129 : vector<8x512xf32>
    %131 = tpu.concatenate %126, %130 in 0 : vector<8x512xf32>, vector<8x512xf32> -> vector<16x512xf32>
    %132 = tpu.concatenate %118, %120 in 0 : vector<8x128xf32>, vector<8x128xf32> -> vector<16x128xf32>
    %133 = vector.extract_strided_slice %131 {offsets = [0, 0], sizes = [16, 128], strides = [1, 1]} : vector<16x512xf32> to vector<16x128xf32>
    %134 = arith.negf %133 : vector<16x128xf32>
    %135 = math.exp %134 : vector<16x128xf32>
    %cst_26 = arith.constant 1.000000e+00 : f32
    %136 = vector.broadcast %cst_26 : f32 to vector<16x128xf32>
    %137 = arith.addf %136, %135 : vector<16x128xf32>
    %138 = arith.divf %136, %137 : vector<16x128xf32>
    %139 = vector.extract_strided_slice %131 {offsets = [0, 128], sizes = [16, 128], strides = [1, 1]} : vector<16x512xf32> to vector<16x128xf32>
    %140 = arith.negf %139 : vector<16x128xf32>
    %141 = math.exp %140 : vector<16x128xf32>
    %cst_27 = arith.constant 1.000000e+00 : f32
    %142 = vector.broadcast %cst_27 : f32 to vector<16x128xf32>
    %143 = arith.addf %142, %141 : vector<16x128xf32>
    %144 = arith.divf %142, %143 : vector<16x128xf32>
    %145 = vector.extract_strided_slice %131 {offsets = [0, 256], sizes = [16, 128], strides = [1, 1]} : vector<16x512xf32> to vector<16x128xf32>
    %146 = math.tanh %145 : vector<16x128xf32>
    %147 = vector.extract_strided_slice %131 {offsets = [0, 384], sizes = [16, 128], strides = [1, 1]} : vector<16x512xf32> to vector<16x128xf32>
    %148 = arith.negf %147 : vector<16x128xf32>
    %149 = math.exp %148 : vector<16x128xf32>
    %cst_28 = arith.constant 1.000000e+00 : f32
    %150 = vector.broadcast %cst_28 : f32 to vector<16x128xf32>
    %151 = arith.addf %150, %149 : vector<16x128xf32>
    %152 = arith.divf %150, %151 : vector<16x128xf32>
    %153 = arith.mulf %144, %132 : vector<16x128xf32>
    %154 = arith.mulf %138, %146 : vector<16x128xf32>
    %155 = arith.addf %153, %154 : vector<16x128xf32>
    %156 = math.tanh %155 : vector<16x128xf32>
    %157 = arith.mulf %152, %156 : vector<16x128xf32>
    %158 = vector.extract_strided_slice %157 {offsets = [0, 0], sizes = [8, 128], strides = [1, 1]} : vector<16x128xf32> to vector<8x128xf32>
    %159 = vector.extract_strided_slice %155 {offsets = [0, 0], sizes = [8, 128], strides = [1, 1]} : vector<16x128xf32> to vector<8x128xf32>
    %160 = vector.extract_strided_slice %157 {offsets = [8, 0], sizes = [8, 128], strides = [1, 1]} : vector<16x128xf32> to vector<8x128xf32>
    %161 = vector.extract_strided_slice %155 {offsets = [8, 0], sizes = [8, 128], strides = [1, 1]} : vector<16x128xf32> to vector<8x128xf32>
    %162 = tpu.concatenate %160, %158 in 1 : vector<8x128xf32>, vector<8x128xf32> -> vector<8x256xf32>
    %c0_29 = arith.constant 0 : index
    %c0_30 = arith.constant 0 : index
    %163 = vector.load %arg3[%c0_29, %c0_30] : memref<256x1024xf32, #tpu.memory_space<vmem>>, vector<256x1024xf32>
    %cst_31 = arith.constant dense<0.000000e+00> : vector<8x1024xf32>
    %164 = tpu.matmul %162, %163, %cst_31 {dimension_numbers = #tpu.dot_dimension_numbers<[1], [0], [0], [1], [0, 0, 1, 1], [], []>} : vector<8x256xf32>, vector<256x1024xf32>, vector<8x1024xf32> -> vector<8x1024xf32>
    %165 = vector.extract_strided_slice %164 {offsets = [0, 512], sizes = [8, 512], strides = [1, 1]} : vector<8x1024xf32> to vector<8x512xf32>
    %166 = vector.broadcast %10 : vector<1x512xf32> to vector<8x512xf32>
    %167 = arith.addf %165, %166 : vector<8x512xf32>
    %168 = vector.extract_strided_slice %9 {offsets = [4, 0, 0], sizes = [1, 8, 512], strides = [1, 1, 1]} : vector<8x8x512xf32> to vector<1x8x512xf32>
    %169 = vector.shape_cast %168 : vector<1x8x512xf32> to vector<8x512xf32>
    %170 = vector.extract_strided_slice %164 {offsets = [0, 0], sizes = [8, 512], strides = [1, 1]} : vector<8x1024xf32> to vector<8x512xf32>
    %171 = arith.addf %169, %170 : vector<8x512xf32>
    %172 = tpu.concatenate %167, %171 in 0 : vector<8x512xf32>, vector<8x512xf32> -> vector<16x512xf32>
    %173 = tpu.concatenate %159, %161 in 0 : vector<8x128xf32>, vector<8x128xf32> -> vector<16x128xf32>
    %174 = vector.extract_strided_slice %172 {offsets = [0, 0], sizes = [16, 128], strides = [1, 1]} : vector<16x512xf32> to vector<16x128xf32>
    %175 = arith.negf %174 : vector<16x128xf32>
    %176 = math.exp %175 : vector<16x128xf32>
    %cst_32 = arith.constant 1.000000e+00 : f32
    %177 = vector.broadcast %cst_32 : f32 to vector<16x128xf32>
    %178 = arith.addf %177, %176 : vector<16x128xf32>
    %179 = arith.divf %177, %178 : vector<16x128xf32>
    %180 = vector.extract_strided_slice %172 {offsets = [0, 128], sizes = [16, 128], strides = [1, 1]} : vector<16x512xf32> to vector<16x128xf32>
    %181 = arith.negf %180 : vector<16x128xf32>
    %182 = math.exp %181 : vector<16x128xf32>
    %cst_33 = arith.constant 1.000000e+00 : f32
    %183 = vector.broadcast %cst_33 : f32 to vector<16x128xf32>
    %184 = arith.addf %183, %182 : vector<16x128xf32>
    %185 = arith.divf %183, %184 : vector<16x128xf32>
    %186 = vector.extract_strided_slice %172 {offsets = [0, 256], sizes = [16, 128], strides = [1, 1]} : vector<16x512xf32> to vector<16x128xf32>
    %187 = math.tanh %186 : vector<16x128xf32>
    %188 = vector.extract_strided_slice %172 {offsets = [0, 384], sizes = [16, 128], strides = [1, 1]} : vector<16x512xf32> to vector<16x128xf32>
    %189 = arith.negf %188 : vector<16x128xf32>
    %190 = math.exp %189 : vector<16x128xf32>
    %cst_34 = arith.constant 1.000000e+00 : f32
    %191 = vector.broadcast %cst_34 : f32 to vector<16x128xf32>
    %192 = arith.addf %191, %190 : vector<16x128xf32>
    %193 = arith.divf %191, %192 : vector<16x128xf32>
    %194 = arith.mulf %185, %173 : vector<16x128xf32>
    %195 = arith.mulf %179, %187 : vector<16x128xf32>
    %196 = arith.addf %194, %195 : vector<16x128xf32>
    %197 = math.tanh %196 : vector<16x128xf32>
    %198 = arith.mulf %193, %197 : vector<16x128xf32>
    %199 = vector.extract_strided_slice %198 {offsets = [0, 0], sizes = [8, 128], strides = [1, 1]} : vector<16x128xf32> to vector<8x128xf32>
    %200 = vector.extract_strided_slice %196 {offsets = [0, 0], sizes = [8, 128], strides = [1, 1]} : vector<16x128xf32> to vector<8x128xf32>
    %201 = vector.extract_strided_slice %198 {offsets = [8, 0], sizes = [8, 128], strides = [1, 1]} : vector<16x128xf32> to vector<8x128xf32>
    %202 = vector.extract_strided_slice %196 {offsets = [8, 0], sizes = [8, 128], strides = [1, 1]} : vector<16x128xf32> to vector<8x128xf32>
    %203 = tpu.concatenate %201, %199 in 1 : vector<8x128xf32>, vector<8x128xf32> -> vector<8x256xf32>
    %c0_35 = arith.constant 0 : index
    %c0_36 = arith.constant 0 : index
    %204 = vector.load %arg3[%c0_35, %c0_36] : memref<256x1024xf32, #tpu.memory_space<vmem>>, vector<256x1024xf32>
    %cst_37 = arith.constant dense<0.000000e+00> : vector<8x1024xf32>
    %205 = tpu.matmul %203, %204, %cst_37 {dimension_numbers = #tpu.dot_dimension_numbers<[1], [0], [0], [1], [0, 0, 1, 1], [], []>} : vector<8x256xf32>, vector<256x1024xf32>, vector<8x1024xf32> -> vector<8x1024xf32>
    %206 = vector.extract_strided_slice %205 {offsets = [0, 512], sizes = [8, 512], strides = [1, 1]} : vector<8x1024xf32> to vector<8x512xf32>
    %207 = vector.broadcast %10 : vector<1x512xf32> to vector<8x512xf32>
    %208 = arith.addf %206, %207 : vector<8x512xf32>
    %209 = vector.extract_strided_slice %9 {offsets = [5, 0, 0], sizes = [1, 8, 512], strides = [1, 1, 1]} : vector<8x8x512xf32> to vector<1x8x512xf32>
    %210 = vector.shape_cast %209 : vector<1x8x512xf32> to vector<8x512xf32>
    %211 = vector.extract_strided_slice %205 {offsets = [0, 0], sizes = [8, 512], strides = [1, 1]} : vector<8x1024xf32> to vector<8x512xf32>
    %212 = arith.addf %210, %211 : vector<8x512xf32>
    %213 = tpu.concatenate %208, %212 in 0 : vector<8x512xf32>, vector<8x512xf32> -> vector<16x512xf32>
    %214 = tpu.concatenate %200, %202 in 0 : vector<8x128xf32>, vector<8x128xf32> -> vector<16x128xf32>
    %215 = vector.extract_strided_slice %213 {offsets = [0, 0], sizes = [16, 128], strides = [1, 1]} : vector<16x512xf32> to vector<16x128xf32>
    %216 = arith.negf %215 : vector<16x128xf32>
    %217 = math.exp %216 : vector<16x128xf32>
    %cst_38 = arith.constant 1.000000e+00 : f32
    %218 = vector.broadcast %cst_38 : f32 to vector<16x128xf32>
    %219 = arith.addf %218, %217 : vector<16x128xf32>
    %220 = arith.divf %218, %219 : vector<16x128xf32>
    %221 = vector.extract_strided_slice %213 {offsets = [0, 128], sizes = [16, 128], strides = [1, 1]} : vector<16x512xf32> to vector<16x128xf32>
    %222 = arith.negf %221 : vector<16x128xf32>
    %223 = math.exp %222 : vector<16x128xf32>
    %cst_39 = arith.constant 1.000000e+00 : f32
    %224 = vector.broadcast %cst_39 : f32 to vector<16x128xf32>
    %225 = arith.addf %224, %223 : vector<16x128xf32>
    %226 = arith.divf %224, %225 : vector<16x128xf32>
    %227 = vector.extract_strided_slice %213 {offsets = [0, 256], sizes = [16, 128], strides = [1, 1]} : vector<16x512xf32> to vector<16x128xf32>
    %228 = math.tanh %227 : vector<16x128xf32>
    %229 = vector.extract_strided_slice %213 {offsets = [0, 384], sizes = [16, 128], strides = [1, 1]} : vector<16x512xf32> to vector<16x128xf32>
    %230 = arith.negf %229 : vector<16x128xf32>
    %231 = math.exp %230 : vector<16x128xf32>
    %cst_40 = arith.constant 1.000000e+00 : f32
    %232 = vector.broadcast %cst_40 : f32 to vector<16x128xf32>
    %233 = arith.addf %232, %231 : vector<16x128xf32>
    %234 = arith.divf %232, %233 : vector<16x128xf32>
    %235 = arith.mulf %226, %214 : vector<16x128xf32>
    %236 = arith.mulf %220, %228 : vector<16x128xf32>
    %237 = arith.addf %235, %236 : vector<16x128xf32>
    %238 = math.tanh %237 : vector<16x128xf32>
    %239 = arith.mulf %234, %238 : vector<16x128xf32>
    %240 = vector.extract_strided_slice %239 {offsets = [0, 0], sizes = [8, 128], strides = [1, 1]} : vector<16x128xf32> to vector<8x128xf32>
    %241 = vector.extract_strided_slice %237 {offsets = [0, 0], sizes = [8, 128], strides = [1, 1]} : vector<16x128xf32> to vector<8x128xf32>
    %242 = vector.extract_strided_slice %239 {offsets = [8, 0], sizes = [8, 128], strides = [1, 1]} : vector<16x128xf32> to vector<8x128xf32>
    %243 = vector.extract_strided_slice %237 {offsets = [8, 0], sizes = [8, 128], strides = [1, 1]} : vector<16x128xf32> to vector<8x128xf32>
    %244 = tpu.concatenate %242, %240 in 1 : vector<8x128xf32>, vector<8x128xf32> -> vector<8x256xf32>
    %c0_41 = arith.constant 0 : index
    %c0_42 = arith.constant 0 : index
    %245 = vector.load %arg3[%c0_41, %c0_42] : memref<256x1024xf32, #tpu.memory_space<vmem>>, vector<256x1024xf32>
    %cst_43 = arith.constant dense<0.000000e+00> : vector<8x1024xf32>
    %246 = tpu.matmul %244, %245, %cst_43 {dimension_numbers = #tpu.dot_dimension_numbers<[1], [0], [0], [1], [0, 0, 1, 1], [], []>} : vector<8x256xf32>, vector<256x1024xf32>, vector<8x1024xf32> -> vector<8x1024xf32>
    %247 = vector.extract_strided_slice %246 {offsets = [0, 512], sizes = [8, 512], strides = [1, 1]} : vector<8x1024xf32> to vector<8x512xf32>
    %248 = vector.broadcast %10 : vector<1x512xf32> to vector<8x512xf32>
    %249 = arith.addf %247, %248 : vector<8x512xf32>
    %250 = vector.extract_strided_slice %9 {offsets = [6, 0, 0], sizes = [1, 8, 512], strides = [1, 1, 1]} : vector<8x8x512xf32> to vector<1x8x512xf32>
    %251 = vector.shape_cast %250 : vector<1x8x512xf32> to vector<8x512xf32>
    %252 = vector.extract_strided_slice %246 {offsets = [0, 0], sizes = [8, 512], strides = [1, 1]} : vector<8x1024xf32> to vector<8x512xf32>
    %253 = arith.addf %251, %252 : vector<8x512xf32>
    %254 = tpu.concatenate %249, %253 in 0 : vector<8x512xf32>, vector<8x512xf32> -> vector<16x512xf32>
    %255 = tpu.concatenate %241, %243 in 0 : vector<8x128xf32>, vector<8x128xf32> -> vector<16x128xf32>
    %256 = vector.extract_strided_slice %254 {offsets = [0, 0], sizes = [16, 128], strides = [1, 1]} : vector<16x512xf32> to vector<16x128xf32>
    %257 = arith.negf %256 : vector<16x128xf32>
    %258 = math.exp %257 : vector<16x128xf32>
    %cst_44 = arith.constant 1.000000e+00 : f32
    %259 = vector.broadcast %cst_44 : f32 to vector<16x128xf32>
    %260 = arith.addf %259, %258 : vector<16x128xf32>
    %261 = arith.divf %259, %260 : vector<16x128xf32>
    %262 = vector.extract_strided_slice %254 {offsets = [0, 128], sizes = [16, 128], strides = [1, 1]} : vector<16x512xf32> to vector<16x128xf32>
    %263 = arith.negf %262 : vector<16x128xf32>
    %264 = math.exp %263 : vector<16x128xf32>
    %cst_45 = arith.constant 1.000000e+00 : f32
    %265 = vector.broadcast %cst_45 : f32 to vector<16x128xf32>
    %266 = arith.addf %265, %264 : vector<16x128xf32>
    %267 = arith.divf %265, %266 : vector<16x128xf32>
    %268 = vector.extract_strided_slice %254 {offsets = [0, 256], sizes = [16, 128], strides = [1, 1]} : vector<16x512xf32> to vector<16x128xf32>
    %269 = math.tanh %268 : vector<16x128xf32>
    %270 = vector.extract_strided_slice %254 {offsets = [0, 384], sizes = [16, 128], strides = [1, 1]} : vector<16x512xf32> to vector<16x128xf32>
    %271 = arith.negf %270 : vector<16x128xf32>
    %272 = math.exp %271 : vector<16x128xf32>
    %cst_46 = arith.constant 1.000000e+00 : f32
    %273 = vector.broadcast %cst_46 : f32 to vector<16x128xf32>
    %274 = arith.addf %273, %272 : vector<16x128xf32>
    %275 = arith.divf %273, %274 : vector<16x128xf32>
    %276 = arith.mulf %267, %255 : vector<16x128xf32>
    %277 = arith.mulf %261, %269 : vector<16x128xf32>
    %278 = arith.addf %276, %277 : vector<16x128xf32>
    %279 = math.tanh %278 : vector<16x128xf32>
    %280 = arith.mulf %275, %279 : vector<16x128xf32>
    %281 = vector.extract_strided_slice %280 {offsets = [0, 0], sizes = [8, 128], strides = [1, 1]} : vector<16x128xf32> to vector<8x128xf32>
    %282 = vector.extract_strided_slice %278 {offsets = [0, 0], sizes = [8, 128], strides = [1, 1]} : vector<16x128xf32> to vector<8x128xf32>
    %283 = vector.extract_strided_slice %280 {offsets = [8, 0], sizes = [8, 128], strides = [1, 1]} : vector<16x128xf32> to vector<8x128xf32>
    %284 = vector.extract_strided_slice %278 {offsets = [8, 0], sizes = [8, 128], strides = [1, 1]} : vector<16x128xf32> to vector<8x128xf32>
    %285 = tpu.concatenate %283, %281 in 1 : vector<8x128xf32>, vector<8x128xf32> -> vector<8x256xf32>
    %c0_47 = arith.constant 0 : index
    %c0_48 = arith.constant 0 : index
    %286 = vector.load %arg3[%c0_47, %c0_48] : memref<256x1024xf32, #tpu.memory_space<vmem>>, vector<256x1024xf32>
    %cst_49 = arith.constant dense<0.000000e+00> : vector<8x1024xf32>
    %287 = tpu.matmul %285, %286, %cst_49 {dimension_numbers = #tpu.dot_dimension_numbers<[1], [0], [0], [1], [0, 0, 1, 1], [], []>} : vector<8x256xf32>, vector<256x1024xf32>, vector<8x1024xf32> -> vector<8x1024xf32>
    %288 = vector.extract_strided_slice %287 {offsets = [0, 512], sizes = [8, 512], strides = [1, 1]} : vector<8x1024xf32> to vector<8x512xf32>
    %289 = vector.broadcast %10 : vector<1x512xf32> to vector<8x512xf32>
    %290 = arith.addf %288, %289 : vector<8x512xf32>
    %291 = vector.extract_strided_slice %9 {offsets = [7, 0, 0], sizes = [1, 8, 512], strides = [1, 1, 1]} : vector<8x8x512xf32> to vector<1x8x512xf32>
    %292 = vector.shape_cast %291 : vector<1x8x512xf32> to vector<8x512xf32>
    %293 = vector.extract_strided_slice %287 {offsets = [0, 0], sizes = [8, 512], strides = [1, 1]} : vector<8x1024xf32> to vector<8x512xf32>
    %294 = arith.addf %292, %293 : vector<8x512xf32>
    %295 = tpu.concatenate %290, %294 in 0 : vector<8x512xf32>, vector<8x512xf32> -> vector<16x512xf32>
    %296 = tpu.concatenate %282, %284 in 0 : vector<8x128xf32>, vector<8x128xf32> -> vector<16x128xf32>
    %297 = vector.extract_strided_slice %295 {offsets = [0, 0], sizes = [16, 128], strides = [1, 1]} : vector<16x512xf32> to vector<16x128xf32>
    %298 = arith.negf %297 : vector<16x128xf32>
    %299 = math.exp %298 : vector<16x128xf32>
    %cst_50 = arith.constant 1.000000e+00 : f32
    %300 = vector.broadcast %cst_50 : f32 to vector<16x128xf32>
    %301 = arith.addf %300, %299 : vector<16x128xf32>
    %302 = arith.divf %300, %301 : vector<16x128xf32>
    %303 = vector.extract_strided_slice %295 {offsets = [0, 128], sizes = [16, 128], strides = [1, 1]} : vector<16x512xf32> to vector<16x128xf32>
    %304 = arith.negf %303 : vector<16x128xf32>
    %305 = math.exp %304 : vector<16x128xf32>
    %cst_51 = arith.constant 1.000000e+00 : f32
    %306 = vector.broadcast %cst_51 : f32 to vector<16x128xf32>
    %307 = arith.addf %306, %305 : vector<16x128xf32>
    %308 = arith.divf %306, %307 : vector<16x128xf32>
    %309 = vector.extract_strided_slice %295 {offsets = [0, 256], sizes = [16, 128], strides = [1, 1]} : vector<16x512xf32> to vector<16x128xf32>
    %310 = math.tanh %309 : vector<16x128xf32>
    %311 = vector.extract_strided_slice %295 {offsets = [0, 384], sizes = [16, 128], strides = [1, 1]} : vector<16x512xf32> to vector<16x128xf32>
    %312 = arith.negf %311 : vector<16x128xf32>
    %313 = math.exp %312 : vector<16x128xf32>
    %cst_52 = arith.constant 1.000000e+00 : f32
    %314 = vector.broadcast %cst_52 : f32 to vector<16x128xf32>
    %315 = arith.addf %314, %313 : vector<16x128xf32>
    %316 = arith.divf %314, %315 : vector<16x128xf32>
    %317 = arith.mulf %308, %296 : vector<16x128xf32>
    %318 = arith.mulf %302, %310 : vector<16x128xf32>
    %319 = arith.addf %317, %318 : vector<16x128xf32>
    %320 = math.tanh %319 : vector<16x128xf32>
    %321 = arith.mulf %316, %320 : vector<16x128xf32>
    %322 = vector.extract_strided_slice %321 {offsets = [0, 0], sizes = [8, 128], strides = [1, 1]} : vector<16x128xf32> to vector<8x128xf32>
    %323 = vector.extract_strided_slice %319 {offsets = [0, 0], sizes = [8, 128], strides = [1, 1]} : vector<16x128xf32> to vector<8x128xf32>
    %324 = vector.extract_strided_slice %321 {offsets = [8, 0], sizes = [8, 128], strides = [1, 1]} : vector<16x128xf32> to vector<8x128xf32>
    %325 = tpu.concatenate %324, %322 in 1 : vector<8x128xf32>, vector<8x128xf32> -> vector<8x256xf32>
    %c0_53 = arith.constant 0 : index
    %c0_54 = arith.constant 0 : index
    %326 = vector.load %arg3[%c0_53, %c0_54] : memref<256x1024xf32, #tpu.memory_space<vmem>>, vector<256x1024xf32>
    %cst_55 = arith.constant dense<0.000000e+00> : vector<8x1024xf32>
    %327 = tpu.matmul %325, %326, %cst_55 {dimension_numbers = #tpu.dot_dimension_numbers<[1], [0], [0], [1], [0, 0, 1, 1], [], []>} : vector<8x256xf32>, vector<256x1024xf32>, vector<8x1024xf32> -> vector<8x1024xf32>
    %328 = vector.extract_strided_slice %327 {offsets = [0, 512], sizes = [8, 512], strides = [1, 1]} : vector<8x1024xf32> to vector<8x512xf32>
    %329 = vector.broadcast %10 : vector<1x512xf32> to vector<8x512xf32>
    %330 = arith.addf %328, %329 : vector<8x512xf32>
    %331 = vector.extract_strided_slice %330 {offsets = [0, 0], sizes = [8, 128], strides = [1, 1]} : vector<8x512xf32> to vector<8x128xf32>
    %332 = arith.negf %331 : vector<8x128xf32>
    %333 = math.exp %332 : vector<8x128xf32>
    %cst_56 = arith.constant 1.000000e+00 : f32
    %334 = vector.broadcast %cst_56 : f32 to vector<8x128xf32>
    %335 = arith.addf %334, %333 : vector<8x128xf32>
    %336 = arith.divf %334, %335 : vector<8x128xf32>
    %337 = vector.extract_strided_slice %330 {offsets = [0, 128], sizes = [8, 128], strides = [1, 1]} : vector<8x512xf32> to vector<8x128xf32>
    %338 = arith.negf %337 : vector<8x128xf32>
    %339 = math.exp %338 : vector<8x128xf32>
    %cst_57 = arith.constant 1.000000e+00 : f32
    %340 = vector.broadcast %cst_57 : f32 to vector<8x128xf32>
    %341 = arith.addf %340, %339 : vector<8x128xf32>
    %342 = arith.divf %340, %341 : vector<8x128xf32>
    %343 = vector.extract_strided_slice %330 {offsets = [0, 256], sizes = [8, 128], strides = [1, 1]} : vector<8x512xf32> to vector<8x128xf32>
    %344 = math.tanh %343 : vector<8x128xf32>
    %345 = vector.extract_strided_slice %330 {offsets = [0, 384], sizes = [8, 128], strides = [1, 1]} : vector<8x512xf32> to vector<8x128xf32>
    %346 = arith.negf %345 : vector<8x128xf32>
    %347 = math.exp %346 : vector<8x128xf32>
    %cst_58 = arith.constant 1.000000e+00 : f32
    %348 = vector.broadcast %cst_58 : f32 to vector<8x128xf32>
    %349 = arith.addf %348, %347 : vector<8x128xf32>
    %350 = arith.divf %348, %349 : vector<8x128xf32>
    %351 = arith.mulf %342, %323 : vector<8x128xf32>
    %352 = arith.mulf %336, %344 : vector<8x128xf32>
    %353 = arith.addf %351, %352 : vector<8x128xf32>
    %354 = math.tanh %353 : vector<8x128xf32>
    %355 = arith.mulf %350, %354 : vector<8x128xf32>
    %c0_59 = arith.constant 0 : index
    %c0_60 = arith.constant 0 : index
    %356 = vector.load %arg5[%c0_59, %c0_60] : memref<1x128xf32, #tpu.memory_space<vmem>>, vector<1x128xf32>
    %357 = vector.broadcast %356 : vector<1x128xf32> to vector<8x128xf32>
    %358 = arith.mulf %355, %357 : vector<8x128xf32>
    %cst_61 = arith.constant dense<0.000000e+00> : vector<8xf32>
    %359 = vector.multi_reduction <add>, %358, %cst_61 [1] : vector<8x128xf32> to vector<8xf32>
    %360 = vector.shape_cast %359 : vector<8xf32> to vector<8x1xf32>
    %c0_62 = arith.constant 0 : index
    %c0_63 = arith.constant 0 : index
    %361 = vector.load %arg6[%c0_62, %c0_63] : memref<1x1xf32, #tpu.memory_space<vmem>>, vector<1x1xf32>
    %362 = vector.broadcast %361 : vector<1x1xf32> to vector<8x1xf32>
    %363 = arith.addf %360, %362 : vector<8x1xf32>
    %c0_64 = arith.constant 0 : index
    %c0_65 = arith.constant 0 : index
    %364 = vector.load %arg7[%c0_64, %c0_65] : memref<8x1xf32, #tpu.memory_space<vmem>>, vector<8x1xf32>
    tpu.vector_store %arg7[%c0_64, %c0_65], %363 {strides = array<i32>} : memref<8x1xf32, #tpu.memory_space<vmem>>, vector<8x1xf32>,
    return
  }
}

</mosaic_0001>

<bundles_post_ra>
// kernel: tpu_custom_call.1
= control target key start
LH: loop header
LB: loop body
LE: loop exit
PB: predicated region body
PF: predicated region fallthrough
CT: control target
= control target key end

     0   :  { %s6885_s0 = inlined_call_operand.vmem [shape: f32[8,8,1], index: 0, kind: input, shape index: {}]   ;;  %s6886_s1 = inlined_call_operand.vmem [shape: f32[1,512], index: 1, kind: input, shape index: {}]   ;;  %s6887_s2 = inlined_call_operand.vmem [shape: f32[1,512], index: 2, kind: input, shape index: {}]   ;;  %s6888_s3 = inlined_call_operand.hbm [shape: f32[256,1024], index: 3, kind: input, shape index: {}]   ;;  %s6889_s4 = inlined_call_operand.vmem [shape: f32[1,512], index: 4, kind: input, shape index: {}]   ;;  %s6890_s5 = inlined_call_operand.vmem [shape: f32[1,128], index: 5, kind: input, shape index: {}]   ;;  %s6891_s6 = inlined_call_operand.<no memory space> [shape: f32[1,1], index: 6, kind: input, shape index: {}]   ;;  %s6892_s7 = inlined_call_operand.vmem [shape: f32[8,1], index: 7, kind: output, shape index: {}]  }
   0x1   :  { %v12_v0 = vstv %s6891_s6 }
   0x2   :  { %13 = vst [vmem:[#allocation2] sm:$0x1] %v12_v0 }
   0x3   :  { %14 = vsyncpa [#allocation4], 0  ;;  %s5332_s26 = smov [#allocation3]   ;;  %s5308_s30 = scalar_lea.hbm %s6888_s3, 32768 }
   0x4   :  { %s26_s27 = sshll.u32 %s5332_s26, 4  ;;  %p5309_p0 = scmp.ne.s32.totalorder %s6888_s3, %s5308_s30  ;;  %s27_s27 = int_to_ptr.vmem [resolvable:$true] %s26_s27 }
   0x5   :  { %p5312_p1 = scmp.lt.u32.totalorder %s5308_s30, %s6888_s3 }
   0x7   :  { %p5314_p2 = pnand %p5312_p1, %p5309_p0 }
   0x9   :  { %5317 = shalt.err (!%p5314_p2)
}
   0xa   :  { %s5318_s6 = scalar_lea.vmem %s27_s27, 32768  ;;  %p5323_p4 = scmp.lt.s32.totalorder %s27_s27, %s27_s27 }
   0xb   :  { %p5319_p3 = scmp.ne.s32.totalorder %s27_s27, %s5318_s6  ;;  %p5324_p5 = scmp.lt.s32.totalorder %s5318_s6, %s5318_s6 }
   0xd   :  { %p5325_p6 = por %p5324_p5, %p5323_p4 }
   0xf   :  { %p5326_p7 = pnand %p5325_p6, %p5319_p3 }
  0x11   :  { %5329 = shalt.err (!%p5326_p7)
}
  0x12   :  { %s5333_s12 = smov 1024   ;;  %s5334_s13 = smov 64  }
  0x13   :  { %32 = dma.hbm_to_vmem [thread:$0]  %s6888_s3, 32768, %s27_s27, [#allocation4], %s5333_s12, %s5333_s12, %s5334_s13  }
  0x14   :  { %5330 = dma.done.wait [#allocation4], 32768  }
  0x15   :  { %5331 = vsyncadd [#allocation4], 4294934528  ;;  %v5335_v1 = vmov 0   ;;  %v42_v2 = vld [vmem:[%s6885_s0] sm:$0xff]  ;;  %v43_v3 = vld [vmem:[%s6885_s0 + $0x8] sm:$0xff]  ;;  %vm3068_vm0 = vcmask 7168  }
  0x16   :  { %5050 = vset.pattern.permute.xlu0 %v5335_v1  ;;  %5051 = vset.pattern.permute.xlu1 %v5335_v1  ;;  %v224_v4 = vld [vmem:[#allocation3 + $0x8] sm:$0xff]  ;;  %v226_v7 = vld [vmem:[#allocation3 + $0x18] sm:$0xff]  ;;  %v223_v9 = vld [vmem:[#allocation3] sm:$0xff] }
  0x17   :  { %53 = vperm.xlu0 %5050, %v42_v2   ;;  %v232_v5 = vld [vmem:[#allocation3 + $0x48] sm:$0xff]  ;;  %v234_v8 = vld [vmem:[#allocation3 + $0x58] sm:$0xff]  ;;  %v231_v11 = vld [vmem:[#allocation3 + $0x40] sm:$0xff] }
  0x18   :  { %v5398_v6 = vpack.c.bf16 %v232_v5, %v224_v4  ;;  %v5400_v10 = vpack.c.bf16 %v234_v8, %v226_v7  ;;  %v225_v12 = vld [vmem:[#allocation3 + $0x10] sm:$0xff]  ;;  %v46_v14 = vld [vmem:[%s6885_s0 + $0x20] sm:$0xff]  ;;  %v5406_v15 = vpack.c.bf16 %v231_v11, %v223_v9  ;;  %v240_v17 = vld [vmem:[#allocation3 + $0x88] sm:$0xff] }
  0x19   :  { %v233_v13 = vld [vmem:[#allocation3 + $0x50] sm:$0xff]  ;;  %v248_v18 = vld [vmem:[#allocation3 + $0xc8] sm:$0xff]  ;;  %v242_v19 = vld [vmem:[#allocation3 + $0x98] sm:$0xff] }
  0x1a   :  { %7205 = vst [vmem:[#allocation6_spill] sm:$0xff] %v5398_v6  ;;  %7206 = vst [vmem:[#allocation7_spill] sm:$0xff] %v5400_v10  ;;  %3126 = vmatprep.subr.bf16.mxu0 %v5398_v6  ;;  %v5408_v16 = vpack.c.bf16 %v233_v13, %v225_v12  ;;  %3190 = vmatprep.subr.bf16.mxu1 %v5400_v10  ;;  %v5411_v20 = vpack.c.bf16 %v248_v18, %v240_v17  ;;  %v250_v21 = vld [vmem:[#allocation3 + $0xd8] sm:$0xff]  ;;  %v239_v22 = vld [vmem:[#allocation3 + $0x80] sm:$0xff] }
  0x1b   :  { %7207 = vst [vmem:[#allocation8_spill] sm:$0xff] %v5406_v15  ;;  %58 = vperm.xlu0 %5050, %v43_v3   ;;  %v247_v23 = vld [vmem:[#allocation3 + $0xc0] sm:$0xff]  ;;  %3128 = vmatpush1.bf16.msra.mxu0 %v5406_v15  ;;  %v5415_v24 = vpack.c.bf16 %v250_v21, %v242_v19  ;;  %v241_v26 = vld [vmem:[#allocation3 + $0x90] sm:$0xff]  ;;  %v256_v28 = vld [vmem:[#allocation3 + $0x108] sm:$0xff] }
  0x1c   :  { %7208 = vst [vmem:[#allocation9_spill] sm:$0xff] %v5408_v16  ;;  %7209 = vst [vmem:[#allocation10_spill] sm:$0xff] %v5411_v20  ;;  %3192 = vmatpush1.bf16.msra.mxu1 %v5408_v16  ;;  %v5417_v25 = vpack.c.bf16 %v247_v23, %v239_v22  ;;  %v249_v27 = vld [vmem:[#allocation3 + $0xd0] sm:$0xff]  ;;  %3130 = vmatprep.subr.bf16.mxu0 %v5411_v20  ;;  %v264_v30 = vld [vmem:[#allocation3 + $0x148] sm:$0xff] }
  0x1d   :  { %7210 = vst [vmem:[#allocation11_spill] sm:$0xff] %v5415_v24  ;;  %v5420_v29 = vpack.c.bf16 %v249_v27, %v241_v26  ;;  %v258_v31 = vld [vmem:[#allocation3 + $0x118] sm:$0xff]  ;;  %v48_v33 = vld [vmem:[%s6885_s0 + $0x30] sm:$0xff]  ;;  %3194 = vmatprep.subr.bf16.mxu1 %v5415_v24  ;;  %v5426_v34 = vpack.c.bf16 %v264_v30, %v256_v28  ;;  %v255_v36 = vld [vmem:[#allocation3 + $0x100] sm:$0xff] }
  0x1e   :  { %7211 = vst [vmem:[#allocation12_spill] sm:$0xff] %v5417_v25  ;;  %v266_v32 = vld [vmem:[#allocation3 + $0x158] sm:$0xff]  ;;  %v263_v37 = vld [vmem:[#allocation3 + $0x140] sm:$0xff]  ;;  %v257_v38 = vld [vmem:[#allocation3 + $0x110] sm:$0xff] }
  0x1f   :  { %7212 = vst [vmem:[#allocation13_spill] sm:$0xff] %v5420_v29  ;;  %7213 = vst [vmem:[#allocation14_spill] sm:$0xff] %v5426_v34  ;;  %v5428_v35 = vpack.c.bf16 %v266_v32, %v258_v31  ;;  %73 = vperm.xlu0 %5050, %v46_v14   ;;  %v265_v39 = vld [vmem:[#allocation3 + $0x150] sm:$0xff]  ;;  %v272_v40 = vld [vmem:[#allocation3 + $0x188] sm:$0xff]  ;;  %3132 = vmatpush1.bf16.msra.mxu0 %v5417_v25  ;;  %v5432_v42 = vpack.c.bf16 %v263_v37, %v255_v36 }
  0x20   :  { %v280_v41 = vld [vmem:[#allocation3 + $0x1c8] sm:$0xff]  ;;  %3196 = vmatpush1.bf16.msra.mxu1 %v5420_v29  ;;  %v5434_v43 = vpack.c.bf16 %v265_v39, %v257_v38  ;;  %v274_v44 = vld [vmem:[#allocation3 + $0x198] sm:$0xff]  ;;  %v271_v46 = vld [vmem:[#allocation3 + $0x180] sm:$0xff]  ;;  %3134 = vmatprep.subr.bf16.mxu0 %v5426_v34 }
  0x21   :  { %7214 = vst [vmem:[#allocation15_spill] sm:$0xff] %v5428_v35  ;;  %7215 = vst [vmem:[#allocation16_spill] sm:$0xff] %v5432_v42  ;;  %v282_v45 = vld [vmem:[#allocation3 + $0x1d8] sm:$0xff]  ;;  %3198 = vmatprep.subr.bf16.mxu1 %v5428_v35  ;;  %v5438_v47 = vpack.c.bf16 %v280_v41, %v272_v40  ;;  %v279_v49 = vld [vmem:[#allocation3 + $0x1c0] sm:$0xff] }
  0x22   :  { %7216 = vst [vmem:[#allocation17_spill] sm:$0xff] %v5434_v43  ;;  %v5440_v48 = vpack.c.bf16 %v282_v45, %v274_v44  ;;  %v273_v50 = vld [vmem:[#allocation3 + $0x190] sm:$0xff]  ;;  %v288_v52 = vld [vmem:[#allocation3 + $0x208] sm:$0xff]  ;;  %v290_v54 = vld [vmem:[#allocation3 + $0x218] sm:$0xff]  ;;  %v5444_v56 = vpack.c.bf16 %v279_v49, %v271_v46 }
  0x23   :  { %7217 = vst [vmem:[#allocation18_spill] sm:$0xff] %v5438_v47  ;;  %v281_v51 = vld [vmem:[#allocation3 + $0x1d0] sm:$0xff]  ;;  %v296_v53 = vld [vmem:[#allocation3 + $0x248] sm:$0xff]  ;;  %83 = vperm.xlu0 %5050, %v48_v33   ;;  %v298_v55 = vld [vmem:[#allocation3 + $0x258] sm:$0xff]  ;;  %3136 = vmatpush1.bf16.msra.mxu0 %v5432_v42 }
  0x24   :  { %7218 = vst [vmem:[#allocation19_spill] sm:$0xff] %v5440_v48  ;;  %3200 = vmatpush1.bf16.msra.mxu1 %v5434_v43  ;;  %7219 = vst [vmem:[#allocation20_spill] sm:$0xff] %v5444_v56  ;;  %v5446_v57 = vpack.c.bf16 %v281_v51, %v273_v50  ;;  %v287_v58 = vld [vmem:[#allocation3 + $0x200] sm:$0xff]  ;;  %3138 = vmatprep.subr.bf16.mxu0 %v5438_v47  ;;  %v5450_v60 = vpack.c.bf16 %v296_v53, %v288_v52  ;;  %v289_v62 = vld [vmem:[#allocation3 + $0x210] sm:$0xff] }
  0x25   :  { %v295_v59 = vld [vmem:[#allocation3 + $0x240] sm:$0xff]  ;;  %3202 = vmatprep.subr.bf16.mxu1 %v5440_v48  ;;  %v5452_v61 = vpack.c.bf16 %v298_v55, %v290_v54  ;;  %v297_v63 = vld [vmem:[#allocation3 + $0x250] sm:$0xff]  ;;  %v304_v0 = vld [vmem:[#allocation3 + $0x288] sm:$0xff] }
  0x26   :  { %7220 = vst [vmem:[#allocation21_spill] sm:$0xff] %v5446_v57  ;;  %7221 = vst [vmem:[#allocation22_spill] sm:$0xff] %v5450_v60  ;;  %v312_v1 = vld [vmem:[#allocation3 + $0x2c8] sm:$0xff]  ;;  %v306_v2 = vld [vmem:[#allocation3 + $0x298] sm:$0xff]  ;;  %v5456_v4 = vpack.c.bf16 %v295_v59, %v287_v58  ;;  %v5458_v5 = vpack.c.bf16 %v297_v63, %v289_v62 }
  0x27   :  { %7222 = vst [vmem:[#allocation23_spill] sm:$0xff] %v5452_v61  ;;  %v314_v3 = vld [vmem:[#allocation3 + $0x2d8] sm:$0xff]  ;;  %3140 = vmatpush1.bf16.msra.mxu0 %v5444_v56  ;;  %v303_v7 = vld [vmem:[#allocation3 + $0x280] sm:$0xff]  ;;  %v5462_v9 = vpack.c.bf16 %v312_v1, %v304_v0  ;;  %v305_v12 = vld [vmem:[#allocation3 + $0x290] sm:$0xff] }
  0x28   :  { %3204 = vmatpush1.bf16.msra.mxu1 %v5446_v57  ;;  %7223 = vst [vmem:[#allocation24_spill] sm:$0xff] %v5456_v4  ;;  %7224 = vst [vmem:[#allocation25_spill] sm:$0xff] %v5458_v5  ;;  %v311_v8 = vld [vmem:[#allocation3 + $0x2c0] sm:$0xff]  ;;  %3142 = vmatprep.subr.bf16.mxu0 %v5450_v60  ;;  %v5464_v11 = vpack.c.bf16 %v314_v3, %v306_v2  ;;  %v313_v13 = vld [vmem:[#allocation3 + $0x2d0] sm:$0xff] }
  0x29   :  { %3206 = vmatprep.subr.bf16.mxu1 %v5452_v61  ;;  %7225 = vst [vmem:[#allocation26_spill] sm:$0xff] %v5462_v9  ;;  %v320_v14 = vld [vmem:[#allocation3 + $0x308] sm:$0xff]  ;;  %v322_v18 = vld [vmem:[#allocation3 + $0x318] sm:$0xff]  ;;  %v5468_v21 = vpack.c.bf16 %v311_v8, %v303_v7  ;;  %v5470_v22 = vpack.c.bf16 %v313_v13, %v305_v12  ;;  %v319_v23 = vld [vmem:[#allocation3 + $0x300] sm:$0xff] }
  0x2a   :  { %7226 = vst [vmem:[#allocation27_spill] sm:$0xff] %v5464_v11  ;;  %v328_v17 = vld [vmem:[#allocation3 + $0x348] sm:$0xff]  ;;  %v330_v19 = vld [vmem:[#allocation3 + $0x358] sm:$0xff]  ;;  %v327_v26 = vld [vmem:[#allocation3 + $0x340] sm:$0xff] }
  0x2b   :  { %3144 = vmatpush1.bf16.msra.mxu0 %v5456_v4  ;;  %7227 = vst [vmem:[#allocation28_spill] sm:$0xff] %v5468_v21  ;;  %7228 = vst [vmem:[#allocation29_spill] sm:$0xff] %v5470_v22  ;;  %v5474_v27 = vpack.c.bf16 %v328_v17, %v320_v14  ;;  %v5476_v28 = vpack.c.bf16 %v330_v19, %v322_v18  ;;  %v321_v30 = vld [vmem:[#allocation3 + $0x310] sm:$0xff]  ;;  %v336_v32 = vld [vmem:[#allocation3 + $0x388] sm:$0xff]  ;;  %v5480_v38 = vpack.c.bf16 %v327_v26, %v319_v23 }
  0x2c   :  { %3208 = vmatpush1.bf16.msra.mxu1 %v5458_v5  ;;  %3146 = vmatprep.subr.bf16.mxu0 %v5462_v9  ;;  %v329_v31 = vld [vmem:[#allocation3 + $0x350] sm:$0xff]  ;;  %v344_v33 = vld [vmem:[#allocation3 + $0x3c8] sm:$0xff]  ;;  %v338_v36 = vld [vmem:[#allocation3 + $0x398] sm:$0xff] }
  0x2d   :  { %3210 = vmatprep.subr.bf16.mxu1 %v5464_v11  ;;  %7229 = vst [vmem:[#allocation30_spill] sm:$0xff] %v5474_v27  ;;  %7230 = vst [vmem:[#allocation31_spill] sm:$0xff] %v5476_v28  ;;  %v346_v37 = vld [vmem:[#allocation3 + $0x3d8] sm:$0xff]  ;;  %v5482_v39 = vpack.c.bf16 %v329_v31, %v321_v30  ;;  %v335_v40 = vld [vmem:[#allocation3 + $0x380] sm:$0xff]  ;;  %v5486_v44 = vpack.c.bf16 %v344_v33, %v336_v32 }
  0x2e   :  { %7231 = vst [vmem:[#allocation32_spill] sm:$0xff] %v5480_v38  ;;  %v343_v41 = vld [vmem:[#allocation3 + $0x3c0] sm:$0xff]  ;;  %v5488_v45 = vpack.c.bf16 %v346_v37, %v338_v36  ;;  %v337_v46 = vld [vmem:[#allocation3 + $0x390] sm:$0xff]  ;;  %v352_v50 = vld [vmem:[#allocation3 + $0x408] sm:$0xff]  ;;  %v6893_v36 = vmov 0.0  }
  0x2f   :  { %3148 = vmatpush1.bf16.msra.mxu0 %v5468_v21  ;;  %7232 = vst [vmem:[#allocation33_spill] sm:$0xff] %v5482_v39  ;;  %7233 = vst [vmem:[#allocation34_spill] sm:$0xff] %v5486_v44  ;;  %v345_v49 = vld [vmem:[#allocation3 + $0x3d0] sm:$0xff]  ;;  %v360_v51 = vld [vmem:[#allocation3 + $0x448] sm:$0xff]  ;;  %v5492_v54 = vpack.c.bf16 %v343_v41, %v335_v40  ;;  %543 = vmatprep.mubr.f32.mxu0 %v6893_v36 }
  0x30   :  { %3212 = vmatpush1.bf16.msra.mxu1 %v5470_v22  ;;  %3150 = vmatprep.subr.bf16.mxu0 %v5474_v27  ;;  %7234 = vst [vmem:[#allocation35_spill] sm:$0xff] %v5488_v45  ;;  %v354_v52 = vld [vmem:[#allocation3 + $0x418] sm:$0xff]  ;;  %v5494_v55 = vpack.c.bf16 %v345_v49, %v337_v46  ;;  %v351_v58 = vld [vmem:[#allocation3 + $0x400] sm:$0xff]  ;;  %v5498_v62 = vpack.c.bf16 %v360_v51, %v352_v50  ;;  %v353_v0 = vld [vmem:[#allocation3 + $0x410] sm:$0xff] }
  0x31   :  { %3214 = vmatprep.subr.bf16.mxu1 %v5476_v28  ;;  %v362_v53 = vld [vmem:[#allocation3 + $0x458] sm:$0xff]  ;;  %7235 = vst [vmem:[#allocation36_spill] sm:$0xff] %v5492_v54  ;;  %v359_v59 = vld [vmem:[#allocation3 + $0x440] sm:$0xff]  ;;  %v361_v1 = vld [vmem:[#allocation3 + $0x450] sm:$0xff]  ;;  %614 = vmatprep.mubr.f32.mxu1 %v6893_v36 }
  0x32   :  { %7236 = vst [vmem:[#allocation37_spill] sm:$0xff] %v5494_v55  ;;  %7237 = vst [vmem:[#allocation38_spill] sm:$0xff] %v5498_v62  ;;  %v5500_v63 = vpack.c.bf16 %v362_v53, %v354_v52  ;;  %v368_v2 = vld [vmem:[#allocation3 + $0x488] sm:$0xff]  ;;  %v370_v7 = vld [vmem:[#allocation3 + $0x498] sm:$0xff]  ;;  %v5504_v12 = vpack.c.bf16 %v359_v59, %v351_v58  ;;  %v5506_v13 = vpack.c.bf16 %v361_v1, %v353_v0 }
  0x33   :  { %3152 = vmatpush1.bf16.msra.mxu0 %v5480_v38  ;;  %v376_v3 = vld [vmem:[#allocation3 + $0x4c8] sm:$0xff]  ;;  %v378_v8 = vld [vmem:[#allocation3 + $0x4d8] sm:$0xff]  ;;  %v367_v14 = vld [vmem:[#allocation3 + $0x480] sm:$0xff] }
  0x34   :  { %3216 = vmatpush1.bf16.msra.mxu1 %v5482_v39  ;;  %3154 = vmatprep.subr.bf16.mxu0 %v5486_v44  ;;  %7238 = vst [vmem:[#allocation39_spill] sm:$0xff] %v5500_v63  ;;  %7239 = vst [vmem:[#allocation40_spill] sm:$0xff] %v5504_v12  ;;  %v375_v17 = vld [vmem:[#allocation3 + $0x4c0] sm:$0xff]  ;;  %v5510_v18 = vpack.c.bf16 %v376_v3, %v368_v2  ;;  %v5512_v19 = vpack.c.bf16 %v378_v8, %v370_v7  ;;  %v369_v23 = vld [vmem:[#allocation3 + $0x490] sm:$0xff] }
  0x35   :  { %3218 = vmatprep.subr.bf16.mxu1 %v5488_v45  ;;  %7240 = vst [vmem:[#allocation41_spill] sm:$0xff] %v5506_v13  ;;  %v377_v26 = vld [vmem:[#allocation3 + $0x4d0] sm:$0xff]  ;;  %v384_v30 = vld [vmem:[#allocation3 + $0x508] sm:$0xff]  ;;  %v386_v32 = vld [vmem:[#allocation3 + $0x518] sm:$0xff]  ;;  %v5518_v37 = vpack.c.bf16 %v375_v17, %v367_v14 }
  0x36   :  { %7241 = vst [vmem:[#allocation42_spill] sm:$0xff] %v5510_v18  ;;  %7242 = vst [vmem:[#allocation43_spill] sm:$0xff] %v5512_v19  ;;  %v392_v31 = vld [vmem:[#allocation3 + $0x548] sm:$0xff]  ;;  %v394_v33 = vld [vmem:[#allocation3 + $0x558] sm:$0xff]  ;;  %v5520_v40 = vpack.c.bf16 %v377_v26, %v369_v23 }
  0x37   :  { %3156 = vmatpush1.bf16.msra.mxu0 %v5492_v54  ;;  %7243 = vst [vmem:[#allocation44_spill] sm:$0xff] %v5518_v37  ;;  %v383_v41 = vld [vmem:[#allocation3 + $0x500] sm:$0xff]  ;;  %v5524_v49 = vpack.c.bf16 %v392_v31, %v384_v30  ;;  %v5526_v50 = vpack.c.bf16 %v394_v33, %v386_v32  ;;  %v385_v51 = vld [vmem:[#allocation3 + $0x510] sm:$0xff]  ;;  %v400_v53 = vld [vmem:[#allocation3 + $0x588] sm:$0xff] }
  0x38   :  { %3220 = vmatpush1.bf16.msra.mxu1 %v5494_v55  ;;  %3158 = vmatprep.subr.bf16.mxu0 %v5498_v62  ;;  %7244 = vst [vmem:[#allocation45_spill] sm:$0xff] %v5520_v40  ;;  %v391_v46 = vld [vmem:[#allocation3 + $0x540] sm:$0xff]  ;;  %v393_v52 = vld [vmem:[#allocation3 + $0x550] sm:$0xff]  ;;  %v408_v58 = vld [vmem:[#allocation3 + $0x5c8] sm:$0xff] }
  0x39   :  { %3222 = vmatprep.subr.bf16.mxu1 %v5500_v63  ;;  %7245 = vst [vmem:[#allocation46_spill] sm:$0xff] %v5524_v49  ;;  %7246 = vst [vmem:[#allocation47_spill] sm:$0xff] %v5526_v50  ;;  %v402_v59 = vld [vmem:[#allocation3 + $0x598] sm:$0xff]  ;;  %v5530_v1 = vpack.c.bf16 %v391_v46, %v383_v41  ;;  %v5532_v2 = vpack.c.bf16 %v393_v52, %v385_v51  ;;  %v399_v3 = vld [vmem:[#allocation3 + $0x580] sm:$0xff]  ;;  %v5536_v8 = vpack.c.bf16 %v408_v58, %v400_v53 }
  0x3a   :  { %v410_v0 = vld [vmem:[#allocation3 + $0x5d8] sm:$0xff]  ;;  %v407_v7 = vld [vmem:[#allocation3 + $0x5c0] sm:$0xff]  ;;  %v401_v17 = vld [vmem:[#allocation3 + $0x590] sm:$0xff] }
  0x3b   :  { %3160 = vmatpush1.bf16.msra.mxu0 %v5504_v12  ;;  %7247 = vst [vmem:[#allocation48_spill] sm:$0xff] %v5530_v1  ;;  %7248 = vst [vmem:[#allocation49_spill] sm:$0xff] %v5532_v2  ;;  %v5538_v14 = vpack.c.bf16 %v410_v0, %v402_v59  ;;  %v409_v23 = vld [vmem:[#allocation3 + $0x5d0] sm:$0xff]  ;;  %v416_v26 = vld [vmem:[#allocation3 + $0x608] sm:$0xff]  ;;  %v5542_v33 = vpack.c.bf16 %v407_v7, %v399_v3 }
  0x3c   :  { %3224 = vmatpush1.bf16.msra.mxu1 %v5506_v13  ;;  %3162 = vmatprep.subr.bf16.mxu0 %v5510_v18  ;;  %7249 = vst [vmem:[#allocation50_spill] sm:$0xff] %v5536_v8  ;;  %v424_v30 = vld [vmem:[#allocation3 + $0x648] sm:$0xff]  ;;  %v418_v31 = vld [vmem:[#allocation3 + $0x618] sm:$0xff]  ;;  %v5544_v41 = vpack.c.bf16 %v409_v23, %v401_v17  ;;  %v415_v46 = vld [vmem:[#allocation3 + $0x600] sm:$0xff] }
  0x3d   :  { %3226 = vmatprep.subr.bf16.mxu1 %v5512_v19  ;;  %7250 = vst [vmem:[#allocation51_spill] sm:$0xff] %v5538_v14  ;;  %v426_v32 = vld [vmem:[#allocation3 + $0x658] sm:$0xff]  ;;  %7251 = vst [vmem:[#allocation52_spill] sm:$0xff] %v5542_v33  ;;  %v423_v51 = vld [vmem:[#allocation3 + $0x640] sm:$0xff]  ;;  %v5548_v52 = vpack.c.bf16 %v424_v30, %v416_v26 }
  0x3e   :  { %7252 = vst [vmem:[#allocation53_spill] sm:$0xff] %v5544_v41  ;;  %v5550_v53 = vpack.c.bf16 %v426_v32, %v418_v31  ;;  %v417_v58 = vld [vmem:[#allocation3 + $0x610] sm:$0xff]  ;;  %v432_v0 = vld [vmem:[#allocation3 + $0x688] sm:$0xff]  ;;  %v5554_v3 = vpack.c.bf16 %v423_v51, %v415_v46  ;;  %v431_v17 = vld [vmem:[#allocation3 + $0x680] sm:$0xff] }
  0x3f   :  { %3164 = vmatpush1.bf16.msra.mxu0 %v5518_v37  ;;  %7253 = vst [vmem:[#allocation54_spill] sm:$0xff] %v5548_v52  ;;  %v425_v59 = vld [vmem:[#allocation3 + $0x650] sm:$0xff]  ;;  %v440_v36 = vld [vmem:[#allocation3 + $0x6c8] sm:$0xff]  ;;  %v439_v23 = vld [vmem:[#allocation3 + $0x6c0] sm:$0xff] }
  0x40   :  { %3228 = vmatpush1.bf16.msra.mxu1 %v5520_v40  ;;  %3166 = vmatprep.subr.bf16.mxu0 %v5524_v49  ;;  %7254 = vst [vmem:[#allocation55_spill] sm:$0xff] %v5550_v53  ;;  %7255 = vst [vmem:[#allocation56_spill] sm:$0xff] %v5554_v3  ;;  %v5556_v7 = vpack.c.bf16 %v425_v59, %v417_v58  ;;  %v5560_v26 = vpack.c.bf16 %v440_v36, %v432_v0  ;;  %v433_v31 = vld [vmem:[#allocation3 + $0x690] sm:$0xff]  ;;  %v447_v58 = vld [vmem:[#allocation3 + $0x700] sm:$0xff] }
  0x41   :  { %3230 = vmatprep.subr.bf16.mxu1 %v5526_v50  ;;  %v441_v32 = vld [vmem:[#allocation3 + $0x6d0] sm:$0xff]  ;;  %v5566_v46 = vpack.c.bf16 %v439_v23, %v431_v17  ;;  %v455_v59 = vld [vmem:[#allocation3 + $0x740] sm:$0xff]  ;;  %v270_v50 = vld [vmem:[#allocation3 + $0x178] sm:$0xff] }
  0x42   :  { %7256 = vst [vmem:[#allocation57_spill] sm:$0xff] %v5556_v7  ;;  %7257 = vst [vmem:[#allocation58_spill] sm:$0xff] %v5560_v26  ;;  %v5568_v51 = vpack.c.bf16 %v441_v32, %v433_v31  ;;  %v457_v0 = vld [vmem:[#allocation3 + $0x750] sm:$0xff]  ;;  %v5578_v17 = vpack.c.bf16 %v455_v59, %v447_v58  ;;  %v463_v31 = vld [vmem:[#allocation3 + $0x780] sm:$0xff] }
  0x43   :  { %3168 = vmatpush1.bf16.msra.mxu0 %v5530_v1  ;;  %v434_v1 = vld [vmem:[#allocation3 + $0x698] sm:$0xff]  ;;  %7259 = vst [vmem:[#allocation60_spill] sm:$0xff] %v5566_v46  ;;  %v471_v32 = vld [vmem:[#allocation3 + $0x7c0] sm:$0xff] }
  0x44   :  { %3232 = vmatpush1.bf16.msra.mxu1 %v5532_v2  ;;  %3170 = vmatprep.subr.bf16.mxu0 %v5536_v8  ;;  %v442_v2 = vld [vmem:[#allocation3 + $0x6d8] sm:$0xff]  ;;  %7260 = vst [vmem:[#allocation61_spill] sm:$0xff] %v5568_v51  ;;  %7263 = vst [vmem:[#allocation64_spill] sm:$0xff] %v5578_v17  ;;  %v5590_v58 = vpack.c.bf16 %v471_v32, %v463_v31 }
  0x45   :  { %3234 = vmatprep.subr.bf16.mxu1 %v5538_v14  ;;  %v5562_v30 = vpack.c.bf16 %v442_v2, %v434_v1  ;;  %v448_v14 = vld [vmem:[#allocation3 + $0x708] sm:$0xff]  ;;  %v450_v8 = vld [vmem:[#allocation3 + $0x718] sm:$0xff]  ;;  %v449_v2 = vld [vmem:[#allocation3 + $0x710] sm:$0xff] }
  0x46   :  { %v5580_v23 = vpack.c.bf16 %v457_v0, %v449_v2  ;;  %7267 = vst [vmem:[#allocation68_spill] sm:$0xff] %v5590_v58 }
  0x47   :  { %3172 = vmatpush1.bf16.msra.mxu0 %v5542_v33  ;;  %7258 = vst [vmem:[#allocation59_spill] sm:$0xff] %v5562_v30  ;;  %v456_v33 = vld [vmem:[#allocation3 + $0x748] sm:$0xff] }
  0x48   :  { %3236 = vmatpush1.bf16.msra.mxu1 %v5544_v41  ;;  %3174 = vmatprep.subr.bf16.mxu0 %v5548_v52  ;;  %v458_v41 = vld [vmem:[#allocation3 + $0x758] sm:$0xff]  ;;  %v5572_v36 = vpack.c.bf16 %v456_v33, %v448_v14  ;;  %7264 = vst [vmem:[#allocation65_spill] sm:$0xff] %v5580_v23  ;;  %v465_v33 = vld [vmem:[#allocation3 + $0x790] sm:$0xff] }
  0x49   :  { %3238 = vmatprep.subr.bf16.mxu1 %v5550_v53  ;;  %v5574_v1 = vpack.c.bf16 %v458_v41, %v450_v8  ;;  %v464_v53 = vld [vmem:[#allocation3 + $0x788] sm:$0xff]  ;;  %v466_v52 = vld [vmem:[#allocation3 + $0x798] sm:$0xff]  ;;  %v473_v41 = vld [vmem:[#allocation3 + $0x7d0] sm:$0xff] }
  0x4a   :  { %7261 = vst [vmem:[#allocation62_spill] sm:$0xff] %v5572_v36  ;;  %v5592_v59 = vpack.c.bf16 %v473_v41, %v465_v33 }
  0x4b   :  { %3176 = vmatpush1.bf16.msra.mxu0 %v5554_v3  ;;  %7262 = vst [vmem:[#allocation63_spill] sm:$0xff] %v5574_v1  ;;  %v472_v3 = vld [vmem:[#allocation3 + $0x7c8] sm:$0xff] }
  0x4c   :  { %3240 = vmatpush1.bf16.msra.mxu1 %v5556_v7  ;;  %3178 = vmatprep.subr.bf16.mxu0 %v5560_v26  ;;  %v474_v7 = vld [vmem:[#allocation3 + $0x7d8] sm:$0xff]  ;;  %v5584_v8 = vpack.c.bf16 %v472_v3, %v464_v53  ;;  %7268 = vst [vmem:[#allocation69_spill] sm:$0xff] %v5592_v59  ;;  %v92_v3 = vlaneseq }
  0x4d   :  { %3242 = vmatprep.subr.bf16.mxu1 %v5562_v30  ;;  %v5586_v14 = vpack.c.bf16 %v474_v7, %v466_v52  ;;  %v228_v30 = vld [vmem:[#allocation3 + $0x28] sm:$0xff]  ;;  %v230_v26 = vld [vmem:[#allocation3 + $0x38] sm:$0xff] }
  0x4e   :  { %7265 = vst [vmem:[#allocation66_spill] sm:$0xff] %v5584_v8  ;;  %v93_v7 = vshrl.u32 %v92_v3, 7 }
  0x4f   :  { %3180 = vmatpush1.bf16.msra.mxu0 %v5566_v46  ;;  %7266 = vst [vmem:[#allocation67_spill] sm:$0xff] %v5586_v14  ;;  %v236_v46 = vld [vmem:[#allocation3 + $0x68] sm:$0xff] }
  0x50   :  { %3244 = vmatpush1.bf16.msra.mxu1 %v5568_v51  ;;  %3182 = vmatprep.subr.bf16.mxu0 %v5572_v36  ;;  %v238_v51 = vld [vmem:[#allocation3 + $0x78] sm:$0xff]  ;;  %v5596_v52 = vpack.c.bf16 %v236_v46, %v228_v30  ;;  %v5604_v2 = vsub.s32 0, %v93_v7  ;;  %v5606_v0 = vsub.s32 1, %v93_v7  ;;  %v5620_v31 = vsub.s32 3, %v93_v7 }
  0x51   :  { %3246 = vmatprep.subr.bf16.mxu1 %v5574_v1  ;;  %v5598_v53 = vpack.c.bf16 %v238_v51, %v230_v26  ;;  %v50_v30 = vld [vmem:[%s6886_s1] sm:$0xf]  ;;  %v268_v1 = vld [vmem:[#allocation3 + $0x168] sm:$0xff] }
  0x52   :  { %7269 = vst [vmem:[#allocation70_spill] sm:$0xff] %v5596_v52  ;;  %7271 = vst [vmem:[#allocation72_spill] sm:$0xff] %v5604_v2  ;;  %v144_v26 = vld [vmem:[%s6887_s2] sm:$0xf]  ;;  %v5615_v46 = vrot.slane %v50_v30, %v5604_v2  ;;  %v5618_v51 = vrot.slane %v50_v30, %v5606_v0 }
  0x53   :  { %3184 = vmatpush1.bf16.msra.mxu0 %v5578_v17  ;;  %7270 = vst [vmem:[#allocation71_spill] sm:$0xff] %v5598_v53  ;;  %7272 = vst [vmem:[#allocation73_spill] sm:$0xff] %v5606_v0  ;;  %v5623_v32 = vrot.slane %v144_v26, %v5604_v2  ;;  %v5626_v33 = vrot.slane %v144_v26, %v5606_v0  ;;  %v260_v17 = vld [vmem:[#allocation3 + $0x128] sm:$0xff]  ;;  %v262_v36 = vld [vmem:[#allocation3 + $0x138] sm:$0xff] }
  0x54   :  { %3248 = vmatpush1.bf16.msra.mxu1 %v5580_v23  ;;  %3186 = vmatprep.subr.bf16.mxu0 %v5584_v8  ;;  %7273 = vst [vmem:[#allocation74_spill] sm:$0xff] %v5615_v46  ;;  %7274 = vst [vmem:[#allocation75_spill] sm:$0xff] %v5618_v51  ;;  %v5638_v23 = vrot.slane %v144_v26, %v5620_v31 }
  0x55   :  { %3250 = vmatprep.subr.bf16.mxu1 %v5586_v14  ;;  %7275 = vst [vmem:[#allocation76_spill] sm:$0xff] %v5620_v31  ;;  %7276 = vst [vmem:[#allocation77_spill] sm:$0xff] %v5623_v32 }
  0x56   :  { %7277 = vst [vmem:[#allocation78_spill] sm:$0xff] %v5626_v33  ;;  %7280 = vst [vmem:[#allocation81_spill] sm:$0xff] %v5638_v23 }
  0x57   :  { %3188 = vmatpush1.bf16.msra.mxu0 %v5590_v58 }
  0x58   :  { %3252 = vmatpush1.bf16.msra.mxu1 %v5592_v59  ;;  %3254 = vmatprep.subr.bf16.mxu0 %v5596_v52  ;;  %v5631_v52 = vrot.slane %v50_v30, %v5620_v31  ;;  %v5633_v59 = vsub.s32 2, %v93_v7 }
  0x59   :  { %3318 = vmatprep.subr.bf16.mxu1 %v5598_v53 }
  0x5a   :  { %7278 = vst [vmem:[#allocation79_spill] sm:$0xff] %v5631_v52  ;;  %7279 = vst [vmem:[#allocation80_spill] sm:$0xff] %v5633_v59  ;;  %v5646_v7 = vrot.slane %v144_v26, %v5633_v59 }
  0x5c   :  { %7282 = vst [vmem:[#allocation83_spill] sm:$0xff] %v5646_v7 }
  0x96   :  { %v54_v41 = vpop.permute.xlu0 %53 }
  0x97   :  { %v112_v3 = vmul.f32 %v5615_v46, %v54_v41  ;;  %v113_v53 = vmul.f32 %v5618_v51, %v54_v41  ;;  %v115_v0 = vmul.f32 %v5631_v52, %v54_v41  ;;  %v5642_v46 = vrot.slane %v50_v30, %v5633_v59 }
  0x99   :  { %v166_v58 = vadd.f32 %v5623_v32, %v112_v3  ;;  %v167_v14 = vadd.f32 %v5626_v33, %v113_v53  ;;  %7281 = vst [vmem:[#allocation82_spill] sm:$0xff] %v5642_v46  ;;  %v169_v51 = vadd.f32 %v5638_v23, %v115_v0  ;;  %v114_v3 = vmul.f32 %v5642_v46, %v54_v41  ;;  %v235_v41 = vld [vmem:[#allocation3 + $0x60] sm:$0xff] }
  0x9b   :  { %v3075_v8 = vmul.f32 -1.442695, %v166_v58  ;;  %v3076_v2 = vmul.f32 -1.442695, %v167_v14  ;;  %v3077_v53 = vmul.f32 -1.442695, %v169_v51  ;;  %v168_v14 = vadd.f32 %v5646_v7, %v114_v3 }
  0x9c   :  { %v227_v51 = vld [vmem:[#allocation3 + $0x20] sm:$0xff]  ;;  %v229_v3 = vld [vmem:[#allocation3 + $0x30] sm:$0xff] }
  0x9d   :  { %5052 = vpow2.f32 %v3075_v8  ;;  %v5653_v46 = vpack.c.bf16 %v235_v41, %v227_v51  ;;  %v259_v41 = vld [vmem:[#allocation3 + $0x120] sm:$0xff] }
  0x9e   :  { %5054 = vpow2.f32 %v3076_v2 }
  0x9f   :  { %5056 = vpow2.f32 %v3077_v53  ;;  %v237_v53 = vld [vmem:[#allocation3 + $0x70] sm:$0xff]  ;;  %7284 = vst [vmem:[#allocation85_spill] sm:$0xff] %v5653_v46 }
  0xa0   :  { %5058 = vtanh.f32 %v168_v14  ;;  %v252_v14 = vld [vmem:[#allocation3 + $0xe8] sm:$0xff] }
  0xa7   :  { %v5053_v58 = vpop.eup %5052 }
  0xa8   :  { %v5055_v31 = vpop.eup %5054  ;;  %v202_v33 = vadd.f32 1.0, %v5053_v58 }
  0xa9   :  { %v208_v52 = vadd.f32 1.0, %v5055_v31  ;;  %v5057_v8 = vpop.eup %5056  ;;  %v244_v31 = vld [vmem:[#allocation3 + $0xa8] sm:$0xff] }
  0xaa   :  { %5060 = vrcp.f32 %v202_v33  ;;  %v5059_v2 = vpop.eup %5058  ;;  %v215_v23 = vadd.f32 1.0, %v5057_v8  ;;  %v246_v33 = vld [vmem:[#allocation3 + $0xb8] sm:$0xff]  ;;  %v5655_v8 = vpack.c.bf16 %v237_v53, %v229_v3  ;;  %v267_v3 = vld [vmem:[#allocation3 + $0x160] sm:$0xff]  ;;  %v5673_v53 = vpack.c.bf16 %v268_v1, %v260_v17 }
  0xab   :  { %5062 = vrcp.f32 %v208_v52  ;;  %v254_v52 = vld [vmem:[#allocation3 + $0xf8] sm:$0xff] }
  0xac   :  { %5064 = vrcp.f32 %v215_v23  ;;  %7285 = vst [vmem:[#allocation86_spill] sm:$0xff] %v5655_v8  ;;  %v5659_v23 = vpack.c.bf16 %v252_v14, %v244_v31  ;;  %7290 = vst [vmem:[#allocation91_spill] sm:$0xff] %v5673_v53  ;;  %v5675_v31 = vpack.c.bf16 %v270_v50, %v262_v36  ;;  %v261_v14 = vld [vmem:[#allocation3 + $0x130] sm:$0xff]  ;;  %v275_v50 = vld [vmem:[#allocation3 + $0x1a0] sm:$0xff] }
  0xad   :  { %v283_v36 = vld [vmem:[#allocation3 + $0x1e0] sm:$0xff] }
  0xae   :  { %7286 = vst [vmem:[#allocation87_spill] sm:$0xff] %v5659_v23  ;;  %7291 = vst [vmem:[#allocation92_spill] sm:$0xff] %v5675_v31 }
  0xb4   :  { %v5061_v30 = vpop.eup %5060 }
  0xb5   :  { %v5063_v0 = vpop.eup %5062  ;;  %v219_v26 = vmul.f32 %v5061_v30, %v5059_v2  ;;  %v243_v2 = vld [vmem:[#allocation3 + $0xa0] sm:$0xff] }
  0xb6   :  { %v218_v59 = vmul.f32 0.0, %v5063_v0  ;;  %v5065_v58 = vpop.eup %5064  ;;  %v5661_v0 = vpack.c.bf16 %v254_v52, %v246_v33  ;;  %v269_v33 = vld [vmem:[#allocation3 + $0x170] sm:$0xff]  ;;  %v276_v52 = vld [vmem:[#allocation3 + $0x1a8] sm:$0xff] }
  0xb7   :  { %v5683_v1 = vpack.c.bf16 %v269_v33, %v261_v14  ;;  %v291_v14 = vld [vmem:[#allocation3 + $0x220] sm:$0xff] }
  0xb8   :  { %v5650_v32 = vadd.f32 %v219_v26, %v218_v59  ;;  %v251_v59 = vld [vmem:[#allocation3 + $0xe0] sm:$0xff]  ;;  %7287 = vst [vmem:[#allocation88_spill] sm:$0xff] %v5661_v0  ;;  %v245_v26 = vld [vmem:[#allocation3 + $0xb0] sm:$0xff] }
  0xb9   :  { %7294 = vst [vmem:[#allocation94_spill] sm:$0xff] %v5683_v1  ;;  %v299_v33 = vld [vmem:[#allocation3 + $0x260] sm:$0xff] }
  0xba   :  { %7283 = vst [vmem:[#allocation84_spill] sm:$0xff] %v5650_v32  ;;  %5066 = vtanh.f32 %v5650_v32  ;;  %v253_v32 = vld [vmem:[#allocation3 + $0xf0] sm:$0xff] }
  0xbb   :  { %v5669_v51 = vpack.c.bf16 %v253_v32, %v245_v26  ;;  %v5681_v32 = vpack.c.bf16 %v267_v3, %v259_v41  ;;  %v277_v26 = vld [vmem:[#allocation3 + $0x1b0] sm:$0xff]  ;;  %v5693_v41 = vpack.c.bf16 %v283_v36, %v275_v50  ;;  %v5705_v50 = vpack.c.bf16 %v299_v33, %v291_v14 }
  0xbd   :  { %7289 = vst [vmem:[#allocation90_spill] sm:$0xff] %v5669_v51  ;;  %7293 = vst [vmem:[#allocation93_spill] sm:$0xff] %v5681_v32 }
  0xbe   :  { %7297 = vst [vmem:[#allocation97_spill] sm:$0xff] %v5693_v41  ;;  %7301 = vst [vmem:[#allocation101_spill] sm:$0xff] %v5705_v50 }
  0xc4   :  { %v5067_v7 = vpop.eup %5066 }
  0xc5   :  { %v5657_v30 = vmul.f32 %v5067_v7, %v5065_v58  ;;  %v5667_v7 = vpack.c.bf16 %v251_v59, %v243_v2  ;;  %v284_v58 = vld [vmem:[#allocation3 + $0x1e8] sm:$0xff]  ;;  %v7292_v2 = vmov 0.0  }
  0xc6   :  { %v5687_v17 = vpack.c.bf16 %v284_v58, %v276_v52  ;;  %v293_v52 = vld [vmem:[#allocation3 + $0x230] sm:$0xff] }
  0xc7   :  { %544 = vmatmul.mubr.f32.vlgmr.msra.gmra.mrb[0].mxu0 %v5657_v30  ;;  %615 = vmatmul.mubr.f32.vlgmr.msra.gmra.mrb[0].mxu1 %v5657_v30  ;;  %7288 = vst [vmem:[#allocation89_spill] sm:$0xff] %v5667_v7  ;;  %v301_v58 = vld [vmem:[#allocation3 + $0x270] sm:$0xff] }
  0xc8   :  { %3256 = vmatpush1.bf16.msra.mxu0 %v5653_v46  ;;  %3320 = vmatpush1.bf16.msra.mxu1 %v5655_v8  ;;  %v278_v46 = vld [vmem:[#allocation3 + $0x1b8] sm:$0xff]  ;;  %7295 = vst [vmem:[#allocation95_spill] sm:$0xff] %v5687_v17  ;;  %v5707_v36 = vpack.c.bf16 %v301_v58, %v293_v52  ;;  %v323_v52 = vld [vmem:[#allocation3 + $0x320] sm:$0xff] }
  0xc9   :  { %3258 = vmatprep.subr.bf16.mxu0 %v5659_v23  ;;  %3322 = vmatprep.subr.bf16.mxu1 %v5661_v0  ;;  %v286_v8 = vld [vmem:[#allocation3 + $0x1f8] sm:$0xff]  ;;  %v292_v0 = vld [vmem:[#allocation3 + $0x228] sm:$0xff]  ;;  %v331_v58 = vld [vmem:[#allocation3 + $0x360] sm:$0xff] }
  0xca   :  { %685 = vmatprep.mubr.f32.mxu0 %v7292_v2  ;;  %756 = vmatprep.mubr.f32.mxu1 %v7292_v2  ;;  %v5689_v59 = vpack.c.bf16 %v286_v8, %v278_v46  ;;  %v285_v2 = vld [vmem:[#allocation3 + $0x1f0] sm:$0xff]  ;;  %v294_v23 = vld [vmem:[#allocation3 + $0x238] sm:$0xff]  ;;  %7302 = vst [vmem:[#allocation102_spill] sm:$0xff] %v5707_v36 }
  0xcb   :  { %v5695_v3 = vpack.c.bf16 %v285_v2, %v277_v26  ;;  %v307_v26 = vld [vmem:[#allocation3 + $0x2a0] sm:$0xff] }
  0xcc   :  { %3260 = vmatpush1.bf16.msra.mxu0 %v5667_v7  ;;  %3324 = vmatpush1.bf16.msra.mxu1 %v5669_v51  ;;  %7296 = vst [vmem:[#allocation96_spill] sm:$0xff] %v5689_v59  ;;  %v300_v7 = vld [vmem:[#allocation3 + $0x268] sm:$0xff]  ;;  %v302_v51 = vld [vmem:[#allocation3 + $0x278] sm:$0xff]  ;;  %v315_v2 = vld [vmem:[#allocation3 + $0x2e0] sm:$0xff] }
  0xcd   :  { %3262 = vmatprep.subr.bf16.mxu0 %v5673_v53  ;;  %3326 = vmatprep.subr.bf16.mxu1 %v5675_v31  ;;  %7298 = vst [vmem:[#allocation98_spill] sm:$0xff] %v5695_v3  ;;  %v5699_v46 = vpack.c.bf16 %v300_v7, %v292_v0  ;;  %v5701_v8 = vpack.c.bf16 %v302_v51, %v294_v23  ;;  %v308_v31 = vld [vmem:[#allocation3 + $0x2a8] sm:$0xff]  ;;  %v310_v53 = vld [vmem:[#allocation3 + $0x2b8] sm:$0xff]  ;;  %v309_v7 = vld [vmem:[#allocation3 + $0x2b0] sm:$0xff] }
  0xce   :  { %v317_v51 = vld [vmem:[#allocation3 + $0x2f0] sm:$0xff]  ;;  %v5717_v14 = vpack.c.bf16 %v315_v2, %v307_v26  ;;  %v5729_v26 = vpack.c.bf16 %v331_v58, %v323_v52 }
  0xcf   :  { %7299 = vst [vmem:[#allocation99_spill] sm:$0xff] %v5699_v46  ;;  %7300 = vst [vmem:[#allocation100_spill] sm:$0xff] %v5701_v8  ;;  %v5719_v33 = vpack.c.bf16 %v317_v51, %v309_v7  ;;  %v339_v7 = vld [vmem:[#allocation3 + $0x3a0] sm:$0xff] }
  0xd0   :  { %3264 = vmatpush1.bf16.msra.mxu0 %v5681_v32  ;;  %3328 = vmatpush1.bf16.msra.mxu1 %v5683_v1  ;;  %v316_v32 = vld [vmem:[#allocation3 + $0x2e8] sm:$0xff]  ;;  %v318_v1 = vld [vmem:[#allocation3 + $0x2f8] sm:$0xff]  ;;  %7305 = vst [vmem:[#allocation105_spill] sm:$0xff] %v5717_v14  ;;  %7309 = vst [vmem:[#allocation109_spill] sm:$0xff] %v5729_v26 }
  0xd1   :  { %3266 = vmatprep.subr.bf16.mxu0 %v5687_v17  ;;  %3330 = vmatprep.subr.bf16.mxu1 %v5689_v59  ;;  %v5711_v23 = vpack.c.bf16 %v316_v32, %v308_v31  ;;  %v5713_v0 = vpack.c.bf16 %v318_v1, %v310_v53  ;;  %v324_v59 = vld [vmem:[#allocation3 + $0x328] sm:$0xff]  ;;  %v326_v17 = vld [vmem:[#allocation3 + $0x338] sm:$0xff]  ;;  %7306 = vst [vmem:[#allocation106_spill] sm:$0xff] %v5719_v33  ;;  %v325_v32 = vld [vmem:[#allocation3 + $0x330] sm:$0xff] }
  0xd2   :  { %v333_v1 = vld [vmem:[#allocation3 + $0x370] sm:$0xff]  ;;  %v347_v51 = vld [vmem:[#allocation3 + $0x3e0] sm:$0xff] }
  0xd3   :  { %7303 = vst [vmem:[#allocation103_spill] sm:$0xff] %v5711_v23  ;;  %7304 = vst [vmem:[#allocation104_spill] sm:$0xff] %v5713_v0  ;;  %v5731_v2 = vpack.c.bf16 %v333_v1, %v325_v32  ;;  %v5741_v52 = vpack.c.bf16 %v347_v51, %v339_v7  ;;  %v355_v32 = vld [vmem:[#allocation3 + $0x420] sm:$0xff] }
  0xd4   :  { %3268 = vmatpush1.bf16.msra.mxu0 %v5693_v41  ;;  %3332 = vmatpush1.bf16.msra.mxu1 %v5695_v3  ;;  %v332_v41 = vld [vmem:[#allocation3 + $0x368] sm:$0xff]  ;;  %v334_v3 = vld [vmem:[#allocation3 + $0x378] sm:$0xff]  ;;  %v363_v1 = vld [vmem:[#allocation3 + $0x460] sm:$0xff] }
  0xd5   :  { %3270 = vmatprep.subr.bf16.mxu0 %v5699_v46  ;;  %3334 = vmatprep.subr.bf16.mxu1 %v5701_v8  ;;  %v5723_v53 = vpack.c.bf16 %v332_v41, %v324_v59  ;;  %v5725_v31 = vpack.c.bf16 %v334_v3, %v326_v17  ;;  %v340_v8 = vld [vmem:[#allocation3 + $0x3a8] sm:$0xff]  ;;  %v342_v46 = vld [vmem:[#allocation3 + $0x3b8] sm:$0xff]  ;;  %7310 = vst [vmem:[#allocation110_spill] sm:$0xff] %v5731_v2  ;;  %v341_v41 = vld [vmem:[#allocation3 + $0x3b0] sm:$0xff] }
  0xd6   :  { %v349_v3 = vld [vmem:[#allocation3 + $0x3f0] sm:$0xff]  ;;  %7313 = vst [vmem:[#allocation113_spill] sm:$0xff] %v5741_v52  ;;  %v5753_v7 = vpack.c.bf16 %v363_v1, %v355_v32 }
  0xd7   :  { %7307 = vst [vmem:[#allocation107_spill] sm:$0xff] %v5723_v53  ;;  %7308 = vst [vmem:[#allocation108_spill] sm:$0xff] %v5725_v31  ;;  %v5743_v58 = vpack.c.bf16 %v349_v3, %v341_v41  ;;  %v371_v41 = vld [vmem:[#allocation3 + $0x4a0] sm:$0xff] }
  0xd8   :  { %3272 = vmatpush1.bf16.msra.mxu0 %v5705_v50  ;;  %3336 = vmatpush1.bf16.msra.mxu1 %v5707_v36  ;;  %v348_v50 = vld [vmem:[#allocation3 + $0x3e8] sm:$0xff]  ;;  %v350_v36 = vld [vmem:[#allocation3 + $0x3f8] sm:$0xff]  ;;  %7317 = vst [vmem:[#allocation117_spill] sm:$0xff] %v5753_v7  ;;  %v379_v3 = vld [vmem:[#allocation3 + $0x4e0] sm:$0xff] }
  0xd9   :  { %3274 = vmatprep.subr.bf16.mxu0 %v5711_v23  ;;  %3338 = vmatprep.subr.bf16.mxu1 %v5713_v0  ;;  %v5735_v17 = vpack.c.bf16 %v348_v50, %v340_v8  ;;  %v5737_v59 = vpack.c.bf16 %v350_v36, %v342_v46  ;;  %v356_v0 = vld [vmem:[#allocation3 + $0x428] sm:$0xff]  ;;  %v358_v23 = vld [vmem:[#allocation3 + $0x438] sm:$0xff]  ;;  %7314 = vst [vmem:[#allocation114_spill] sm:$0xff] %v5743_v58  ;;  %v357_v50 = vld [vmem:[#allocation3 + $0x430] sm:$0xff] }
  0xda   :  { %v365_v36 = vld [vmem:[#allocation3 + $0x470] sm:$0xff]  ;;  %v5765_v32 = vpack.c.bf16 %v379_v3, %v371_v41 }
  0xdb   :  { %7311 = vst [vmem:[#allocation111_spill] sm:$0xff] %v5735_v17  ;;  %7312 = vst [vmem:[#allocation112_spill] sm:$0xff] %v5737_v59  ;;  %v5755_v51 = vpack.c.bf16 %v365_v36, %v357_v50  ;;  %v387_v50 = vld [vmem:[#allocation3 + $0x520] sm:$0xff] }
  0xdc   :  { %3276 = vmatpush1.bf16.msra.mxu0 %v5717_v14  ;;  %3340 = vmatpush1.bf16.msra.mxu1 %v5719_v33  ;;  %v364_v14 = vld [vmem:[#allocation3 + $0x468] sm:$0xff]  ;;  %v366_v33 = vld [vmem:[#allocation3 + $0x478] sm:$0xff]  ;;  %7321 = vst [vmem:[#allocation121_spill] sm:$0xff] %v5765_v32  ;;  %v395_v36 = vld [vmem:[#allocation3 + $0x560] sm:$0xff] }
  0xdd   :  { %3278 = vmatprep.subr.bf16.mxu0 %v5723_v53  ;;  %3342 = vmatprep.subr.bf16.mxu1 %v5725_v31  ;;  %v5747_v46 = vpack.c.bf16 %v364_v14, %v356_v0  ;;  %v5749_v8 = vpack.c.bf16 %v366_v33, %v358_v23  ;;  %v372_v31 = vld [vmem:[#allocation3 + $0x4a8] sm:$0xff]  ;;  %v374_v53 = vld [vmem:[#allocation3 + $0x4b8] sm:$0xff]  ;;  %7318 = vst [vmem:[#allocation118_spill] sm:$0xff] %v5755_v51  ;;  %v373_v14 = vld [vmem:[#allocation3 + $0x4b0] sm:$0xff] }
  0xde   :  { %v381_v33 = vld [vmem:[#allocation3 + $0x4f0] sm:$0xff]  ;;  %v5777_v41 = vpack.c.bf16 %v395_v36, %v387_v50 }
  0xdf   :  { %7315 = vst [vmem:[#allocation115_spill] sm:$0xff] %v5747_v46  ;;  %7316 = vst [vmem:[#allocation116_spill] sm:$0xff] %v5749_v8  ;;  %v5767_v1 = vpack.c.bf16 %v381_v33, %v373_v14  ;;  %v403_v14 = vld [vmem:[#allocation3 + $0x5a0] sm:$0xff] }
  0xe0   :  { %3280 = vmatpush1.bf16.msra.mxu0 %v5729_v26  ;;  %3344 = vmatpush1.bf16.msra.mxu1 %v5731_v2  ;;  %v380_v26 = vld [vmem:[#allocation3 + $0x4e8] sm:$0xff]  ;;  %v382_v2 = vld [vmem:[#allocation3 + $0x4f8] sm:$0xff]  ;;  %7325 = vst [vmem:[#allocation125_spill] sm:$0xff] %v5777_v41  ;;  %v411_v33 = vld [vmem:[#allocation3 + $0x5e0] sm:$0xff] }
  0xe1   :  { %3282 = vmatprep.subr.bf16.mxu0 %v5735_v17  ;;  %3346 = vmatprep.subr.bf16.mxu1 %v5737_v59  ;;  %v5759_v23 = vpack.c.bf16 %v380_v26, %v372_v31  ;;  %v5761_v0 = vpack.c.bf16 %v382_v2, %v374_v53  ;;  %v388_v59 = vld [vmem:[#allocation3 + $0x528] sm:$0xff]  ;;  %v390_v17 = vld [vmem:[#allocation3 + $0x538] sm:$0xff]  ;;  %7322 = vst [vmem:[#allocation122_spill] sm:$0xff] %v5767_v1  ;;  %v389_v26 = vld [vmem:[#allocation3 + $0x530] sm:$0xff] }
  0xe2   :  { %v397_v2 = vld [vmem:[#allocation3 + $0x570] sm:$0xff]  ;;  %v5789_v50 = vpack.c.bf16 %v411_v33, %v403_v14 }
  0xe3   :  { %7319 = vst [vmem:[#allocation119_spill] sm:$0xff] %v5759_v23  ;;  %7320 = vst [vmem:[#allocation120_spill] sm:$0xff] %v5761_v0  ;;  %v5779_v3 = vpack.c.bf16 %v397_v2, %v389_v26  ;;  %v419_v26 = vld [vmem:[#allocation3 + $0x620] sm:$0xff] }
  0xe4   :  { %3284 = vmatpush1.bf16.msra.mxu0 %v5741_v52  ;;  %3348 = vmatpush1.bf16.msra.mxu1 %v5743_v58  ;;  %v396_v52 = vld [vmem:[#allocation3 + $0x568] sm:$0xff]  ;;  %v398_v58 = vld [vmem:[#allocation3 + $0x578] sm:$0xff]  ;;  %7329 = vst [vmem:[#allocation129_spill] sm:$0xff] %v5789_v50  ;;  %v427_v2 = vld [vmem:[#allocation3 + $0x660] sm:$0xff] }
  0xe5   :  { %3286 = vmatprep.subr.bf16.mxu0 %v5747_v46  ;;  %3350 = vmatprep.subr.bf16.mxu1 %v5749_v8  ;;  %v5771_v53 = vpack.c.bf16 %v396_v52, %v388_v59  ;;  %v5773_v31 = vpack.c.bf16 %v398_v58, %v390_v17  ;;  %v404_v8 = vld [vmem:[#allocation3 + $0x5a8] sm:$0xff]  ;;  %v406_v46 = vld [vmem:[#allocation3 + $0x5b8] sm:$0xff]  ;;  %7326 = vst [vmem:[#allocation126_spill] sm:$0xff] %v5779_v3  ;;  %v405_v52 = vld [vmem:[#allocation3 + $0x5b0] sm:$0xff] }
  0xe6   :  { %v413_v58 = vld [vmem:[#allocation3 + $0x5f0] sm:$0xff]  ;;  %v5801_v14 = vpack.c.bf16 %v427_v2, %v419_v26 }
  0xe7   :  { %7323 = vst [vmem:[#allocation123_spill] sm:$0xff] %v5771_v53  ;;  %7324 = vst [vmem:[#allocation124_spill] sm:$0xff] %v5773_v31  ;;  %v5791_v36 = vpack.c.bf16 %v413_v58, %v405_v52  ;;  %v435_v52 = vld [vmem:[#allocation3 + $0x6a0] sm:$0xff] }
  0xe8   :  { %3288 = vmatpush1.bf16.msra.mxu0 %v5753_v7  ;;  %3352 = vmatpush1.bf16.msra.mxu1 %v5755_v51  ;;  %v412_v7 = vld [vmem:[#allocation3 + $0x5e8] sm:$0xff]  ;;  %v414_v51 = vld [vmem:[#allocation3 + $0x5f8] sm:$0xff]  ;;  %7333 = vst [vmem:[#allocation133_spill] sm:$0xff] %v5801_v14  ;;  %v443_v58 = vld [vmem:[#allocation3 + $0x6e0] sm:$0xff] }
  0xe9   :  { %3290 = vmatprep.subr.bf16.mxu0 %v5759_v23  ;;  %3354 = vmatprep.subr.bf16.mxu1 %v5761_v0  ;;  %v5783_v17 = vpack.c.bf16 %v412_v7, %v404_v8  ;;  %v5785_v59 = vpack.c.bf16 %v414_v51, %v406_v46  ;;  %v420_v0 = vld [vmem:[#allocation3 + $0x628] sm:$0xff]  ;;  %v422_v23 = vld [vmem:[#allocation3 + $0x638] sm:$0xff]  ;;  %7330 = vst [vmem:[#allocation130_spill] sm:$0xff] %v5791_v36  ;;  %v421_v7 = vld [vmem:[#allocation3 + $0x630] sm:$0xff] }
  0xea   :  { %v429_v51 = vld [vmem:[#allocation3 + $0x670] sm:$0xff]  ;;  %v5813_v26 = vpack.c.bf16 %v443_v58, %v435_v52 }
  0xeb   :  { %7327 = vst [vmem:[#allocation127_spill] sm:$0xff] %v5783_v17  ;;  %7328 = vst [vmem:[#allocation128_spill] sm:$0xff] %v5785_v59  ;;  %v5803_v33 = vpack.c.bf16 %v429_v51, %v421_v7  ;;  %v451_v7 = vld [vmem:[#allocation3 + $0x720] sm:$0xff] }
  0xec   :  { %3292 = vmatpush1.bf16.msra.mxu0 %v5765_v32  ;;  %3356 = vmatpush1.bf16.msra.mxu1 %v5767_v1  ;;  %v428_v32 = vld [vmem:[#allocation3 + $0x668] sm:$0xff]  ;;  %v430_v1 = vld [vmem:[#allocation3 + $0x678] sm:$0xff]  ;;  %7337 = vst [vmem:[#allocation137_spill] sm:$0xff] %v5813_v26  ;;  %v459_v51 = vld [vmem:[#allocation3 + $0x760] sm:$0xff] }
  0xed   :  { %3294 = vmatprep.subr.bf16.mxu0 %v5771_v53  ;;  %3358 = vmatprep.subr.bf16.mxu1 %v5773_v31  ;;  %v5795_v46 = vpack.c.bf16 %v428_v32, %v420_v0  ;;  %v5797_v8 = vpack.c.bf16 %v430_v1, %v422_v23  ;;  %v436_v31 = vld [vmem:[#allocation3 + $0x6a8] sm:$0xff]  ;;  %v438_v53 = vld [vmem:[#allocation3 + $0x6b8] sm:$0xff]  ;;  %7334 = vst [vmem:[#allocation134_spill] sm:$0xff] %v5803_v33  ;;  %v437_v32 = vld [vmem:[#allocation3 + $0x6b0] sm:$0xff] }
  0xee   :  { %v445_v1 = vld [vmem:[#allocation3 + $0x6f0] sm:$0xff]  ;;  %v5825_v52 = vpack.c.bf16 %v459_v51, %v451_v7 }
  0xef   :  { %7331 = vst [vmem:[#allocation131_spill] sm:$0xff] %v5795_v46  ;;  %7332 = vst [vmem:[#allocation132_spill] sm:$0xff] %v5797_v8  ;;  %v5815_v2 = vpack.c.bf16 %v445_v1, %v437_v32  ;;  %v467_v32 = vld [vmem:[#allocation3 + $0x7a0] sm:$0xff]  ;;  %v477_v1 = vld [vmem:[#allocation3 + $0x7f0] sm:$0xff] }
  0xf0   :  { %3296 = vmatpush1.bf16.msra.mxu0 %v5777_v41  ;;  %3360 = vmatpush1.bf16.msra.mxu1 %v5779_v3  ;;  %v444_v41 = vld [vmem:[#allocation3 + $0x6e8] sm:$0xff]  ;;  %v446_v3 = vld [vmem:[#allocation3 + $0x6f8] sm:$0xff]  ;;  %7341 = vst [vmem:[#allocation141_spill] sm:$0xff] %v5825_v52 }
  0xf1   :  { %3298 = vmatprep.subr.bf16.mxu0 %v5783_v17  ;;  %3362 = vmatprep.subr.bf16.mxu1 %v5785_v59  ;;  %v5807_v23 = vpack.c.bf16 %v444_v41, %v436_v31  ;;  %v5809_v0 = vpack.c.bf16 %v446_v3, %v438_v53  ;;  %v452_v59 = vld [vmem:[#allocation3 + $0x728] sm:$0xff]  ;;  %v454_v17 = vld [vmem:[#allocation3 + $0x738] sm:$0xff]  ;;  %7338 = vst [vmem:[#allocation138_spill] sm:$0xff] %v5815_v2  ;;  %v453_v41 = vld [vmem:[#allocation3 + $0x730] sm:$0xff] }
  0xf2   :  { %v461_v3 = vld [vmem:[#allocation3 + $0x770] sm:$0xff] }
  0xf3   :  { %7335 = vst [vmem:[#allocation135_spill] sm:$0xff] %v5807_v23  ;;  %7336 = vst [vmem:[#allocation136_spill] sm:$0xff] %v5809_v0  ;;  %v5827_v58 = vpack.c.bf16 %v461_v3, %v453_v41  ;;  %v7352_v41 = vld [vmem:[#allocation52_spill] sm:$0xff]  ;;  %v7353_v3 = vld [vmem:[#allocation53_spill] sm:$0xff] }
  0xf4   :  { %3300 = vmatpush1.bf16.msra.mxu0 %v5789_v50  ;;  %3364 = vmatpush1.bf16.msra.mxu1 %v5791_v36  ;;  %v460_v50 = vld [vmem:[#allocation3 + $0x768] sm:$0xff]  ;;  %v462_v36 = vld [vmem:[#allocation3 + $0x778] sm:$0xff] }
  0xf5   :  { %3302 = vmatprep.subr.bf16.mxu0 %v5795_v46  ;;  %3366 = vmatprep.subr.bf16.mxu1 %v5797_v8  ;;  %v5819_v53 = vpack.c.bf16 %v460_v50, %v452_v59  ;;  %v5821_v31 = vpack.c.bf16 %v462_v36, %v454_v17  ;;  %v468_v8 = vld [vmem:[#allocation3 + $0x7a8] sm:$0xff]  ;;  %v470_v46 = vld [vmem:[#allocation3 + $0x7b8] sm:$0xff]  ;;  %7342 = vst [vmem:[#allocation142_spill] sm:$0xff] %v5827_v58  ;;  %v475_v50 = vld [vmem:[#allocation3 + $0x7e0] sm:$0xff] }
  0xf6   :  { %v469_v36 = vld [vmem:[#allocation3 + $0x7b0] sm:$0xff]  ;;  %v5837_v7 = vpack.c.bf16 %v475_v50, %v467_v32  ;;  %v7354_v32 = vld [vmem:[#allocation54_spill] sm:$0xff]  ;;  %v7355_v50 = vld [vmem:[#allocation55_spill] sm:$0xff] }
  0xf7   :  { %7339 = vst [vmem:[#allocation139_spill] sm:$0xff] %v5819_v53  ;;  %7340 = vst [vmem:[#allocation140_spill] sm:$0xff] %v5821_v31  ;;  %v5839_v51 = vpack.c.bf16 %v477_v1, %v469_v36  ;;  %v7356_v36 = vld [vmem:[#allocation56_spill] sm:$0xff]  ;;  %v7357_v1 = vld [vmem:[#allocation57_spill] sm:$0xff] }
  0xf8   :  { %3304 = vmatpush1.bf16.msra.mxu0 %v5801_v14  ;;  %3368 = vmatpush1.bf16.msra.mxu1 %v5803_v33  ;;  %v476_v14 = vld [vmem:[#allocation3 + $0x7e8] sm:$0xff]  ;;  %v478_v33 = vld [vmem:[#allocation3 + $0x7f8] sm:$0xff]  ;;  %7345 = vst [vmem:[#allocation145_spill] sm:$0xff] %v5837_v7 }
  0xf9   :  { %3306 = vmatprep.subr.bf16.mxu0 %v5807_v23  ;;  %3370 = vmatprep.subr.bf16.mxu1 %v5809_v0  ;;  %v5831_v17 = vpack.c.bf16 %v476_v14, %v468_v8  ;;  %v5833_v59 = vpack.c.bf16 %v478_v33, %v470_v46  ;;  %7346 = vst [vmem:[#allocation146_spill] sm:$0xff] %v5839_v51  ;;  %v7348_v46 = vld [vmem:[#allocation48_spill] sm:$0xff]  ;;  %v7349_v8 = vld [vmem:[#allocation49_spill] sm:$0xff]  ;;  %v7350_v14 = vld [vmem:[#allocation50_spill] sm:$0xff] }
  0xfa   :  { %v7351_v33 = vld [vmem:[#allocation51_spill] sm:$0xff] }
  0xfb   :  { %7343 = vst [vmem:[#allocation143_spill] sm:$0xff] %v5831_v17  ;;  %7344 = vst [vmem:[#allocation144_spill] sm:$0xff] %v5833_v59 }
  0xfc   :  { %3308 = vmatpush1.bf16.msra.mxu0 %v5813_v26  ;;  %3372 = vmatpush1.bf16.msra.mxu1 %v5815_v2 }
  0xfd   :  { %3310 = vmatprep.subr.bf16.mxu0 %v5819_v53  ;;  %3374 = vmatprep.subr.bf16.mxu1 %v5821_v31 }
 0x100   :  { %3312 = vmatpush1.bf16.msra.mxu0 %v5825_v52  ;;  %3376 = vmatpush1.bf16.msra.mxu1 %v5827_v58 }
 0x101   :  { %3314 = vmatprep.subr.bf16.mxu0 %v5831_v17  ;;  %3378 = vmatprep.subr.bf16.mxu1 %v5833_v59 }
 0x104   :  { %3316 = vmatpush1.bf16.msra.mxu0 %v5837_v7  ;;  %3380 = vmatpush1.bf16.msra.mxu1 %v5839_v51 }
 0x105   :  { %3382 = vmatprep.subr.bf16.mxu0 %v5398_v6  ;;  %3446 = vmatprep.subr.bf16.mxu1 %v5400_v10 }
 0x107   :  { %686 = vmatmul.mubr.f32.vlgmr.msra.gmra.mrb[2].mxu0 %v5657_v30  ;;  %757 = vmatmul.mubr.f32.vlgmr.msra.gmra.mrb[2].mxu1 %v5657_v30  ;;  %v7347_v30 = vld [vmem:[#allocation47_spill] sm:$0xff] }
 0x108   :  { %3384 = vmatpush1.bf16.msra.mxu0 %v5406_v15  ;;  %3448 = vmatpush1.bf16.msra.mxu1 %v5408_v16 }
 0x109   :  { %3386 = vmatprep.subr.bf16.mxu0 %v5411_v20  ;;  %3450 = vmatprep.subr.bf16.mxu1 %v5415_v24 }
 0x10c   :  { %3388 = vmatpush1.bf16.msra.mxu0 %v5417_v25  ;;  %3452 = vmatpush1.bf16.msra.mxu1 %v5420_v29 }
 0x10d   :  { %3390 = vmatprep.subr.bf16.mxu0 %v5426_v34  ;;  %3454 = vmatprep.subr.bf16.mxu1 %v5428_v35 }
 0x110   :  { %3392 = vmatpush1.bf16.msra.mxu0 %v5432_v42  ;;  %3456 = vmatpush1.bf16.msra.mxu1 %v5434_v43 }
 0x111   :  { %3394 = vmatprep.subr.bf16.mxu0 %v5438_v47  ;;  %3458 = vmatprep.subr.bf16.mxu1 %v5440_v48 }
 0x114   :  { %3396 = vmatpush1.bf16.msra.mxu0 %v5444_v56  ;;  %3460 = vmatpush1.bf16.msra.mxu1 %v5446_v57 }
 0x115   :  { %3398 = vmatprep.subr.bf16.mxu0 %v5450_v60  ;;  %3462 = vmatprep.subr.bf16.mxu1 %v5452_v61 }
 0x118   :  { %3400 = vmatpush1.bf16.msra.mxu0 %v5456_v4  ;;  %3464 = vmatpush1.bf16.msra.mxu1 %v5458_v5 }
 0x119   :  { %3402 = vmatprep.subr.bf16.mxu0 %v5462_v9  ;;  %3466 = vmatprep.subr.bf16.mxu1 %v5464_v11 }
 0x11c   :  { %3404 = vmatpush1.bf16.msra.mxu0 %v5468_v21  ;;  %3468 = vmatpush1.bf16.msra.mxu1 %v5470_v22 }
 0x11d   :  { %3406 = vmatprep.subr.bf16.mxu0 %v5474_v27  ;;  %3470 = vmatprep.subr.bf16.mxu1 %v5476_v28 }
 0x120   :  { %3408 = vmatpush1.bf16.msra.mxu0 %v5480_v38  ;;  %3472 = vmatpush1.bf16.msra.mxu1 %v5482_v39 }
 0x121   :  { %3410 = vmatprep.subr.bf16.mxu0 %v5486_v44  ;;  %3474 = vmatprep.subr.bf16.mxu1 %v5488_v45  ;;  %v7387_v45 = vld [vmem:[#allocation80_spill] sm:$0xff] }
 0x124   :  { %3412 = vmatpush1.bf16.msra.mxu0 %v5492_v54  ;;  %3476 = vmatpush1.bf16.msra.mxu1 %v5494_v55 }
 0x125   :  { %3414 = vmatprep.subr.bf16.mxu0 %v5498_v62  ;;  %3478 = vmatprep.subr.bf16.mxu1 %v5500_v63  ;;  %v7377_v62 = vld [vmem:[#allocation83_spill] sm:$0xff] }
 0x128   :  { %3416 = vmatpush1.bf16.msra.mxu0 %v5504_v12  ;;  %3480 = vmatpush1.bf16.msra.mxu1 %v5506_v13 }
 0x129   :  { %3418 = vmatprep.subr.bf16.mxu0 %v5510_v18  ;;  %3482 = vmatprep.subr.bf16.mxu1 %v5512_v19 }
 0x12c   :  { %3420 = vmatpush1.bf16.msra.mxu0 %v5518_v37  ;;  %3484 = vmatpush1.bf16.msra.mxu1 %v5520_v40 }
 0x12d   :  { %3422 = vmatprep.subr.bf16.mxu0 %v5524_v49  ;;  %3486 = vmatprep.subr.bf16.mxu1 %v7347_v30  ;;  %v7358_v30 = vld [vmem:[#allocation58_spill] sm:$0xff] }
 0x130   :  { %3424 = vmatpush1.bf16.msra.mxu0 %v7348_v46  ;;  %3488 = vmatpush1.bf16.msra.mxu1 %v7349_v8  ;;  %v7359_v46 = vld [vmem:[#allocation59_spill] sm:$0xff]  ;;  %v7360_v8 = vld [vmem:[#allocation60_spill] sm:$0xff] }
 0x131   :  { %3426 = vmatprep.subr.bf16.mxu0 %v7350_v14  ;;  %3490 = vmatprep.subr.bf16.mxu1 %v7351_v33  ;;  %v7361_v14 = vld [vmem:[#allocation61_spill] sm:$0xff]  ;;  %v7362_v33 = vld [vmem:[#allocation62_spill] sm:$0xff] }
 0x134   :  { %3428 = vmatpush1.bf16.msra.mxu0 %v7352_v41  ;;  %3492 = vmatpush1.bf16.msra.mxu1 %v7353_v3  ;;  %v7363_v41 = vld [vmem:[#allocation63_spill] sm:$0xff]  ;;  %v7364_v3 = vld [vmem:[#allocation64_spill] sm:$0xff] }
 0x135   :  { %3430 = vmatprep.subr.bf16.mxu0 %v7354_v32  ;;  %3494 = vmatprep.subr.bf16.mxu1 %v7355_v50  ;;  %v7365_v32 = vld [vmem:[#allocation65_spill] sm:$0xff]  ;;  %v7366_v50 = vld [vmem:[#allocation66_spill] sm:$0xff] }
 0x138   :  { %3432 = vmatpush1.bf16.msra.mxu0 %v7356_v36  ;;  %3496 = vmatpush1.bf16.msra.mxu1 %v7357_v1  ;;  %v7367_v36 = vld [vmem:[#allocation67_spill] sm:$0xff]  ;;  %v7368_v1 = vld [vmem:[#allocation68_spill] sm:$0xff] }
 0x139   :  { %3434 = vmatprep.subr.bf16.mxu0 %v7358_v30  ;;  %3498 = vmatprep.subr.bf16.mxu1 %v7359_v46  ;;  %v7369_v30 = vld [vmem:[#allocation69_spill] sm:$0xff]  ;;  %v7370_v46 = vld [vmem:[#allocation70_spill] sm:$0xff] }
 0x13c   :  { %3436 = vmatpush1.bf16.msra.mxu0 %v7360_v8  ;;  %3500 = vmatpush1.bf16.msra.mxu1 %v7361_v14  ;;  %v7371_v8 = vld [vmem:[#allocation71_spill] sm:$0xff]  ;;  %v59_v14 = vpop.permute.xlu0 %58 }
 0x13d   :  { %3438 = vmatprep.subr.bf16.mxu0 %v7362_v33  ;;  %3502 = vmatprep.subr.bf16.mxu1 %v7363_v41  ;;  %v7372_v33 = vld [vmem:[#allocation74_spill] sm:$0xff]  ;;  %v7373_v41 = vld [vmem:[#allocation75_spill] sm:$0xff] }
 0x13e   :  { %v116_v49 = vmul.f32 %v7372_v33, %v59_v14  ;;  %v117_v40 = vmul.f32 %v7373_v41, %v59_v14 }
 0x140   :  { %3440 = vmatpush1.bf16.msra.mxu0 %v7364_v3  ;;  %3504 = vmatpush1.bf16.msra.mxu1 %v7365_v32  ;;  %v7374_v3 = vld [vmem:[#allocation77_spill] sm:$0xff] }
 0x141   :  { %3442 = vmatprep.subr.bf16.mxu0 %v7366_v50  ;;  %3506 = vmatprep.subr.bf16.mxu1 %v7367_v36  ;;  %v170_v37 = vadd.f32 %v7374_v3, %v116_v49  ;;  %v7375_v50 = vld [vmem:[#allocation78_spill] sm:$0xff] }
 0x142   :  { %v171_v18 = vadd.f32 %v7375_v50, %v117_v40 }
 0x144   :  { %3444 = vmatpush1.bf16.msra.mxu0 %v7368_v1  ;;  %3508 = vmatpush1.bf16.msra.mxu1 %v7369_v30 }
 0x145   :  { %3510 = vmatprep.subr.bf16.mxu0 %v7370_v46  ;;  %3574 = vmatprep.subr.bf16.mxu1 %v7371_v8  ;;  %v7376_v8 = vld [vmem:[#allocation82_spill] sm:$0xff] }
 0x146   :  { %v118_v46 = vmul.f32 %v7376_v8, %v59_v14 }
 0x148   :  { %v172_v33 = vadd.f32 %v7377_v62, %v118_v46  ;;  %v49_v46 = vld [vmem:[%s6885_s0 + $0x38] sm:$0xff] }
 0x149   :  { %v7384_v62 = vld [vmem:[#allocation76_spill] sm:$0xff] }
 0x19a   :  { %v545_v32 = vpop.f32.mrb[0].mxu0  ;;  %v616_v19 = vpop.f32.mrb[0].mxu1 }
 0x19b   :  { %v788_v36 = vadd.f32 %v545_v32, %v170_v37  ;;  %v547_v13 = vpop.f32.mrb[1].mxu0  ;;  %v618_v1 = vpop.f32.mrb[1].mxu1  ;;  %v790_v55 = vadd.f32 %v616_v19, %v172_v33  ;;  %v198_v19 = vld [vmem:[%s6889_s4] sm:$0xf]  ;;  %v7379_v33 = vld [vmem:[#allocation72_spill] sm:$0xff] }
 0x19c   :  { %v789_v12 = vadd.f32 %v547_v13, %v171_v18  ;;  %v7378_v18 = vld [vmem:[#allocation84_spill] sm:$0xff]  ;;  %v5947_v8 = vrot.slane %v198_v19, %v7384_v62 }
 0x19d   :  { %v3079_v30 = vmul.f32 -1.442695, %v788_v36 }
 0x19e   :  { %v3081_v63 = vmul.f32 -1.442695, %v789_v12 }
 0x19f   :  { %5068 = vpow2.f32 %v3079_v30 }
 0x1a0   :  { %5070 = vpow2.f32 %v3081_v63  ;;  %v44_v63 = vld [vmem:[%s6885_s0 + $0x10] sm:$0xff] }
 0x1a1   :  { %5072 = vtanh.f32 %v790_v55  ;;  %63 = vperm.xlu1 %5051, %v44_v63   ;;  %v45_v55 = vld [vmem:[%s6885_s0 + $0x18] sm:$0xff] }
 0x1a5   :  { %68 = vperm.xlu1 %5051, %v45_v55  }
 0x1a9   :  { %v5069_v41 = vpop.eup %5068 }
 0x1aa   :  { %v5071_v54 = vpop.eup %5070  ;;  %v799_v49 = vadd.f32 1.0, %v5069_v41  ;;  %v5938_v41 = vrot.slane %v198_v19, %v7379_v33  ;;  %v7386_v33 = vld [vmem:[#allocation81_spill] sm:$0xff] }
 0x1ab   :  { %v811_v3 = vadd.f32 1.0, %v5071_v54  ;;  %v5073_v37 = vpop.eup %5072  ;;  %v47_v54 = vld [vmem:[%s6885_s0 + $0x28] sm:$0xff] }
 0x1ac   :  { %5074 = vrcp.f32 %v799_v49  ;;  %78 = vperm.xlu1 %5051, %v47_v54   ;;  %7380 = vst [vmem:[#allocation84_spill] sm:$0xff] %v5938_v41 }
 0x1ad   :  { %5076 = vrcp.f32 %v811_v3  ;;  %v7381_v3 = vld [vmem:[#allocation73_spill] sm:$0xff] }
 0x1ae   :  { %v5941_v36 = vrot.slane %v198_v19, %v7381_v3  ;;  %7385 = vst [vmem:[#allocation73_spill] sm:$0xff] %v5947_v8 }
 0x1b0   :  { %88 = vperm.xlu1 %5051, %v49_v46   ;;  %7382 = vst [vmem:[#allocation72_spill] sm:$0xff] %v5941_v36 }
 0x1b6   :  { %v5075_v40 = vpop.eup %5074 }
 0x1b7   :  { %v5077_v32 = vpop.eup %5076  ;;  %v833_v13 = vmul.f32 %v5075_v40, %v5073_v37  ;;  %v7383_v40 = vld [vmem:[#allocation79_spill] sm:$0xff] }
 0x1b8   :  { %v831_v12 = vmul.f32 %v5077_v32, %v7378_v18  ;;  %v119_v32 = vmul.f32 %v7383_v40, %v59_v14  ;;  %v5952_v14 = vrot.slane %v198_v19, %v7387_v45 }
 0x1ba   :  { %v5920_v30 = vadd.f32 %v833_v13, %v831_v12  ;;  %v173_v46 = vadd.f32 %v7386_v33, %v119_v32  ;;  %7388 = vst [vmem:[#allocation76_spill] sm:$0xff] %v5952_v14 }
 0x1bc   :  { %v791_v3 = vadd.f32 %v618_v1, %v173_v46 }
 0x1da   :  { %v687_v49 = vpop.f32.mrb[2].mxu0  ;;  %v758_v37 = vpop.f32.mrb[2].mxu1 }
 0x1db   :  { %v784_v13 = vadd.f32 %v5938_v41, %v687_v49  ;;  %v689_v18 = vpop.f32.mrb[3].mxu0  ;;  %v760_v12 = vpop.f32.mrb[3].mxu1  ;;  %v3083_v49 = vmul.f32 -1.442695, %v791_v3  ;;  %v786_v40 = vadd.f32 %v5952_v14, %v758_v37 }
 0x1dc   :  { %v785_v63 = vadd.f32 %v5941_v36, %v689_v18  ;;  %v787_v50 = vadd.f32 %v5947_v8, %v760_v12 }
 0x1dd   :  { %v3078_v55 = vmul.f32 -1.442695, %v784_v13 }
 0x1de   :  { %v3080_v54 = vmul.f32 -1.442695, %v785_v63  ;;  %v3082_v41 = vmul.f32 -1.442695, %v787_v50 }
 0x1df   :  { %5078 = vpow2.f32 %v3078_v55 }
 0x1e0   :  { %5080 = vpow2.f32 %v3080_v54 }
 0x1e1   :  { %5082 = vpow2.f32 %v3083_v49 }
 0x1e2   :  { %5084 = vpow2.f32 %v3082_v41 }
 0x1e3   :  { %5086 = vtanh.f32 %v786_v40 }
 0x1e9   :  { %v5079_v18 = vpop.eup %5078 }
 0x1ea   :  { %v5081_v13 = vpop.eup %5080  ;;  %v798_v63 = vadd.f32 1.0, %v5079_v18 }
 0x1eb   :  { %v810_v62 = vadd.f32 1.0, %v5081_v13  ;;  %v5083_v32 = vpop.eup %5082 }
 0x1ec   :  { %5088 = vrcp.f32 %v798_v63  ;;  %v5085_v1 = vpop.eup %5084  ;;  %v825_v50 = vadd.f32 1.0, %v5083_v32  ;;  %v7389_v63 = vld [vmem:[#allocation85_spill] sm:$0xff]  ;;  %v7391_v32 = vld [vmem:[#allocation87_spill] sm:$0xff] }
 0x1ed   :  { %5090 = vrcp.f32 %v810_v62  ;;  %v5087_v55 = vpop.eup %5086  ;;  %v824_v19 = vadd.f32 1.0, %v5085_v1  ;;  %v7390_v62 = vld [vmem:[#allocation86_spill] sm:$0xff]  ;;  %v7392_v1 = vld [vmem:[#allocation88_spill] sm:$0xff] }
 0x1ee   :  { %5092 = vtanh.f32 %v5920_v30 }
 0x1ef   :  { %5094 = vrcp.f32 %v824_v19  ;;  %v7397_v19 = vld [vmem:[#allocation93_spill] sm:$0xff] }
 0x1f6   :  { %v5089_v12 = vpop.eup %5088 }
 0x1f7   :  { %v5091_v54 = vpop.eup %5090  ;;  %v832_v45 = vmul.f32 %v5089_v12, %v5087_v55  ;;  %v7393_v55 = vld [vmem:[#allocation89_spill] sm:$0xff]  ;;  %v7394_v12 = vld [vmem:[#allocation90_spill] sm:$0xff] }
 0x1f8   :  { %v830_v46 = vmul.f32 0.0, %v5091_v54  ;;  %v5093_v41 = vpop.eup %5092  ;;  %v7395_v54 = vld [vmem:[#allocation91_spill] sm:$0xff] }
 0x1f9   :  { %v5095_v37 = vpop.eup %5094 }
 0x1fa   :  { %v5955_v3 = vadd.f32 %v832_v45, %v830_v46  ;;  %v7396_v45 = vld [vmem:[#allocation92_spill] sm:$0xff]  ;;  %v7398_v46 = vld [vmem:[#allocation94_spill] sm:$0xff] }
 0x1fc   :  { %5096 = vtanh.f32 %v5955_v3 }
 0x1fd   :  { %5098 = vrcp.f32 %v825_v50  ;;  %v7399_v50 = vld [vmem:[#allocation95_spill] sm:$0xff] }
 0x206   :  { %v5097_v40 = vpop.eup %5096 }
 0x207   :  { %v5099_v49 = vpop.eup %5098  ;;  %v838_v18 = vmul.f32 %v5097_v40, %v5095_v37  ;;  %v7401_v37 = vld [vmem:[#allocation97_spill] sm:$0xff]  ;;  %v7402_v40 = vld [vmem:[#allocation98_spill] sm:$0xff] }
 0x208   :  { %v5959_v13 = vmul.f32 %v5099_v49, %v5093_v41  ;;  %v7400_v41 = vld [vmem:[#allocation96_spill] sm:$0xff]  ;;  %v7403_v49 = vld [vmem:[#allocation99_spill] sm:$0xff] }
 0x209   :  { %904 = vmatprep.mubr.f32.mxu0 %v838_v18  ;;  %975 = vmatprep.mubr.f32.mxu1 %v838_v18 }
 0x20a   :  { %905 = vmatmul.mubr.f32.vlgmr.msra.gmra.mrb[4].mxu0 %v5959_v13  ;;  %976 = vmatmul.mubr.f32.vlgmr.msra.gmra.mrb[4].mxu1 %v5959_v13 }
 0x20b   :  { %3512 = vmatpush1.bf16.msra.mxu0 %v7389_v63  ;;  %3576 = vmatpush1.bf16.msra.mxu1 %v7390_v62 }
 0x20c   :  { %1046 = vmatprep.mubr.f32.mxu0 %v838_v18  ;;  %1117 = vmatprep.mubr.f32.mxu1 %v838_v18  ;;  %v7404_v18 = vld [vmem:[#allocation100_spill] sm:$0xff] }
 0x20d   :  { %3514 = vmatprep.subr.bf16.mxu0 %v7391_v32  ;;  %3578 = vmatprep.subr.bf16.mxu1 %v7392_v1 }
 0x20f   :  { %3516 = vmatpush1.bf16.msra.mxu0 %v7393_v55  ;;  %3580 = vmatpush1.bf16.msra.mxu1 %v7394_v12  ;;  %v7405_v12 = vld [vmem:[#allocation101_spill] sm:$0xff] }
 0x210   :  { %3518 = vmatprep.subr.bf16.mxu0 %v7395_v54  ;;  %3582 = vmatprep.subr.bf16.mxu1 %v7396_v45  ;;  %v7406_v54 = vld [vmem:[#allocation102_spill] sm:$0xff]  ;;  %v7407_v45 = vld [vmem:[#allocation103_spill] sm:$0xff] }
 0x213   :  { %3520 = vmatpush1.bf16.msra.mxu0 %v7397_v19  ;;  %3584 = vmatpush1.bf16.msra.mxu1 %v7398_v46  ;;  %v7408_v19 = vld [vmem:[#allocation104_spill] sm:$0xff]  ;;  %v7409_v46 = vld [vmem:[#allocation105_spill] sm:$0xff] }
 0x214   :  { %3522 = vmatprep.subr.bf16.mxu0 %v7399_v50  ;;  %3586 = vmatprep.subr.bf16.mxu1 %v7400_v41  ;;  %v7410_v50 = vld [vmem:[#allocation106_spill] sm:$0xff]  ;;  %v7411_v41 = vld [vmem:[#allocation107_spill] sm:$0xff] }
 0x217   :  { %3524 = vmatpush1.bf16.msra.mxu0 %v7401_v37  ;;  %3588 = vmatpush1.bf16.msra.mxu1 %v7402_v40  ;;  %v7412_v37 = vld [vmem:[#allocation108_spill] sm:$0xff]  ;;  %v7413_v40 = vld [vmem:[#allocation109_spill] sm:$0xff] }
 0x218   :  { %3526 = vmatprep.subr.bf16.mxu0 %v7403_v49  ;;  %3590 = vmatprep.subr.bf16.mxu1 %v7404_v18  ;;  %v7414_v49 = vld [vmem:[#allocation110_spill] sm:$0xff]  ;;  %v7415_v18 = vld [vmem:[#allocation111_spill] sm:$0xff] }
 0x21b   :  { %3528 = vmatpush1.bf16.msra.mxu0 %v7405_v12  ;;  %3592 = vmatpush1.bf16.msra.mxu1 %v7406_v54  ;;  %v7416_v12 = vld [vmem:[#allocation112_spill] sm:$0xff]  ;;  %v7417_v54 = vld [vmem:[#allocation113_spill] sm:$0xff] }
 0x21c   :  { %3530 = vmatprep.subr.bf16.mxu0 %v7407_v45  ;;  %3594 = vmatprep.subr.bf16.mxu1 %v7408_v19  ;;  %v7418_v45 = vld [vmem:[#allocation114_spill] sm:$0xff]  ;;  %v7419_v19 = vld [vmem:[#allocation115_spill] sm:$0xff] }
 0x21f   :  { %3532 = vmatpush1.bf16.msra.mxu0 %v7409_v46  ;;  %3596 = vmatpush1.bf16.msra.mxu1 %v7410_v50  ;;  %v7420_v46 = vld [vmem:[#allocation116_spill] sm:$0xff]  ;;  %v7421_v50 = vld [vmem:[#allocation117_spill] sm:$0xff] }
 0x220   :  { %3534 = vmatprep.subr.bf16.mxu0 %v7411_v41  ;;  %3598 = vmatprep.subr.bf16.mxu1 %v7412_v37  ;;  %v7422_v41 = vld [vmem:[#allocation118_spill] sm:$0xff]  ;;  %v7423_v37 = vld [vmem:[#allocation119_spill] sm:$0xff] }
 0x223   :  { %3536 = vmatpush1.bf16.msra.mxu0 %v7413_v40  ;;  %3600 = vmatpush1.bf16.msra.mxu1 %v7414_v49  ;;  %v7424_v40 = vld [vmem:[#allocation120_spill] sm:$0xff]  ;;  %v7425_v49 = vld [vmem:[#allocation121_spill] sm:$0xff] }
 0x224   :  { %3538 = vmatprep.subr.bf16.mxu0 %v7415_v18  ;;  %3602 = vmatprep.subr.bf16.mxu1 %v7416_v12  ;;  %v7426_v18 = vld [vmem:[#allocation122_spill] sm:$0xff]  ;;  %v7427_v12 = vld [vmem:[#allocation123_spill] sm:$0xff] }
 0x227   :  { %3540 = vmatpush1.bf16.msra.mxu0 %v7417_v54  ;;  %3604 = vmatpush1.bf16.msra.mxu1 %v7418_v45  ;;  %v7428_v54 = vld [vmem:[#allocation124_spill] sm:$0xff]  ;;  %v7429_v45 = vld [vmem:[#allocation125_spill] sm:$0xff] }
 0x228   :  { %3542 = vmatprep.subr.bf16.mxu0 %v7419_v19  ;;  %3606 = vmatprep.subr.bf16.mxu1 %v7420_v46  ;;  %v7430_v19 = vld [vmem:[#allocation126_spill] sm:$0xff]  ;;  %v7431_v46 = vld [vmem:[#allocation127_spill] sm:$0xff] }
 0x22b   :  { %3544 = vmatpush1.bf16.msra.mxu0 %v7421_v50  ;;  %3608 = vmatpush1.bf16.msra.mxu1 %v7422_v41  ;;  %v7432_v50 = vld [vmem:[#allocation128_spill] sm:$0xff]  ;;  %v7433_v41 = vld [vmem:[#allocation129_spill] sm:$0xff] }
 0x22c   :  { %3546 = vmatprep.subr.bf16.mxu0 %v7423_v37  ;;  %3610 = vmatprep.subr.bf16.mxu1 %v7424_v40  ;;  %v7434_v37 = vld [vmem:[#allocation130_spill] sm:$0xff]  ;;  %v7435_v40 = vld [vmem:[#allocation131_spill] sm:$0xff] }
 0x22f   :  { %3548 = vmatpush1.bf16.msra.mxu0 %v7425_v49  ;;  %3612 = vmatpush1.bf16.msra.mxu1 %v7426_v18  ;;  %v7436_v49 = vld [vmem:[#allocation132_spill] sm:$0xff]  ;;  %v7437_v18 = vld [vmem:[#allocation133_spill] sm:$0xff] }
 0x230   :  { %3550 = vmatprep.subr.bf16.mxu0 %v7427_v12  ;;  %3614 = vmatprep.subr.bf16.mxu1 %v7428_v54  ;;  %v7438_v12 = vld [vmem:[#allocation134_spill] sm:$0xff] }
 0x233   :  { %3552 = vmatpush1.bf16.msra.mxu0 %v7429_v45  ;;  %3616 = vmatpush1.bf16.msra.mxu1 %v7430_v19 }
 0x234   :  { %3554 = vmatprep.subr.bf16.mxu0 %v7431_v46  ;;  %3618 = vmatprep.subr.bf16.mxu1 %v7432_v50 }
 0x237   :  { %3556 = vmatpush1.bf16.msra.mxu0 %v7433_v41  ;;  %3620 = vmatpush1.bf16.msra.mxu1 %v7434_v37 }
 0x238   :  { %3558 = vmatprep.subr.bf16.mxu0 %v7435_v40  ;;  %3622 = vmatprep.subr.bf16.mxu1 %v7436_v49 }
 0x23b   :  { %3560 = vmatpush1.bf16.msra.mxu0 %v7437_v18  ;;  %3624 = vmatpush1.bf16.msra.mxu1 %v7438_v12 }
 0x23c   :  { %3562 = vmatprep.subr.bf16.mxu0 %v5807_v23  ;;  %3626 = vmatprep.subr.bf16.mxu1 %v5809_v0 }
 0x23f   :  { %3564 = vmatpush1.bf16.msra.mxu0 %v5813_v26  ;;  %3628 = vmatpush1.bf16.msra.mxu1 %v5815_v2 }
 0x240   :  { %3566 = vmatprep.subr.bf16.mxu0 %v5819_v53  ;;  %3630 = vmatprep.subr.bf16.mxu1 %v5821_v31 }
 0x243   :  { %3568 = vmatpush1.bf16.msra.mxu0 %v5825_v52  ;;  %3632 = vmatpush1.bf16.msra.mxu1 %v5827_v58 }
 0x244   :  { %3570 = vmatprep.subr.bf16.mxu0 %v5831_v17  ;;  %3634 = vmatprep.subr.bf16.mxu1 %v5833_v59 }
 0x247   :  { %3572 = vmatpush1.bf16.msra.mxu0 %v5837_v7  ;;  %3636 = vmatpush1.bf16.msra.mxu1 %v5839_v51 }
 0x248   :  { %3638 = vmatprep.subr.bf16.mxu0 %v5398_v6  ;;  %3702 = vmatprep.subr.bf16.mxu1 %v5400_v10 }
 0x24a   :  { %1047 = vmatmul.mubr.f32.vlgmr.msra.gmra.mrb[6].mxu0 %v5959_v13  ;;  %1118 = vmatmul.mubr.f32.vlgmr.msra.gmra.mrb[6].mxu1 %v5959_v13  ;;  %v7439_v13 = vld [vmem:[#allocation35_spill] sm:$0xff] }
 0x24b   :  { %3640 = vmatpush1.bf16.msra.mxu0 %v5406_v15  ;;  %3704 = vmatpush1.bf16.msra.mxu1 %v5408_v16 }
 0x24c   :  { %3642 = vmatprep.subr.bf16.mxu0 %v5411_v20  ;;  %3706 = vmatprep.subr.bf16.mxu1 %v5415_v24 }
 0x24f   :  { %3644 = vmatpush1.bf16.msra.mxu0 %v5417_v25  ;;  %3708 = vmatpush1.bf16.msra.mxu1 %v5420_v29 }
 0x250   :  { %3646 = vmatprep.subr.bf16.mxu0 %v5426_v34  ;;  %3710 = vmatprep.subr.bf16.mxu1 %v5428_v35 }
 0x253   :  { %3648 = vmatpush1.bf16.msra.mxu0 %v5432_v42  ;;  %3712 = vmatpush1.bf16.msra.mxu1 %v5434_v43  ;;  %v7481_v42 = vld [vmem:[#allocation83_spill] sm:$0xff] }
 0x254   :  { %3650 = vmatprep.subr.bf16.mxu0 %v5438_v47  ;;  %3714 = vmatprep.subr.bf16.mxu1 %v5440_v48 }
 0x257   :  { %3652 = vmatpush1.bf16.msra.mxu0 %v5444_v56  ;;  %3716 = vmatpush1.bf16.msra.mxu1 %v5446_v57 }
 0x258   :  { %3654 = vmatprep.subr.bf16.mxu0 %v5450_v60  ;;  %3718 = vmatprep.subr.bf16.mxu1 %v5452_v61 }
 0x25b   :  { %3656 = vmatpush1.bf16.msra.mxu0 %v5456_v4  ;;  %3720 = vmatpush1.bf16.msra.mxu1 %v5458_v5  ;;  %v7440_v5 = vld [vmem:[#allocation36_spill] sm:$0xff] }
 0x25c   :  { %3658 = vmatprep.subr.bf16.mxu0 %v5462_v9  ;;  %3722 = vmatprep.subr.bf16.mxu1 %v5464_v11  ;;  %v7441_v9 = vld [vmem:[#allocation37_spill] sm:$0xff]  ;;  %v7442_v11 = vld [vmem:[#allocation38_spill] sm:$0xff] }
 0x25f   :  { %3660 = vmatpush1.bf16.msra.mxu0 %v5468_v21  ;;  %3724 = vmatpush1.bf16.msra.mxu1 %v5470_v22  ;;  %v7443_v21 = vld [vmem:[#allocation39_spill] sm:$0xff]  ;;  %v7444_v22 = vld [vmem:[#allocation40_spill] sm:$0xff] }
 0x260   :  { %3662 = vmatprep.subr.bf16.mxu0 %v5474_v27  ;;  %3726 = vmatprep.subr.bf16.mxu1 %v5476_v28  ;;  %v7445_v27 = vld [vmem:[#allocation41_spill] sm:$0xff]  ;;  %v7446_v28 = vld [vmem:[#allocation42_spill] sm:$0xff] }
 0x263   :  { %3664 = vmatpush1.bf16.msra.mxu0 %v5480_v38  ;;  %3728 = vmatpush1.bf16.msra.mxu1 %v5482_v39  ;;  %v7447_v38 = vld [vmem:[#allocation43_spill] sm:$0xff]  ;;  %v7448_v39 = vld [vmem:[#allocation44_spill] sm:$0xff] }
 0x264   :  { %3666 = vmatprep.subr.bf16.mxu0 %v5486_v44  ;;  %3730 = vmatprep.subr.bf16.mxu1 %v7439_v13  ;;  %v7449_v44 = vld [vmem:[#allocation45_spill] sm:$0xff]  ;;  %v7450_v13 = vld [vmem:[#allocation46_spill] sm:$0xff] }
 0x267   :  { %3668 = vmatpush1.bf16.msra.mxu0 %v7440_v5  ;;  %3732 = vmatpush1.bf16.msra.mxu1 %v7441_v9  ;;  %v7451_v5 = vld [vmem:[#allocation47_spill] sm:$0xff]  ;;  %v7452_v9 = vld [vmem:[#allocation48_spill] sm:$0xff] }
 0x268   :  { %3670 = vmatprep.subr.bf16.mxu0 %v7442_v11  ;;  %3734 = vmatprep.subr.bf16.mxu1 %v7443_v21  ;;  %v7453_v11 = vld [vmem:[#allocation49_spill] sm:$0xff]  ;;  %v7454_v21 = vld [vmem:[#allocation50_spill] sm:$0xff] }
 0x26b   :  { %3672 = vmatpush1.bf16.msra.mxu0 %v7444_v22  ;;  %3736 = vmatpush1.bf16.msra.mxu1 %v7445_v27  ;;  %v7455_v22 = vld [vmem:[#allocation51_spill] sm:$0xff]  ;;  %v7456_v27 = vld [vmem:[#allocation52_spill] sm:$0xff] }
 0x26c   :  { %3674 = vmatprep.subr.bf16.mxu0 %v7446_v28  ;;  %3738 = vmatprep.subr.bf16.mxu1 %v7447_v38  ;;  %v7457_v28 = vld [vmem:[#allocation53_spill] sm:$0xff]  ;;  %v7458_v38 = vld [vmem:[#allocation54_spill] sm:$0xff] }
 0x26f   :  { %3676 = vmatpush1.bf16.msra.mxu0 %v7448_v39  ;;  %3740 = vmatpush1.bf16.msra.mxu1 %v7449_v44  ;;  %v7459_v39 = vld [vmem:[#allocation55_spill] sm:$0xff]  ;;  %v7460_v44 = vld [vmem:[#allocation56_spill] sm:$0xff] }
 0x270   :  { %3678 = vmatprep.subr.bf16.mxu0 %v7450_v13  ;;  %3742 = vmatprep.subr.bf16.mxu1 %v7451_v5  ;;  %v7461_v13 = vld [vmem:[#allocation57_spill] sm:$0xff]  ;;  %v7462_v5 = vld [vmem:[#allocation58_spill] sm:$0xff] }
 0x273   :  { %3680 = vmatpush1.bf16.msra.mxu0 %v7452_v9  ;;  %3744 = vmatpush1.bf16.msra.mxu1 %v7453_v11  ;;  %v7463_v9 = vld [vmem:[#allocation59_spill] sm:$0xff]  ;;  %v7464_v11 = vld [vmem:[#allocation60_spill] sm:$0xff] }
 0x274   :  { %3682 = vmatprep.subr.bf16.mxu0 %v7454_v21  ;;  %3746 = vmatprep.subr.bf16.mxu1 %v7455_v22  ;;  %v7465_v21 = vld [vmem:[#allocation61_spill] sm:$0xff]  ;;  %v7466_v22 = vld [vmem:[#allocation62_spill] sm:$0xff] }
 0x277   :  { %3684 = vmatpush1.bf16.msra.mxu0 %v7456_v27  ;;  %3748 = vmatpush1.bf16.msra.mxu1 %v7457_v28  ;;  %v7467_v27 = vld [vmem:[#allocation63_spill] sm:$0xff]  ;;  %v7468_v28 = vld [vmem:[#allocation64_spill] sm:$0xff] }
 0x278   :  { %3686 = vmatprep.subr.bf16.mxu0 %v7458_v38  ;;  %3750 = vmatprep.subr.bf16.mxu1 %v7459_v39  ;;  %v7469_v38 = vld [vmem:[#allocation65_spill] sm:$0xff]  ;;  %v7470_v39 = vld [vmem:[#allocation66_spill] sm:$0xff] }
 0x27b   :  { %3688 = vmatpush1.bf16.msra.mxu0 %v7460_v44  ;;  %3752 = vmatpush1.bf16.msra.mxu1 %v7461_v13  ;;  %v7471_v44 = vld [vmem:[#allocation67_spill] sm:$0xff]  ;;  %v7472_v13 = vld [vmem:[#allocation68_spill] sm:$0xff] }
 0x27c   :  { %3690 = vmatprep.subr.bf16.mxu0 %v7462_v5  ;;  %3754 = vmatprep.subr.bf16.mxu1 %v7463_v9  ;;  %v7473_v5 = vld [vmem:[#allocation69_spill] sm:$0xff]  ;;  %v7474_v9 = vld [vmem:[#allocation70_spill] sm:$0xff] }
 0x27f   :  { %3692 = vmatpush1.bf16.msra.mxu0 %v7464_v11  ;;  %3756 = vmatpush1.bf16.msra.mxu1 %v7465_v21  ;;  %v7475_v11 = vld [vmem:[#allocation71_spill] sm:$0xff]  ;;  %v64_v21 = vpop.permute.xlu1 %63 }
 0x280   :  { %3694 = vmatprep.subr.bf16.mxu0 %v7466_v22  ;;  %3758 = vmatprep.subr.bf16.mxu1 %v7467_v27  ;;  %v7476_v22 = vld [vmem:[#allocation74_spill] sm:$0xff]  ;;  %v7477_v27 = vld [vmem:[#allocation75_spill] sm:$0xff] }
 0x281   :  { %v120_v4 = vmul.f32 %v7476_v22, %v64_v21  ;;  %v121_v61 = vmul.f32 %v7477_v27, %v64_v21 }
 0x283   :  { %3696 = vmatpush1.bf16.msra.mxu0 %v7468_v28  ;;  %3760 = vmatpush1.bf16.msra.mxu1 %v7469_v38  ;;  %v7478_v28 = vld [vmem:[#allocation77_spill] sm:$0xff]  ;;  %v7479_v38 = vld [vmem:[#allocation78_spill] sm:$0xff] }
 0x284   :  { %3698 = vmatprep.subr.bf16.mxu0 %v7470_v39  ;;  %3762 = vmatprep.subr.bf16.mxu1 %v7471_v44  ;;  %v174_v60 = vadd.f32 %v7478_v28, %v120_v4  ;;  %v175_v57 = vadd.f32 %v7479_v38, %v121_v61 }
 0x287   :  { %3700 = vmatpush1.bf16.msra.mxu0 %v7472_v13  ;;  %3764 = vmatpush1.bf16.msra.mxu1 %v7473_v5 }
 0x288   :  { %3766 = vmatprep.subr.bf16.mxu0 %v7474_v9  ;;  %3830 = vmatprep.subr.bf16.mxu1 %v7475_v11  ;;  %v7480_v9 = vld [vmem:[#allocation82_spill] sm:$0xff] }
 0x289   :  { %v122_v11 = vmul.f32 %v7480_v9, %v64_v21 }
 0x28b   :  { %v176_v22 = vadd.f32 %v7481_v42, %v122_v11 }
 0x2dd   :  { %v906_v39 = vpop.f32.mrb[4].mxu0  ;;  %v977_v56 = vpop.f32.mrb[4].mxu1 }
 0x2de   :  { %v1128_v44 = vadd.f32 %v906_v39, %v174_v60  ;;  %v908_v48 = vpop.f32.mrb[5].mxu0  ;;  %v979_v13 = vpop.f32.mrb[5].mxu1  ;;  %v1130_v35 = vadd.f32 %v977_v56, %v176_v22  ;;  %v7483_v56 = vld [vmem:[#allocation84_spill] sm:$0xff] }
 0x2df   :  { %v1129_v47 = vadd.f32 %v908_v48, %v175_v57 }
 0x2e0   :  { %v3085_v5 = vmul.f32 -1.442695, %v1128_v44 }
 0x2e1   :  { %v3087_v43 = vmul.f32 -1.442695, %v1129_v47 }
 0x2e2   :  { %5100 = vpow2.f32 %v3085_v5  ;;  %v7482_v5 = vld [vmem:[#allocation79_spill] sm:$0xff] }
 0x2e3   :  { %5102 = vpow2.f32 %v3087_v43  ;;  %v123_v43 = vmul.f32 %v7482_v5, %v64_v21 }
 0x2e4   :  { %5104 = vtanh.f32 %v1130_v35 }
 0x2e5   :  { %v177_v35 = vadd.f32 %v7386_v33, %v123_v43 }
 0x2ec   :  { %v5101_v27 = vpop.eup %5100 }
 0x2ed   :  { %v5103_v34 = vpop.eup %5102  ;;  %v1139_v4 = vadd.f32 1.0, %v5101_v27 }
 0x2ee   :  { %v1151_v61 = vadd.f32 1.0, %v5103_v34  ;;  %v5105_v60 = vpop.eup %5104 }
 0x2ef   :  { %5106 = vrcp.f32 %v1139_v4 }
 0x2f0   :  { %5108 = vrcp.f32 %v1151_v61 }
 0x2f9   :  { %v5107_v39 = vpop.eup %5106 }
 0x2fa   :  { %v5109_v38 = vpop.eup %5108  ;;  %v1173_v48 = vmul.f32 %v5107_v39, %v5105_v60  ;;  %v1131_v60 = vadd.f32 %v979_v13, %v177_v35 }
 0x2fb   :  { %v1171_v47 = vmul.f32 %v5109_v38, %v5920_v30 }
 0x2fc   :  { %v3089_v30 = vmul.f32 -1.442695, %v1131_v60 }
 0x2fd   :  { %v6100_v57 = vadd.f32 %v1173_v48, %v1171_v47 }
 0x31d   :  { %v1048_v44 = vpop.f32.mrb[6].mxu0  ;;  %v1119_v11 = vpop.f32.mrb[6].mxu1 }
 0x31e   :  { %v1124_v22 = vadd.f32 %v1048_v44, %v7483_v56  ;;  %v1050_v42 = vpop.f32.mrb[7].mxu0  ;;  %v1121_v27 = vpop.f32.mrb[7].mxu1  ;;  %v1126_v21 = vadd.f32 %v1119_v11, %v5952_v14 }
 0x31f   :  { %v1125_v34 = vadd.f32 %v1050_v42, %v5941_v36  ;;  %v1127_v38 = vadd.f32 %v1121_v27, %v5947_v8 }
 0x320   :  { %v3084_v4 = vmul.f32 -1.442695, %v1124_v22 }
 0x321   :  { %v3086_v61 = vmul.f32 -1.442695, %v1125_v34  ;;  %v3088_v39 = vmul.f32 -1.442695, %v1127_v38 }
 0x322   :  { %5110 = vpow2.f32 %v3084_v4 }
 0x323   :  { %5112 = vpow2.f32 %v3086_v61 }
 0x324   :  { %5114 = vpow2.f32 %v3089_v30 }
 0x325   :  { %5116 = vpow2.f32 %v3088_v39 }
 0x326   :  { %5118 = vtanh.f32 %v1126_v21 }
 0x32c   :  { %v5111_v48 = vpop.eup %5110 }
 0x32d   :  { %v5113_v47 = vpop.eup %5112  ;;  %v1138_v44 = vadd.f32 1.0, %v5111_v48 }
 0x32e   :  { %v1150_v42 = vadd.f32 1.0, %v5113_v47  ;;  %v5115_v43 = vpop.eup %5114 }
 0x32f   :  { %5120 = vrcp.f32 %v1138_v44  ;;  %v5117_v22 = vpop.eup %5116  ;;  %v1165_v60 = vadd.f32 1.0, %v5115_v43  ;;  %v7485_v44 = vld [vmem:[#allocation91_spill] sm:$0xff]  ;;  %v7487_v43 = vld [vmem:[#allocation93_spill] sm:$0xff] }
 0x330   :  { %5122 = vrcp.f32 %v1150_v42  ;;  %v5119_v34 = vpop.eup %5118  ;;  %v1164_v27 = vadd.f32 1.0, %v5117_v22  ;;  %v7486_v42 = vld [vmem:[#allocation92_spill] sm:$0xff]  ;;  %v7488_v22 = vld [vmem:[#allocation94_spill] sm:$0xff] }
 0x331   :  { %5124 = vtanh.f32 %v6100_v57 }
 0x332   :  { %5126 = vrcp.f32 %v1164_v27  ;;  %v7493_v27 = vld [vmem:[#allocation99_spill] sm:$0xff] }
 0x339   :  { %v5121_v4 = vpop.eup %5120 }
 0x33a   :  { %v5123_v13 = vpop.eup %5122  ;;  %v1172_v35 = vmul.f32 %v5121_v4, %v5119_v34  ;;  %v7489_v34 = vld [vmem:[#allocation95_spill] sm:$0xff]  ;;  %v7490_v4 = vld [vmem:[#allocation96_spill] sm:$0xff] }
 0x33b   :  { %v1170_v61 = vmul.f32 %v5123_v13, %v5955_v3  ;;  %v5125_v38 = vpop.eup %5124  ;;  %v7484_v3 = vld [vmem:[#allocation90_spill] sm:$0xff]  ;;  %v7491_v13 = vld [vmem:[#allocation97_spill] sm:$0xff] }
 0x33c   :  { %v5127_v30 = vpop.eup %5126 }
 0x33d   :  { %v6109_v11 = vadd.f32 %v1172_v35, %v1170_v61  ;;  %v7492_v35 = vld [vmem:[#allocation98_spill] sm:$0xff]  ;;  %v7494_v61 = vld [vmem:[#allocation100_spill] sm:$0xff] }
 0x33f   :  { %5128 = vtanh.f32 %v6109_v11 }
 0x340   :  { %5130 = vrcp.f32 %v1165_v60  ;;  %v7495_v60 = vld [vmem:[#allocation101_spill] sm:$0xff] }
 0x349   :  { %v5129_v39 = vpop.eup %5128 }
 0x34a   :  { %v5131_v21 = vpop.eup %5130  ;;  %v1178_v48 = vmul.f32 %v5129_v39, %v5127_v30  ;;  %v7497_v30 = vld [vmem:[#allocation103_spill] sm:$0xff]  ;;  %v7498_v39 = vld [vmem:[#allocation104_spill] sm:$0xff] }
 0x34b   :  { %v6113_v47 = vmul.f32 %v5131_v21, %v5125_v38  ;;  %v7496_v38 = vld [vmem:[#allocation102_spill] sm:$0xff]  ;;  %v7499_v21 = vld [vmem:[#allocation105_spill] sm:$0xff] }
 0x34c   :  { %1244 = vmatprep.mubr.f32.mxu0 %v1178_v48  ;;  %1315 = vmatprep.mubr.f32.mxu1 %v1178_v48 }
 0x34d   :  { %1245 = vmatmul.mubr.f32.vlgmr.msra.gmra.mrb[8].mxu0 %v6113_v47  ;;  %1316 = vmatmul.mubr.f32.vlgmr.msra.gmra.mrb[8].mxu1 %v6113_v47 }
 0x34e   :  { %3768 = vmatpush1.bf16.msra.mxu0 %v7389_v63  ;;  %3832 = vmatpush1.bf16.msra.mxu1 %v7390_v62 }
 0x34f   :  { %1386 = vmatprep.mubr.f32.mxu0 %v1178_v48  ;;  %1457 = vmatprep.mubr.f32.mxu1 %v1178_v48  ;;  %v7500_v48 = vld [vmem:[#allocation106_spill] sm:$0xff] }
 0x350   :  { %3770 = vmatprep.subr.bf16.mxu0 %v7391_v32  ;;  %3834 = vmatprep.subr.bf16.mxu1 %v7392_v1 }
 0x352   :  { %3772 = vmatpush1.bf16.msra.mxu0 %v7393_v55  ;;  %3836 = vmatpush1.bf16.msra.mxu1 %v7484_v3 }
 0x353   :  { %3774 = vmatprep.subr.bf16.mxu0 %v7485_v44  ;;  %3838 = vmatprep.subr.bf16.mxu1 %v7486_v42 }
 0x356   :  { %3776 = vmatpush1.bf16.msra.mxu0 %v7487_v43  ;;  %3840 = vmatpush1.bf16.msra.mxu1 %v7488_v22 }
 0x357   :  { %3778 = vmatprep.subr.bf16.mxu0 %v7489_v34  ;;  %3842 = vmatprep.subr.bf16.mxu1 %v7490_v4  ;;  %v7501_v4 = vld [vmem:[#allocation107_spill] sm:$0xff] }
 0x35a   :  { %3780 = vmatpush1.bf16.msra.mxu0 %v7491_v13  ;;  %3844 = vmatpush1.bf16.msra.mxu1 %v7492_v35  ;;  %v7502_v13 = vld [vmem:[#allocation108_spill] sm:$0xff]  ;;  %v7503_v35 = vld [vmem:[#allocation109_spill] sm:$0xff] }
 0x35b   :  { %3782 = vmatprep.subr.bf16.mxu0 %v7493_v27  ;;  %3846 = vmatprep.subr.bf16.mxu1 %v7494_v61  ;;  %v7504_v27 = vld [vmem:[#allocation110_spill] sm:$0xff]  ;;  %v7505_v61 = vld [vmem:[#allocation111_spill] sm:$0xff] }
 0x35e   :  { %3784 = vmatpush1.bf16.msra.mxu0 %v7495_v60  ;;  %3848 = vmatpush1.bf16.msra.mxu1 %v7496_v38  ;;  %v7506_v60 = vld [vmem:[#allocation112_spill] sm:$0xff]  ;;  %v7507_v38 = vld [vmem:[#allocation113_spill] sm:$0xff] }
 0x35f   :  { %3786 = vmatprep.subr.bf16.mxu0 %v7497_v30  ;;  %3850 = vmatprep.subr.bf16.mxu1 %v7498_v39  ;;  %v7508_v30 = vld [vmem:[#allocation114_spill] sm:$0xff]  ;;  %v7509_v39 = vld [vmem:[#allocation115_spill] sm:$0xff] }
 0x362   :  { %3788 = vmatpush1.bf16.msra.mxu0 %v7499_v21  ;;  %3852 = vmatpush1.bf16.msra.mxu1 %v7500_v48  ;;  %v7510_v21 = vld [vmem:[#allocation116_spill] sm:$0xff]  ;;  %v7511_v48 = vld [vmem:[#allocation117_spill] sm:$0xff] }
 0x363   :  { %3790 = vmatprep.subr.bf16.mxu0 %v7501_v4  ;;  %3854 = vmatprep.subr.bf16.mxu1 %v7502_v13  ;;  %v7512_v4 = vld [vmem:[#allocation118_spill] sm:$0xff]  ;;  %v7513_v13 = vld [vmem:[#allocation119_spill] sm:$0xff] }
 0x366   :  { %3792 = vmatpush1.bf16.msra.mxu0 %v7503_v35  ;;  %3856 = vmatpush1.bf16.msra.mxu1 %v7504_v27  ;;  %v7514_v35 = vld [vmem:[#allocation120_spill] sm:$0xff]  ;;  %v7515_v27 = vld [vmem:[#allocation121_spill] sm:$0xff] }
 0x367   :  { %3794 = vmatprep.subr.bf16.mxu0 %v7505_v61  ;;  %3858 = vmatprep.subr.bf16.mxu1 %v7506_v60  ;;  %v7516_v61 = vld [vmem:[#allocation122_spill] sm:$0xff]  ;;  %v7517_v60 = vld [vmem:[#allocation123_spill] sm:$0xff] }
 0x36a   :  { %3796 = vmatpush1.bf16.msra.mxu0 %v7507_v38  ;;  %3860 = vmatpush1.bf16.msra.mxu1 %v7508_v30 }
 0x36b   :  { %3798 = vmatprep.subr.bf16.mxu0 %v7509_v39  ;;  %3862 = vmatprep.subr.bf16.mxu1 %v7510_v21 }
 0x36e   :  { %3800 = vmatpush1.bf16.msra.mxu0 %v7511_v48  ;;  %3864 = vmatpush1.bf16.msra.mxu1 %v7512_v4 }
 0x36f   :  { %3802 = vmatprep.subr.bf16.mxu0 %v7513_v13  ;;  %3866 = vmatprep.subr.bf16.mxu1 %v7514_v35 }
 0x372   :  { %3804 = vmatpush1.bf16.msra.mxu0 %v7515_v27  ;;  %3868 = vmatpush1.bf16.msra.mxu1 %v7516_v61 }
 0x373   :  { %3806 = vmatprep.subr.bf16.mxu0 %v7517_v60  ;;  %3870 = vmatprep.subr.bf16.mxu1 %v7428_v54 }
 0x376   :  { %3808 = vmatpush1.bf16.msra.mxu0 %v7429_v45  ;;  %3872 = vmatpush1.bf16.msra.mxu1 %v7430_v19 }
 0x377   :  { %3810 = vmatprep.subr.bf16.mxu0 %v7431_v46  ;;  %3874 = vmatprep.subr.bf16.mxu1 %v7432_v50 }
 0x37a   :  { %3812 = vmatpush1.bf16.msra.mxu0 %v7433_v41  ;;  %3876 = vmatpush1.bf16.msra.mxu1 %v7434_v37 }
 0x37b   :  { %3814 = vmatprep.subr.bf16.mxu0 %v7435_v40  ;;  %3878 = vmatprep.subr.bf16.mxu1 %v7436_v49 }
 0x37e   :  { %3816 = vmatpush1.bf16.msra.mxu0 %v7437_v18  ;;  %3880 = vmatpush1.bf16.msra.mxu1 %v7438_v12 }
 0x37f   :  { %3818 = vmatprep.subr.bf16.mxu0 %v5807_v23  ;;  %3882 = vmatprep.subr.bf16.mxu1 %v5809_v0 }
 0x382   :  { %3820 = vmatpush1.bf16.msra.mxu0 %v5813_v26  ;;  %3884 = vmatpush1.bf16.msra.mxu1 %v5815_v2 }
 0x383   :  { %3822 = vmatprep.subr.bf16.mxu0 %v5819_v53  ;;  %3886 = vmatprep.subr.bf16.mxu1 %v5821_v31 }
 0x386   :  { %3824 = vmatpush1.bf16.msra.mxu0 %v5825_v52  ;;  %3888 = vmatpush1.bf16.msra.mxu1 %v5827_v58 }
 0x387   :  { %3826 = vmatprep.subr.bf16.mxu0 %v5831_v17  ;;  %3890 = vmatprep.subr.bf16.mxu1 %v5833_v59 }
 0x38a   :  { %3828 = vmatpush1.bf16.msra.mxu0 %v5837_v7  ;;  %3892 = vmatpush1.bf16.msra.mxu1 %v5839_v51  ;;  %v7518_v51 = vld [vmem:[#allocation14_spill] sm:$0xff]  ;;  %v7521_v7 = vld [vmem:[#allocation17_spill] sm:$0xff] }
 0x38b   :  { %3894 = vmatprep.subr.bf16.mxu0 %v5398_v6  ;;  %3958 = vmatprep.subr.bf16.mxu1 %v5400_v10  ;;  %v7519_v6 = vld [vmem:[#allocation15_spill] sm:$0xff]  ;;  %v7520_v10 = vld [vmem:[#allocation16_spill] sm:$0xff] }
 0x38d   :  { %1387 = vmatmul.mubr.f32.vlgmr.msra.gmra.mrb[10].mxu0 %v6113_v47  ;;  %1458 = vmatmul.mubr.f32.vlgmr.msra.gmra.mrb[10].mxu1 %v6113_v47  ;;  %v7522_v47 = vld [vmem:[#allocation18_spill] sm:$0xff] }
 0x38e   :  { %3896 = vmatpush1.bf16.msra.mxu0 %v5406_v15  ;;  %3960 = vmatpush1.bf16.msra.mxu1 %v5408_v16  ;;  %v7523_v15 = vld [vmem:[#allocation19_spill] sm:$0xff]  ;;  %v7524_v16 = vld [vmem:[#allocation20_spill] sm:$0xff] }
 0x38f   :  { %3898 = vmatprep.subr.bf16.mxu0 %v5411_v20  ;;  %3962 = vmatprep.subr.bf16.mxu1 %v5415_v24  ;;  %v7525_v20 = vld [vmem:[#allocation21_spill] sm:$0xff]  ;;  %v7526_v24 = vld [vmem:[#allocation22_spill] sm:$0xff] }
 0x392   :  { %3900 = vmatpush1.bf16.msra.mxu0 %v5417_v25  ;;  %3964 = vmatpush1.bf16.msra.mxu1 %v5420_v29  ;;  %v7527_v25 = vld [vmem:[#allocation23_spill] sm:$0xff]  ;;  %v7528_v29 = vld [vmem:[#allocation24_spill] sm:$0xff] }
 0x393   :  { %3902 = vmatprep.subr.bf16.mxu0 %v7518_v51  ;;  %3966 = vmatprep.subr.bf16.mxu1 %v7519_v6  ;;  %v7529_v51 = vld [vmem:[#allocation25_spill] sm:$0xff]  ;;  %v7530_v6 = vld [vmem:[#allocation26_spill] sm:$0xff] }
 0x396   :  { %3904 = vmatpush1.bf16.msra.mxu0 %v7520_v10  ;;  %3968 = vmatpush1.bf16.msra.mxu1 %v7521_v7  ;;  %v7531_v10 = vld [vmem:[#allocation27_spill] sm:$0xff]  ;;  %v7532_v7 = vld [vmem:[#allocation28_spill] sm:$0xff] }
 0x397   :  { %3906 = vmatprep.subr.bf16.mxu0 %v7522_v47  ;;  %3970 = vmatprep.subr.bf16.mxu1 %v7523_v15  ;;  %v7533_v47 = vld [vmem:[#allocation29_spill] sm:$0xff]  ;;  %v7534_v15 = vld [vmem:[#allocation30_spill] sm:$0xff] }
 0x39a   :  { %3908 = vmatpush1.bf16.msra.mxu0 %v7524_v16  ;;  %3972 = vmatpush1.bf16.msra.mxu1 %v7525_v20  ;;  %v7535_v16 = vld [vmem:[#allocation31_spill] sm:$0xff]  ;;  %v7536_v20 = vld [vmem:[#allocation32_spill] sm:$0xff] }
 0x39b   :  { %3910 = vmatprep.subr.bf16.mxu0 %v7526_v24  ;;  %3974 = vmatprep.subr.bf16.mxu1 %v7527_v25  ;;  %v7537_v24 = vld [vmem:[#allocation33_spill] sm:$0xff]  ;;  %v7538_v25 = vld [vmem:[#allocation34_spill] sm:$0xff] }
 0x39e   :  { %3912 = vmatpush1.bf16.msra.mxu0 %v7528_v29  ;;  %3976 = vmatpush1.bf16.msra.mxu1 %v7529_v51  ;;  %v7539_v29 = vld [vmem:[#allocation35_spill] sm:$0xff]  ;;  %v7540_v51 = vld [vmem:[#allocation36_spill] sm:$0xff] }
 0x39f   :  { %3914 = vmatprep.subr.bf16.mxu0 %v7530_v6  ;;  %3978 = vmatprep.subr.bf16.mxu1 %v7531_v10  ;;  %v7541_v6 = vld [vmem:[#allocation37_spill] sm:$0xff]  ;;  %v7542_v10 = vld [vmem:[#allocation38_spill] sm:$0xff] }
 0x3a2   :  { %3916 = vmatpush1.bf16.msra.mxu0 %v7532_v7  ;;  %3980 = vmatpush1.bf16.msra.mxu1 %v7533_v47  ;;  %v7543_v7 = vld [vmem:[#allocation39_spill] sm:$0xff]  ;;  %v7544_v47 = vld [vmem:[#allocation40_spill] sm:$0xff] }
 0x3a3   :  { %3918 = vmatprep.subr.bf16.mxu0 %v7534_v15  ;;  %3982 = vmatprep.subr.bf16.mxu1 %v7535_v16  ;;  %v7545_v15 = vld [vmem:[#allocation41_spill] sm:$0xff]  ;;  %v7546_v16 = vld [vmem:[#allocation42_spill] sm:$0xff] }
 0x3a6   :  { %3920 = vmatpush1.bf16.msra.mxu0 %v7536_v20  ;;  %3984 = vmatpush1.bf16.msra.mxu1 %v7537_v24  ;;  %v7547_v20 = vld [vmem:[#allocation43_spill] sm:$0xff]  ;;  %v7548_v24 = vld [vmem:[#allocation44_spill] sm:$0xff] }
 0x3a7   :  { %3922 = vmatprep.subr.bf16.mxu0 %v7538_v25  ;;  %3986 = vmatprep.subr.bf16.mxu1 %v7539_v29  ;;  %v7549_v25 = vld [vmem:[#allocation45_spill] sm:$0xff]  ;;  %v7550_v29 = vld [vmem:[#allocation46_spill] sm:$0xff] }
 0x3aa   :  { %3924 = vmatpush1.bf16.msra.mxu0 %v7540_v51  ;;  %3988 = vmatpush1.bf16.msra.mxu1 %v7541_v6  ;;  %v7551_v51 = vld [vmem:[#allocation47_spill] sm:$0xff]  ;;  %v7552_v6 = vld [vmem:[#allocation48_spill] sm:$0xff] }
 0x3ab   :  { %3926 = vmatprep.subr.bf16.mxu0 %v7542_v10  ;;  %3990 = vmatprep.subr.bf16.mxu1 %v7543_v7  ;;  %v7553_v10 = vld [vmem:[#allocation49_spill] sm:$0xff]  ;;  %v7554_v7 = vld [vmem:[#allocation50_spill] sm:$0xff] }
 0x3ae   :  { %3928 = vmatpush1.bf16.msra.mxu0 %v7544_v47  ;;  %3992 = vmatpush1.bf16.msra.mxu1 %v7545_v15  ;;  %v7555_v47 = vld [vmem:[#allocation51_spill] sm:$0xff]  ;;  %v7556_v15 = vld [vmem:[#allocation52_spill] sm:$0xff] }
 0x3af   :  { %3930 = vmatprep.subr.bf16.mxu0 %v7546_v16  ;;  %3994 = vmatprep.subr.bf16.mxu1 %v7547_v20  ;;  %v7557_v16 = vld [vmem:[#allocation53_spill] sm:$0xff]  ;;  %v7558_v20 = vld [vmem:[#allocation54_spill] sm:$0xff] }
 0x3b2   :  { %3932 = vmatpush1.bf16.msra.mxu0 %v7548_v24  ;;  %3996 = vmatpush1.bf16.msra.mxu1 %v7549_v25  ;;  %v7559_v24 = vld [vmem:[#allocation55_spill] sm:$0xff]  ;;  %v7560_v25 = vld [vmem:[#allocation56_spill] sm:$0xff] }
 0x3b3   :  { %3934 = vmatprep.subr.bf16.mxu0 %v7550_v29  ;;  %3998 = vmatprep.subr.bf16.mxu1 %v7551_v51  ;;  %v7561_v29 = vld [vmem:[#allocation57_spill] sm:$0xff]  ;;  %v7562_v51 = vld [vmem:[#allocation58_spill] sm:$0xff] }
 0x3b6   :  { %3936 = vmatpush1.bf16.msra.mxu0 %v7552_v6  ;;  %4000 = vmatpush1.bf16.msra.mxu1 %v7553_v10  ;;  %v7563_v6 = vld [vmem:[#allocation59_spill] sm:$0xff]  ;;  %v7564_v10 = vld [vmem:[#allocation60_spill] sm:$0xff] }
 0x3b7   :  { %3938 = vmatprep.subr.bf16.mxu0 %v7554_v7  ;;  %4002 = vmatprep.subr.bf16.mxu1 %v7555_v47  ;;  %v7565_v7 = vld [vmem:[#allocation61_spill] sm:$0xff]  ;;  %v7566_v47 = vld [vmem:[#allocation62_spill] sm:$0xff] }
 0x3ba   :  { %3940 = vmatpush1.bf16.msra.mxu0 %v7556_v15  ;;  %4004 = vmatpush1.bf16.msra.mxu1 %v7557_v16  ;;  %v7567_v15 = vld [vmem:[#allocation63_spill] sm:$0xff]  ;;  %v7568_v16 = vld [vmem:[#allocation64_spill] sm:$0xff] }
 0x3bb   :  { %3942 = vmatprep.subr.bf16.mxu0 %v7558_v20  ;;  %4006 = vmatprep.subr.bf16.mxu1 %v7559_v24  ;;  %v7569_v20 = vld [vmem:[#allocation65_spill] sm:$0xff]  ;;  %v7570_v24 = vld [vmem:[#allocation66_spill] sm:$0xff] }
 0x3be   :  { %3944 = vmatpush1.bf16.msra.mxu0 %v7560_v25  ;;  %4008 = vmatpush1.bf16.msra.mxu1 %v7561_v29  ;;  %v7571_v25 = vld [vmem:[#allocation67_spill] sm:$0xff]  ;;  %v7572_v29 = vld [vmem:[#allocation68_spill] sm:$0xff] }
 0x3bf   :  { %3946 = vmatprep.subr.bf16.mxu0 %v7562_v51  ;;  %4010 = vmatprep.subr.bf16.mxu1 %v7563_v6  ;;  %v7573_v51 = vld [vmem:[#allocation69_spill] sm:$0xff]  ;;  %v7574_v6 = vld [vmem:[#allocation70_spill] sm:$0xff] }
 0x3c2   :  { %3948 = vmatpush1.bf16.msra.mxu0 %v7564_v10  ;;  %4012 = vmatpush1.bf16.msra.mxu1 %v7565_v7  ;;  %v7575_v10 = vld [vmem:[#allocation71_spill] sm:$0xff]  ;;  %v69_v7 = vpop.permute.xlu1 %68 }
 0x3c3   :  { %3950 = vmatprep.subr.bf16.mxu0 %v7566_v47  ;;  %4014 = vmatprep.subr.bf16.mxu1 %v7567_v15  ;;  %v7576_v47 = vld [vmem:[#allocation74_spill] sm:$0xff]  ;;  %v7577_v15 = vld [vmem:[#allocation75_spill] sm:$0xff] }
 0x3c4   :  { %v124_v59 = vmul.f32 %v7576_v47, %v69_v7  ;;  %v125_v17 = vmul.f32 %v7577_v15, %v69_v7 }
 0x3c6   :  { %3952 = vmatpush1.bf16.msra.mxu0 %v7568_v16  ;;  %4016 = vmatpush1.bf16.msra.mxu1 %v7569_v20  ;;  %v178_v16 = vadd.f32 %v7478_v28, %v124_v59 }
 0x3c7   :  { %3954 = vmatprep.subr.bf16.mxu0 %v7570_v24  ;;  %4018 = vmatprep.subr.bf16.mxu1 %v7571_v25  ;;  %v7578_v24 = vld [vmem:[#allocation78_spill] sm:$0xff] }
 0x3c8   :  { %v179_v52 = vadd.f32 %v7578_v24, %v125_v17 }
 0x3ca   :  { %3956 = vmatpush1.bf16.msra.mxu0 %v7572_v29  ;;  %4020 = vmatpush1.bf16.msra.mxu1 %v7573_v51 }
 0x3cb   :  { %4022 = vmatprep.subr.bf16.mxu0 %v7574_v6  ;;  %4086 = vmatprep.subr.bf16.mxu1 %v7575_v10  ;;  %v126_v10 = vmul.f32 %v7480_v9, %v69_v7  ;;  %v7579_v6 = vld [vmem:[#allocation83_spill] sm:$0xff] }
 0x3cd   :  { %v180_v47 = vadd.f32 %v7579_v6, %v126_v10  ;;  %v127_v10 = vmul.f32 %v7482_v5, %v69_v7 }
 0x420   :  { %v1246_v20 = vpop.f32.mrb[8].mxu0  ;;  %v1317_v58 = vpop.f32.mrb[8].mxu1 }
 0x421   :  { %v1468_v25 = vadd.f32 %v1246_v20, %v178_v16  ;;  %v1248_v31 = vpop.f32.mrb[9].mxu0  ;;  %v1319_v29 = vpop.f32.mrb[9].mxu1  ;;  %v1470_v26 = vadd.f32 %v1317_v58, %v180_v47  ;;  %v181_v47 = vadd.f32 %v7386_v33, %v127_v10 }
 0x422   :  { %v1469_v53 = vadd.f32 %v1248_v31, %v179_v52 }
 0x423   :  { %v3091_v51 = vmul.f32 -1.442695, %v1468_v25 }
 0x424   :  { %v3093_v2 = vmul.f32 -1.442695, %v1469_v53 }
 0x425   :  { %5132 = vpow2.f32 %v3091_v51 }
 0x426   :  { %5134 = vpow2.f32 %v3093_v2 }
 0x427   :  { %5136 = vtanh.f32 %v1470_v26 }
 0x42f   :  { %v5133_v15 = vpop.eup %5132 }
 0x430   :  { %v5135_v0 = vpop.eup %5134  ;;  %v1479_v59 = vadd.f32 1.0, %v5133_v15 }
 0x431   :  { %v1491_v28 = vadd.f32 1.0, %v5135_v0  ;;  %v5137_v16 = vpop.eup %5136 }
 0x432   :  { %5138 = vrcp.f32 %v1479_v59  ;;  %v1471_v59 = vadd.f32 %v1319_v29, %v181_v47 }
 0x433   :  { %5140 = vrcp.f32 %v1491_v28 }
 0x43c   :  { %v5139_v20 = vpop.eup %5138 }
 0x43d   :  { %v5141_v17 = vpop.eup %5140  ;;  %v1513_v31 = vmul.f32 %v5139_v20, %v5137_v16  ;;  %v3095_v16 = vmul.f32 -1.442695, %v1471_v59 }
 0x43e   :  { %v1511_v25 = vmul.f32 %v5141_v17, %v6100_v57 }
 0x440   :  { %v6254_v53 = vadd.f32 %v1513_v31, %v1511_v25 }
 0x460   :  { %v1388_v2 = vpop.f32.mrb[10].mxu0  ;;  %v1459_v52 = vpop.f32.mrb[10].mxu1 }
 0x461   :  { %v1464_v58 = vadd.f32 %v1388_v2, %v7483_v56  ;;  %v1390_v51 = vpop.f32.mrb[11].mxu0  ;;  %v1461_v15 = vpop.f32.mrb[11].mxu1  ;;  %v1466_v17 = vadd.f32 %v1459_v52, %v5952_v14 }
 0x462   :  { %v1465_v0 = vadd.f32 %v1390_v51, %v5941_v36  ;;  %v1467_v57 = vadd.f32 %v1461_v15, %v5947_v8 }
 0x463   :  { %v3090_v26 = vmul.f32 -1.442695, %v1464_v58 }
 0x464   :  { %v3092_v28 = vmul.f32 -1.442695, %v1465_v0  ;;  %v3094_v20 = vmul.f32 -1.442695, %v1467_v57 }
 0x465   :  { %5142 = vpow2.f32 %v3090_v26 }
 0x466   :  { %5144 = vpow2.f32 %v3092_v28 }
 0x467   :  { %5146 = vpow2.f32 %v3095_v16 }
 0x468   :  { %5148 = vpow2.f32 %v3094_v20 }
 0x469   :  { %5150 = vtanh.f32 %v1466_v17 }
 0x46f   :  { %v5143_v7 = vpop.eup %5142 }
 0x470   :  { %v5145_v31 = vpop.eup %5144  ;;  %v1478_v25 = vadd.f32 1.0, %v5143_v7 }
 0x471   :  { %v1490_v2 = vadd.f32 1.0, %v5145_v31  ;;  %v5147_v58 = vpop.eup %5146  ;;  %v7581_v31 = vld [vmem:[#allocation97_spill] sm:$0xff] }
 0x472   :  { %5152 = vrcp.f32 %v1478_v25  ;;  %v5149_v10 = vpop.eup %5148  ;;  %v1505_v47 = vadd.f32 1.0, %v5147_v58  ;;  %v7582_v25 = vld [vmem:[#allocation98_spill] sm:$0xff]  ;;  %v7584_v58 = vld [vmem:[#allocation100_spill] sm:$0xff] }
 0x473   :  { %5154 = vrcp.f32 %v1490_v2  ;;  %v5151_v51 = vpop.eup %5150  ;;  %v1504_v15 = vadd.f32 1.0, %v5149_v10  ;;  %v7583_v2 = vld [vmem:[#allocation99_spill] sm:$0xff]  ;;  %v7585_v10 = vld [vmem:[#allocation101_spill] sm:$0xff] }
 0x474   :  { %5156 = vtanh.f32 %v6254_v53 }
 0x475   :  { %5158 = vrcp.f32 %v1504_v15  ;;  %v7590_v15 = vld [vmem:[#allocation106_spill] sm:$0xff] }
 0x47c   :  { %v5153_v0 = vpop.eup %5152 }
 0x47d   :  { %v5155_v29 = vpop.eup %5154  ;;  %v1512_v26 = vmul.f32 %v5153_v0, %v5151_v51  ;;  %v7586_v51 = vld [vmem:[#allocation102_spill] sm:$0xff]  ;;  %v7587_v0 = vld [vmem:[#allocation103_spill] sm:$0xff] }
 0x47e   :  { %v1510_v28 = vmul.f32 %v5155_v29, %v6109_v11  ;;  %v5157_v59 = vpop.eup %5156  ;;  %v7580_v11 = vld [vmem:[#allocation96_spill] sm:$0xff] }
 0x47f   :  { %v5159_v57 = vpop.eup %5158  ;;  %v7588_v29 = vld [vmem:[#allocation104_spill] sm:$0xff] }
 0x480   :  { %v6263_v52 = vadd.f32 %v1512_v26, %v1510_v28  ;;  %v7589_v26 = vld [vmem:[#allocation105_spill] sm:$0xff]  ;;  %v7591_v28 = vld [vmem:[#allocation107_spill] sm:$0xff] }
 0x482   :  { %5160 = vtanh.f32 %v6263_v52 }
 0x483   :  { %5162 = vrcp.f32 %v1505_v47  ;;  %v7592_v47 = vld [vmem:[#allocation108_spill] sm:$0xff] }
 0x48c   :  { %v5161_v16 = vpop.eup %5160 }
 0x48d   :  { %v5163_v20 = vpop.eup %5162  ;;  %v1518_v17 = vmul.f32 %v5161_v16, %v5159_v57  ;;  %v7594_v57 = vld [vmem:[#allocation110_spill] sm:$0xff]  ;;  %v7595_v16 = vld [vmem:[#allocation111_spill] sm:$0xff] }
 0x48e   :  { %v6267_v7 = vmul.f32 %v5163_v20, %v5157_v59  ;;  %v7593_v59 = vld [vmem:[#allocation109_spill] sm:$0xff]  ;;  %v7596_v20 = vld [vmem:[#allocation112_spill] sm:$0xff] }
 0x48f   :  { %1584 = vmatprep.mubr.f32.mxu0 %v1518_v17  ;;  %1655 = vmatprep.mubr.f32.mxu1 %v1518_v17 }
 0x490   :  { %1585 = vmatmul.mubr.f32.vlgmr.msra.gmra.mrb[12].mxu0 %v6267_v7  ;;  %1656 = vmatmul.mubr.f32.vlgmr.msra.gmra.mrb[12].mxu1 %v6267_v7 }
 0x491   :  { %4024 = vmatpush1.bf16.msra.mxu0 %v7389_v63  ;;  %4088 = vmatpush1.bf16.msra.mxu1 %v7390_v62 }
 0x492   :  { %1726 = vmatprep.mubr.f32.mxu0 %v1518_v17  ;;  %1797 = vmatprep.mubr.f32.mxu1 %v1518_v17  ;;  %v7597_v17 = vld [vmem:[#allocation136_spill] sm:$0xff] }
 0x493   :  { %4026 = vmatprep.subr.bf16.mxu0 %v7391_v32  ;;  %4090 = vmatprep.subr.bf16.mxu1 %v7392_v1 }
 0x495   :  { %4028 = vmatpush1.bf16.msra.mxu0 %v7393_v55  ;;  %4092 = vmatpush1.bf16.msra.mxu1 %v7484_v3 }
 0x496   :  { %4030 = vmatprep.subr.bf16.mxu0 %v7485_v44  ;;  %4094 = vmatprep.subr.bf16.mxu1 %v7486_v42 }
 0x499   :  { %4032 = vmatpush1.bf16.msra.mxu0 %v7487_v43  ;;  %4096 = vmatpush1.bf16.msra.mxu1 %v7488_v22 }
 0x49a   :  { %4034 = vmatprep.subr.bf16.mxu0 %v7489_v34  ;;  %4098 = vmatprep.subr.bf16.mxu1 %v7580_v11 }
 0x49d   :  { %4036 = vmatpush1.bf16.msra.mxu0 %v7581_v31  ;;  %4100 = vmatpush1.bf16.msra.mxu1 %v7582_v25 }
 0x49e   :  { %4038 = vmatprep.subr.bf16.mxu0 %v7583_v2  ;;  %4102 = vmatprep.subr.bf16.mxu1 %v7584_v58 }
 0x4a1   :  { %4040 = vmatpush1.bf16.msra.mxu0 %v7585_v10  ;;  %4104 = vmatpush1.bf16.msra.mxu1 %v7586_v51 }
 0x4a2   :  { %4042 = vmatprep.subr.bf16.mxu0 %v7587_v0  ;;  %4106 = vmatprep.subr.bf16.mxu1 %v7588_v29 }
 0x4a5   :  { %4044 = vmatpush1.bf16.msra.mxu0 %v7589_v26  ;;  %4108 = vmatpush1.bf16.msra.mxu1 %v7590_v15 }
 0x4a6   :  { %4046 = vmatprep.subr.bf16.mxu0 %v7591_v28  ;;  %4110 = vmatprep.subr.bf16.mxu1 %v7592_v47 }
 0x4a9   :  { %4048 = vmatpush1.bf16.msra.mxu0 %v7593_v59  ;;  %4112 = vmatpush1.bf16.msra.mxu1 %v7594_v57 }
 0x4aa   :  { %4050 = vmatprep.subr.bf16.mxu0 %v7595_v16  ;;  %4114 = vmatprep.subr.bf16.mxu1 %v7596_v20 }
 0x4ad   :  { %4052 = vmatpush1.bf16.msra.mxu0 %v7507_v38  ;;  %4116 = vmatpush1.bf16.msra.mxu1 %v7508_v30 }
 0x4ae   :  { %4054 = vmatprep.subr.bf16.mxu0 %v7509_v39  ;;  %4118 = vmatprep.subr.bf16.mxu1 %v7510_v21 }
 0x4b1   :  { %4056 = vmatpush1.bf16.msra.mxu0 %v7511_v48  ;;  %4120 = vmatpush1.bf16.msra.mxu1 %v7512_v4 }
 0x4b2   :  { %4058 = vmatprep.subr.bf16.mxu0 %v7513_v13  ;;  %4122 = vmatprep.subr.bf16.mxu1 %v7514_v35 }
 0x4b5   :  { %4060 = vmatpush1.bf16.msra.mxu0 %v7515_v27  ;;  %4124 = vmatpush1.bf16.msra.mxu1 %v7516_v61 }
 0x4b6   :  { %4062 = vmatprep.subr.bf16.mxu0 %v7517_v60  ;;  %4126 = vmatprep.subr.bf16.mxu1 %v7428_v54 }
 0x4b9   :  { %4064 = vmatpush1.bf16.msra.mxu0 %v7429_v45  ;;  %4128 = vmatpush1.bf16.msra.mxu1 %v7430_v19  ;;  %v7598_v19 = vld [vmem:[#allocation137_spill] sm:$0xff] }
 0x4ba   :  { %4066 = vmatprep.subr.bf16.mxu0 %v7431_v46  ;;  %4130 = vmatprep.subr.bf16.mxu1 %v7432_v50  ;;  %v7599_v46 = vld [vmem:[#allocation138_spill] sm:$0xff]  ;;  %v7600_v50 = vld [vmem:[#allocation139_spill] sm:$0xff] }
 0x4bd   :  { %4068 = vmatpush1.bf16.msra.mxu0 %v7433_v41  ;;  %4132 = vmatpush1.bf16.msra.mxu1 %v7434_v37  ;;  %v7601_v41 = vld [vmem:[#allocation140_spill] sm:$0xff]  ;;  %v7602_v37 = vld [vmem:[#allocation141_spill] sm:$0xff] }
 0x4be   :  { %4070 = vmatprep.subr.bf16.mxu0 %v7435_v40  ;;  %4134 = vmatprep.subr.bf16.mxu1 %v7436_v49  ;;  %v7603_v40 = vld [vmem:[#allocation142_spill] sm:$0xff]  ;;  %v7604_v49 = vld [vmem:[#allocation143_spill] sm:$0xff] }
 0x4c1   :  { %4072 = vmatpush1.bf16.msra.mxu0 %v7437_v18  ;;  %4136 = vmatpush1.bf16.msra.mxu1 %v7438_v12  ;;  %v7605_v18 = vld [vmem:[#allocation144_spill] sm:$0xff]  ;;  %v7606_v12 = vld [vmem:[#allocation145_spill] sm:$0xff] }
 0x4c2   :  { %4074 = vmatprep.subr.bf16.mxu0 %v5807_v23  ;;  %4138 = vmatprep.subr.bf16.mxu1 %v7597_v17  ;;  %v7607_v23 = vld [vmem:[#allocation146_spill] sm:$0xff] }
 0x4c3   :  { %v7608_v17 = vld [vmem:[#allocation6_spill] sm:$0xff] }
 0x4c5   :  { %4076 = vmatpush1.bf16.msra.mxu0 %v7598_v19  ;;  %4140 = vmatpush1.bf16.msra.mxu1 %v7599_v46  ;;  %v7609_v19 = vld [vmem:[#allocation7_spill] sm:$0xff] }
 0x4c6   :  { %4078 = vmatprep.subr.bf16.mxu0 %v7600_v50  ;;  %4142 = vmatprep.subr.bf16.mxu1 %v7601_v41  ;;  %v7610_v41 = vld [vmem:[#allocation8_spill] sm:$0xff]  ;;  %v7619_v50 = vld [vmem:[#allocation17_spill] sm:$0xff] }
 0x4c9   :  { %4080 = vmatpush1.bf16.msra.mxu0 %v7602_v37  ;;  %4144 = vmatpush1.bf16.msra.mxu1 %v7603_v40  ;;  %v7611_v37 = vld [vmem:[#allocation9_spill] sm:$0xff]  ;;  %v7612_v40 = vld [vmem:[#allocation10_spill] sm:$0xff] }
 0x4ca   :  { %4082 = vmatprep.subr.bf16.mxu0 %v7604_v49  ;;  %4146 = vmatprep.subr.bf16.mxu1 %v7605_v18  ;;  %v7613_v49 = vld [vmem:[#allocation11_spill] sm:$0xff]  ;;  %v7614_v18 = vld [vmem:[#allocation12_spill] sm:$0xff] }
 0x4cd   :  { %4084 = vmatpush1.bf16.msra.mxu0 %v7606_v12  ;;  %4148 = vmatpush1.bf16.msra.mxu1 %v7607_v23  ;;  %v7615_v12 = vld [vmem:[#allocation13_spill] sm:$0xff]  ;;  %v7616_v23 = vld [vmem:[#allocation14_spill] sm:$0xff] }
 0x4ce   :  { %4150 = vmatprep.subr.bf16.mxu0 %v7608_v17  ;;  %4214 = vmatprep.subr.bf16.mxu1 %v7609_v19  ;;  %v7617_v17 = vld [vmem:[#allocation15_spill] sm:$0xff]  ;;  %v7618_v19 = vld [vmem:[#allocation16_spill] sm:$0xff] }
 0x4d0   :  { %1727 = vmatmul.mubr.f32.vlgmr.msra.gmra.mrb[14].mxu0 %v6267_v7  ;;  %1798 = vmatmul.mubr.f32.vlgmr.msra.gmra.mrb[14].mxu1 %v6267_v7  ;;  %v7620_v7 = vld [vmem:[#allocation18_spill] sm:$0xff] }
 0x4d1   :  { %4152 = vmatpush1.bf16.msra.mxu0 %v7610_v41  ;;  %4216 = vmatpush1.bf16.msra.mxu1 %v7611_v37  ;;  %v7621_v41 = vld [vmem:[#allocation19_spill] sm:$0xff]  ;;  %v7622_v37 = vld [vmem:[#allocation20_spill] sm:$0xff] }
 0x4d2   :  { %4154 = vmatprep.subr.bf16.mxu0 %v7612_v40  ;;  %4218 = vmatprep.subr.bf16.mxu1 %v7613_v49  ;;  %v7623_v40 = vld [vmem:[#allocation21_spill] sm:$0xff]  ;;  %v7624_v49 = vld [vmem:[#allocation22_spill] sm:$0xff] }
 0x4d5   :  { %4156 = vmatpush1.bf16.msra.mxu0 %v7614_v18  ;;  %4220 = vmatpush1.bf16.msra.mxu1 %v7615_v12  ;;  %v7625_v18 = vld [vmem:[#allocation23_spill] sm:$0xff]  ;;  %v7626_v12 = vld [vmem:[#allocation24_spill] sm:$0xff] }
 0x4d6   :  { %4158 = vmatprep.subr.bf16.mxu0 %v7616_v23  ;;  %4222 = vmatprep.subr.bf16.mxu1 %v7617_v17  ;;  %v7627_v23 = vld [vmem:[#allocation25_spill] sm:$0xff]  ;;  %v7628_v17 = vld [vmem:[#allocation26_spill] sm:$0xff] }
 0x4d9   :  { %4160 = vmatpush1.bf16.msra.mxu0 %v7618_v19  ;;  %4224 = vmatpush1.bf16.msra.mxu1 %v7619_v50  ;;  %v7629_v19 = vld [vmem:[#allocation27_spill] sm:$0xff]  ;;  %v7630_v50 = vld [vmem:[#allocation28_spill] sm:$0xff] }
 0x4da   :  { %4162 = vmatprep.subr.bf16.mxu0 %v7620_v7  ;;  %4226 = vmatprep.subr.bf16.mxu1 %v7621_v41  ;;  %v7631_v7 = vld [vmem:[#allocation29_spill] sm:$0xff]  ;;  %v7632_v41 = vld [vmem:[#allocation30_spill] sm:$0xff] }
 0x4dd   :  { %4164 = vmatpush1.bf16.msra.mxu0 %v7622_v37  ;;  %4228 = vmatpush1.bf16.msra.mxu1 %v7623_v40  ;;  %v7633_v37 = vld [vmem:[#allocation31_spill] sm:$0xff]  ;;  %v7634_v40 = vld [vmem:[#allocation32_spill] sm:$0xff] }
 0x4de   :  { %4166 = vmatprep.subr.bf16.mxu0 %v7624_v49  ;;  %4230 = vmatprep.subr.bf16.mxu1 %v7625_v18  ;;  %v7635_v49 = vld [vmem:[#allocation33_spill] sm:$0xff]  ;;  %v7636_v18 = vld [vmem:[#allocation34_spill] sm:$0xff] }
 0x4e1   :  { %4168 = vmatpush1.bf16.msra.mxu0 %v7626_v12  ;;  %4232 = vmatpush1.bf16.msra.mxu1 %v7627_v23  ;;  %v7637_v12 = vld [vmem:[#allocation35_spill] sm:$0xff]  ;;  %v7638_v23 = vld [vmem:[#allocation36_spill] sm:$0xff] }
 0x4e2   :  { %4170 = vmatprep.subr.bf16.mxu0 %v7628_v17  ;;  %4234 = vmatprep.subr.bf16.mxu1 %v7629_v19  ;;  %v7639_v17 = vld [vmem:[#allocation37_spill] sm:$0xff]  ;;  %v7640_v19 = vld [vmem:[#allocation38_spill] sm:$0xff] }
 0x4e5   :  { %4172 = vmatpush1.bf16.msra.mxu0 %v7630_v50  ;;  %4236 = vmatpush1.bf16.msra.mxu1 %v7631_v7  ;;  %v7641_v50 = vld [vmem:[#allocation39_spill] sm:$0xff]  ;;  %v7642_v7 = vld [vmem:[#allocation40_spill] sm:$0xff] }
 0x4e6   :  { %4174 = vmatprep.subr.bf16.mxu0 %v7632_v41  ;;  %4238 = vmatprep.subr.bf16.mxu1 %v7633_v37  ;;  %v7643_v41 = vld [vmem:[#allocation41_spill] sm:$0xff]  ;;  %v7644_v37 = vld [vmem:[#allocation42_spill] sm:$0xff] }
 0x4e9   :  { %4176 = vmatpush1.bf16.msra.mxu0 %v7634_v40  ;;  %4240 = vmatpush1.bf16.msra.mxu1 %v7635_v49  ;;  %v7645_v40 = vld [vmem:[#allocation43_spill] sm:$0xff]  ;;  %v7646_v49 = vld [vmem:[#allocation44_spill] sm:$0xff] }
 0x4ea   :  { %4178 = vmatprep.subr.bf16.mxu0 %v7636_v18  ;;  %4242 = vmatprep.subr.bf16.mxu1 %v7637_v12  ;;  %v7647_v18 = vld [vmem:[#allocation45_spill] sm:$0xff]  ;;  %v7648_v12 = vld [vmem:[#allocation46_spill] sm:$0xff] }
 0x4ed   :  { %4180 = vmatpush1.bf16.msra.mxu0 %v7638_v23  ;;  %4244 = vmatpush1.bf16.msra.mxu1 %v7639_v17  ;;  %v7649_v23 = vld [vmem:[#allocation47_spill] sm:$0xff]  ;;  %v7650_v17 = vld [vmem:[#allocation48_spill] sm:$0xff] }
 0x4ee   :  { %4182 = vmatprep.subr.bf16.mxu0 %v7640_v19  ;;  %4246 = vmatprep.subr.bf16.mxu1 %v7641_v50  ;;  %v7651_v19 = vld [vmem:[#allocation49_spill] sm:$0xff]  ;;  %v7652_v50 = vld [vmem:[#allocation50_spill] sm:$0xff] }
 0x4f1   :  { %4184 = vmatpush1.bf16.msra.mxu0 %v7642_v7  ;;  %4248 = vmatpush1.bf16.msra.mxu1 %v7643_v41  ;;  %v7653_v7 = vld [vmem:[#allocation51_spill] sm:$0xff]  ;;  %v7654_v41 = vld [vmem:[#allocation52_spill] sm:$0xff] }
 0x4f2   :  { %4186 = vmatprep.subr.bf16.mxu0 %v7644_v37  ;;  %4250 = vmatprep.subr.bf16.mxu1 %v7645_v40  ;;  %v7655_v37 = vld [vmem:[#allocation53_spill] sm:$0xff]  ;;  %v7656_v40 = vld [vmem:[#allocation54_spill] sm:$0xff] }
 0x4f5   :  { %4188 = vmatpush1.bf16.msra.mxu0 %v7646_v49  ;;  %4252 = vmatpush1.bf16.msra.mxu1 %v7647_v18  ;;  %v7657_v49 = vld [vmem:[#allocation55_spill] sm:$0xff]  ;;  %v7658_v18 = vld [vmem:[#allocation56_spill] sm:$0xff] }
 0x4f6   :  { %4190 = vmatprep.subr.bf16.mxu0 %v7648_v12  ;;  %4254 = vmatprep.subr.bf16.mxu1 %v7649_v23  ;;  %v7659_v12 = vld [vmem:[#allocation57_spill] sm:$0xff]  ;;  %v7660_v23 = vld [vmem:[#allocation58_spill] sm:$0xff] }
 0x4f9   :  { %4192 = vmatpush1.bf16.msra.mxu0 %v7650_v17  ;;  %4256 = vmatpush1.bf16.msra.mxu1 %v7651_v19  ;;  %v7661_v17 = vld [vmem:[#allocation59_spill] sm:$0xff]  ;;  %v7662_v19 = vld [vmem:[#allocation60_spill] sm:$0xff] }
 0x4fa   :  { %4194 = vmatprep.subr.bf16.mxu0 %v7652_v50  ;;  %4258 = vmatprep.subr.bf16.mxu1 %v7653_v7  ;;  %v7663_v50 = vld [vmem:[#allocation61_spill] sm:$0xff]  ;;  %v7664_v7 = vld [vmem:[#allocation62_spill] sm:$0xff] }
 0x4fd   :  { %4196 = vmatpush1.bf16.msra.mxu0 %v7654_v41  ;;  %4260 = vmatpush1.bf16.msra.mxu1 %v7655_v37  ;;  %v7665_v41 = vld [vmem:[#allocation63_spill] sm:$0xff]  ;;  %v7666_v37 = vld [vmem:[#allocation64_spill] sm:$0xff] }
 0x4fe   :  { %4198 = vmatprep.subr.bf16.mxu0 %v7656_v40  ;;  %4262 = vmatprep.subr.bf16.mxu1 %v7657_v49  ;;  %v7667_v40 = vld [vmem:[#allocation65_spill] sm:$0xff]  ;;  %v7668_v49 = vld [vmem:[#allocation66_spill] sm:$0xff] }
 0x501   :  { %4200 = vmatpush1.bf16.msra.mxu0 %v7658_v18  ;;  %4264 = vmatpush1.bf16.msra.mxu1 %v7659_v12  ;;  %v7669_v18 = vld [vmem:[#allocation67_spill] sm:$0xff]  ;;  %v7670_v12 = vld [vmem:[#allocation68_spill] sm:$0xff] }
 0x502   :  { %4202 = vmatprep.subr.bf16.mxu0 %v7660_v23  ;;  %4266 = vmatprep.subr.bf16.mxu1 %v7661_v17  ;;  %v7671_v23 = vld [vmem:[#allocation69_spill] sm:$0xff]  ;;  %v7672_v17 = vld [vmem:[#allocation70_spill] sm:$0xff] }
 0x505   :  { %4204 = vmatpush1.bf16.msra.mxu0 %v7662_v19  ;;  %4268 = vmatpush1.bf16.msra.mxu1 %v7663_v50  ;;  %v7673_v19 = vld [vmem:[#allocation71_spill] sm:$0xff]  ;;  %v74_v50 = vpop.permute.xlu0 %73 }
 0x506   :  { %4206 = vmatprep.subr.bf16.mxu0 %v7664_v7  ;;  %4270 = vmatprep.subr.bf16.mxu1 %v7665_v41  ;;  %v7674_v7 = vld [vmem:[#allocation74_spill] sm:$0xff]  ;;  %v7675_v41 = vld [vmem:[#allocation75_spill] sm:$0xff] }
 0x507   :  { %v128_v46 = vmul.f32 %v7674_v7, %v74_v50  ;;  %v129_v45 = vmul.f32 %v7675_v41, %v74_v50 }
 0x509   :  { %4208 = vmatpush1.bf16.msra.mxu0 %v7666_v37  ;;  %4272 = vmatpush1.bf16.msra.mxu1 %v7667_v40  ;;  %v7676_v37 = vld [vmem:[#allocation77_spill] sm:$0xff] }
 0x50a   :  { %4210 = vmatprep.subr.bf16.mxu0 %v7668_v49  ;;  %4274 = vmatprep.subr.bf16.mxu1 %v7669_v18  ;;  %v182_v54 = vadd.f32 %v7676_v37, %v128_v46  ;;  %v183_v49 = vadd.f32 %v7578_v24, %v129_v45 }
 0x50d   :  { %4212 = vmatpush1.bf16.msra.mxu0 %v7670_v12  ;;  %4276 = vmatpush1.bf16.msra.mxu1 %v7671_v23 }
 0x50e   :  { %4278 = vmatprep.subr.bf16.mxu0 %v7672_v17  ;;  %4342 = vmatprep.subr.bf16.mxu1 %v7673_v19  ;;  %v130_v19 = vmul.f32 %v7480_v9, %v74_v50 }
 0x510   :  { %v184_v7 = vadd.f32 %v7579_v6, %v130_v19  ;;  %v131_v19 = vmul.f32 %v7482_v5, %v74_v50 }
 0x563   :  { %v1586_v40 = vpop.f32.mrb[12].mxu0  ;;  %v1657_v60 = vpop.f32.mrb[12].mxu1 }
 0x564   :  { %v1808_v18 = vadd.f32 %v1586_v40, %v182_v54  ;;  %v1588_v61 = vpop.f32.mrb[13].mxu0  ;;  %v1659_v12 = vpop.f32.mrb[13].mxu1  ;;  %v1810_v17 = vadd.f32 %v1657_v60, %v184_v7  ;;  %v185_v7 = vadd.f32 %v7386_v33, %v131_v19 }
 0x565   :  { %v1809_v27 = vadd.f32 %v1588_v61, %v183_v49 }
 0x566   :  { %v3097_v23 = vmul.f32 -1.442695, %v1808_v18 }
 0x567   :  { %v3099_v35 = vmul.f32 -1.442695, %v1809_v27 }
 0x568   :  { %5164 = vpow2.f32 %v3097_v23 }
 0x569   :  { %5166 = vpow2.f32 %v3099_v35 }
 0x56a   :  { %5168 = vtanh.f32 %v1810_v17 }
 0x572   :  { %v5165_v41 = vpop.eup %5164 }
 0x573   :  { %v5167_v13 = vpop.eup %5166  ;;  %v1819_v46 = vadd.f32 1.0, %v5165_v41 }
 0x574   :  { %v1831_v37 = vadd.f32 1.0, %v5167_v13  ;;  %v5169_v54 = vpop.eup %5168 }
 0x575   :  { %5170 = vrcp.f32 %v1819_v46  ;;  %v1811_v46 = vadd.f32 %v1659_v12, %v185_v7 }
 0x576   :  { %5172 = vrcp.f32 %v1831_v37 }
 0x57f   :  { %v5171_v45 = vpop.eup %5170 }
 0x580   :  { %v5173_v40 = vpop.eup %5172  ;;  %v1853_v49 = vmul.f32 %v5171_v45, %v5169_v54  ;;  %v3101_v54 = vmul.f32 -1.442695, %v1811_v46 }
 0x581   :  { %v1851_v18 = vmul.f32 %v5173_v40, %v6254_v53 }
 0x583   :  { %v6408_v23 = vadd.f32 %v1853_v49, %v1851_v18 }
 0x5a3   :  { %v1728_v35 = vpop.f32.mrb[14].mxu0  ;;  %v1799_v27 = vpop.f32.mrb[14].mxu1 }
 0x5a4   :  { %v1804_v61 = vadd.f32 %v1728_v35, %v7483_v56  ;;  %v1730_v60 = vpop.f32.mrb[15].mxu0  ;;  %v1801_v41 = vpop.f32.mrb[15].mxu1  ;;  %v1806_v40 = vadd.f32 %v1799_v27, %v5952_v14 }
 0x5a5   :  { %v1805_v13 = vadd.f32 %v1730_v60, %v5941_v36  ;;  %v1807_v53 = vadd.f32 %v1801_v41, %v5947_v8 }
 0x5a6   :  { %v3096_v17 = vmul.f32 -1.442695, %v1804_v61 }
 0x5a7   :  { %v3098_v37 = vmul.f32 -1.442695, %v1805_v13  ;;  %v3100_v45 = vmul.f32 -1.442695, %v1807_v53 }
 0x5a8   :  { %5174 = vpow2.f32 %v3096_v17 }
 0x5a9   :  { %5176 = vpow2.f32 %v3098_v37 }
 0x5aa   :  { %5178 = vpow2.f32 %v3101_v54 }
 0x5ab   :  { %5180 = vpow2.f32 %v3100_v45 }
 0x5ac   :  { %5182 = vtanh.f32 %v1806_v40 }
 0x5b2   :  { %v5175_v50 = vpop.eup %5174 }
 0x5b3   :  { %v5177_v49 = vpop.eup %5176  ;;  %v1818_v18 = vadd.f32 1.0, %v5175_v50 }
 0x5b4   :  { %v1830_v35 = vadd.f32 1.0, %v5177_v49  ;;  %v5179_v61 = vpop.eup %5178  ;;  %v7678_v49 = vld [vmem:[#allocation120_spill] sm:$0xff] }
 0x5b5   :  { %5184 = vrcp.f32 %v1818_v18  ;;  %v5181_v19 = vpop.eup %5180  ;;  %v1845_v7 = vadd.f32 1.0, %v5179_v61  ;;  %v7679_v18 = vld [vmem:[#allocation121_spill] sm:$0xff]  ;;  %v7681_v61 = vld [vmem:[#allocation123_spill] sm:$0xff] }
 0x5b6   :  { %5186 = vrcp.f32 %v1830_v35  ;;  %v5183_v60 = vpop.eup %5182  ;;  %v1844_v41 = vadd.f32 1.0, %v5181_v19  ;;  %v7680_v35 = vld [vmem:[#allocation122_spill] sm:$0xff]  ;;  %v7682_v19 = vld [vmem:[#allocation124_spill] sm:$0xff] }
 0x5b7   :  { %5188 = vtanh.f32 %v6408_v23 }
 0x5b8   :  { %5190 = vrcp.f32 %v1844_v41  ;;  %v7687_v41 = vld [vmem:[#allocation129_spill] sm:$0xff] }
 0x5bf   :  { %v5185_v13 = vpop.eup %5184 }
 0x5c0   :  { %v5187_v12 = vpop.eup %5186  ;;  %v1852_v17 = vmul.f32 %v5185_v13, %v5183_v60  ;;  %v7683_v60 = vld [vmem:[#allocation125_spill] sm:$0xff]  ;;  %v7684_v13 = vld [vmem:[#allocation126_spill] sm:$0xff] }
 0x5c1   :  { %v1850_v37 = vmul.f32 %v5187_v12, %v6263_v52  ;;  %v5189_v46 = vpop.eup %5188  ;;  %v7677_v52 = vld [vmem:[#allocation119_spill] sm:$0xff] }
 0x5c2   :  { %v5191_v53 = vpop.eup %5190  ;;  %v7685_v12 = vld [vmem:[#allocation127_spill] sm:$0xff] }
 0x5c3   :  { %v6417_v27 = vadd.f32 %v1852_v17, %v1850_v37  ;;  %v7686_v17 = vld [vmem:[#allocation128_spill] sm:$0xff]  ;;  %v7688_v37 = vld [vmem:[#allocation130_spill] sm:$0xff] }
 0x5c5   :  { %5192 = vtanh.f32 %v6417_v27 }
 0x5c6   :  { %5194 = vrcp.f32 %v1845_v7  ;;  %v7689_v7 = vld [vmem:[#allocation131_spill] sm:$0xff] }
 0x5cf   :  { %v5193_v54 = vpop.eup %5192 }
 0x5d0   :  { %v5195_v45 = vpop.eup %5194  ;;  %v1858_v40 = vmul.f32 %v5193_v54, %v5191_v53  ;;  %v7691_v53 = vld [vmem:[#allocation133_spill] sm:$0xff]  ;;  %v7692_v54 = vld [vmem:[#allocation134_spill] sm:$0xff] }
 0x5d1   :  { %v6421_v50 = vmul.f32 %v5195_v45, %v5189_v46  ;;  %v7690_v46 = vld [vmem:[#allocation132_spill] sm:$0xff]  ;;  %v7693_v45 = vld [vmem:[#allocation135_spill] sm:$0xff] }
 0x5d2   :  { %1924 = vmatprep.mubr.f32.mxu0 %v1858_v40  ;;  %1995 = vmatprep.mubr.f32.mxu1 %v1858_v40 }
 0x5d3   :  { %1925 = vmatmul.mubr.f32.vlgmr.msra.gmra.mrb[16].mxu0 %v6421_v50  ;;  %1996 = vmatmul.mubr.f32.vlgmr.msra.gmra.mrb[16].mxu1 %v6421_v50 }
 0x5d4   :  { %4280 = vmatpush1.bf16.msra.mxu0 %v7389_v63  ;;  %4344 = vmatpush1.bf16.msra.mxu1 %v7390_v62 }
 0x5d5   :  { %2066 = vmatprep.mubr.f32.mxu0 %v1858_v40  ;;  %2137 = vmatprep.mubr.f32.mxu1 %v1858_v40  ;;  %v7694_v40 = vld [vmem:[#allocation136_spill] sm:$0xff] }
 0x5d6   :  { %4282 = vmatprep.subr.bf16.mxu0 %v7391_v32  ;;  %4346 = vmatprep.subr.bf16.mxu1 %v7392_v1 }
 0x5d8   :  { %4284 = vmatpush1.bf16.msra.mxu0 %v7393_v55  ;;  %4348 = vmatpush1.bf16.msra.mxu1 %v7484_v3 }
 0x5d9   :  { %4286 = vmatprep.subr.bf16.mxu0 %v7485_v44  ;;  %4350 = vmatprep.subr.bf16.mxu1 %v7486_v42 }
 0x5dc   :  { %4288 = vmatpush1.bf16.msra.mxu0 %v7487_v43  ;;  %4352 = vmatpush1.bf16.msra.mxu1 %v7488_v22 }
 0x5dd   :  { %4290 = vmatprep.subr.bf16.mxu0 %v7489_v34  ;;  %4354 = vmatprep.subr.bf16.mxu1 %v7580_v11 }
 0x5e0   :  { %4292 = vmatpush1.bf16.msra.mxu0 %v7581_v31  ;;  %4356 = vmatpush1.bf16.msra.mxu1 %v7582_v25 }
 0x5e1   :  { %4294 = vmatprep.subr.bf16.mxu0 %v7583_v2  ;;  %4358 = vmatprep.subr.bf16.mxu1 %v7584_v58 }
 0x5e4   :  { %4296 = vmatpush1.bf16.msra.mxu0 %v7585_v10  ;;  %4360 = vmatpush1.bf16.msra.mxu1 %v7586_v51 }
 0x5e5   :  { %4298 = vmatprep.subr.bf16.mxu0 %v7587_v0  ;;  %4362 = vmatprep.subr.bf16.mxu1 %v7588_v29 }
 0x5e8   :  { %4300 = vmatpush1.bf16.msra.mxu0 %v7589_v26  ;;  %4364 = vmatpush1.bf16.msra.mxu1 %v7590_v15 }
 0x5e9   :  { %4302 = vmatprep.subr.bf16.mxu0 %v7591_v28  ;;  %4366 = vmatprep.subr.bf16.mxu1 %v7592_v47 }
 0x5ec   :  { %4304 = vmatpush1.bf16.msra.mxu0 %v7593_v59  ;;  %4368 = vmatpush1.bf16.msra.mxu1 %v7594_v57 }
 0x5ed   :  { %4306 = vmatprep.subr.bf16.mxu0 %v7595_v16  ;;  %4370 = vmatprep.subr.bf16.mxu1 %v7596_v20 }
 0x5f0   :  { %4308 = vmatpush1.bf16.msra.mxu0 %v7507_v38  ;;  %4372 = vmatpush1.bf16.msra.mxu1 %v7508_v30 }
 0x5f1   :  { %4310 = vmatprep.subr.bf16.mxu0 %v7509_v39  ;;  %4374 = vmatprep.subr.bf16.mxu1 %v7510_v21 }
 0x5f4   :  { %4312 = vmatpush1.bf16.msra.mxu0 %v7511_v48  ;;  %4376 = vmatpush1.bf16.msra.mxu1 %v7512_v4 }
 0x5f5   :  { %4314 = vmatprep.subr.bf16.mxu0 %v7677_v52  ;;  %4378 = vmatprep.subr.bf16.mxu1 %v7678_v49 }
 0x5f8   :  { %4316 = vmatpush1.bf16.msra.mxu0 %v7679_v18  ;;  %4380 = vmatpush1.bf16.msra.mxu1 %v7680_v35 }
 0x5f9   :  { %4318 = vmatprep.subr.bf16.mxu0 %v7681_v61  ;;  %4382 = vmatprep.subr.bf16.mxu1 %v7682_v19 }
 0x5fc   :  { %4320 = vmatpush1.bf16.msra.mxu0 %v7683_v60  ;;  %4384 = vmatpush1.bf16.msra.mxu1 %v7684_v13  ;;  %v7695_v13 = vld [vmem:[#allocation137_spill] sm:$0xff] }
 0x5fd   :  { %4322 = vmatprep.subr.bf16.mxu0 %v7685_v12  ;;  %4386 = vmatprep.subr.bf16.mxu1 %v7686_v17  ;;  %v7696_v12 = vld [vmem:[#allocation138_spill] sm:$0xff]  ;;  %v7697_v17 = vld [vmem:[#allocation139_spill] sm:$0xff] }
 0x600   :  { %4324 = vmatpush1.bf16.msra.mxu0 %v7687_v41  ;;  %4388 = vmatpush1.bf16.msra.mxu1 %v7688_v37  ;;  %v7698_v41 = vld [vmem:[#allocation140_spill] sm:$0xff]  ;;  %v7699_v37 = vld [vmem:[#allocation141_spill] sm:$0xff] }
 0x601   :  { %4326 = vmatprep.subr.bf16.mxu0 %v7689_v7  ;;  %4390 = vmatprep.subr.bf16.mxu1 %v7690_v46  ;;  %v7700_v7 = vld [vmem:[#allocation142_spill] sm:$0xff]  ;;  %v7701_v46 = vld [vmem:[#allocation143_spill] sm:$0xff] }
 0x604   :  { %4328 = vmatpush1.bf16.msra.mxu0 %v7691_v53  ;;  %4392 = vmatpush1.bf16.msra.mxu1 %v7692_v54  ;;  %v7702_v53 = vld [vmem:[#allocation144_spill] sm:$0xff]  ;;  %v7703_v54 = vld [vmem:[#allocation145_spill] sm:$0xff] }
 0x605   :  { %4330 = vmatprep.subr.bf16.mxu0 %v7693_v45  ;;  %4394 = vmatprep.subr.bf16.mxu1 %v7694_v40  ;;  %v7704_v45 = vld [vmem:[#allocation146_spill] sm:$0xff] }
 0x606   :  { %v7705_v40 = vld [vmem:[#allocation6_spill] sm:$0xff] }
 0x608   :  { %4332 = vmatpush1.bf16.msra.mxu0 %v7695_v13  ;;  %4396 = vmatpush1.bf16.msra.mxu1 %v7696_v12  ;;  %v7706_v13 = vld [vmem:[#allocation7_spill] sm:$0xff] }
 0x609   :  { %4334 = vmatprep.subr.bf16.mxu0 %v7697_v17  ;;  %4398 = vmatprep.subr.bf16.mxu1 %v7698_v41  ;;  %v7707_v41 = vld [vmem:[#allocation8_spill] sm:$0xff]  ;;  %v7716_v17 = vld [vmem:[#allocation17_spill] sm:$0xff] }
 0x60c   :  { %4336 = vmatpush1.bf16.msra.mxu0 %v7699_v37  ;;  %4400 = vmatpush1.bf16.msra.mxu1 %v7700_v7  ;;  %v7708_v37 = vld [vmem:[#allocation9_spill] sm:$0xff]  ;;  %v7709_v7 = vld [vmem:[#allocation10_spill] sm:$0xff] }
 0x60d   :  { %4338 = vmatprep.subr.bf16.mxu0 %v7701_v46  ;;  %4402 = vmatprep.subr.bf16.mxu1 %v7702_v53  ;;  %v7710_v46 = vld [vmem:[#allocation11_spill] sm:$0xff]  ;;  %v7711_v53 = vld [vmem:[#allocation12_spill] sm:$0xff] }
 0x610   :  { %4340 = vmatpush1.bf16.msra.mxu0 %v7703_v54  ;;  %4404 = vmatpush1.bf16.msra.mxu1 %v7704_v45  ;;  %v7712_v54 = vld [vmem:[#allocation13_spill] sm:$0xff]  ;;  %v7713_v45 = vld [vmem:[#allocation14_spill] sm:$0xff] }
 0x611   :  { %4406 = vmatprep.subr.bf16.mxu0 %v7705_v40  ;;  %4470 = vmatprep.subr.bf16.mxu1 %v7706_v13  ;;  %v7714_v40 = vld [vmem:[#allocation15_spill] sm:$0xff]  ;;  %v7715_v13 = vld [vmem:[#allocation16_spill] sm:$0xff] }
 0x613   :  { %2067 = vmatmul.mubr.f32.vlgmr.msra.gmra.mrb[18].mxu0 %v6421_v50  ;;  %2138 = vmatmul.mubr.f32.vlgmr.msra.gmra.mrb[18].mxu1 %v6421_v50  ;;  %v7717_v50 = vld [vmem:[#allocation18_spill] sm:$0xff] }
 0x614   :  { %4408 = vmatpush1.bf16.msra.mxu0 %v7707_v41  ;;  %4472 = vmatpush1.bf16.msra.mxu1 %v7708_v37  ;;  %v7718_v41 = vld [vmem:[#allocation19_spill] sm:$0xff]  ;;  %v7719_v37 = vld [vmem:[#allocation20_spill] sm:$0xff] }
 0x615   :  { %4410 = vmatprep.subr.bf16.mxu0 %v7709_v7  ;;  %4474 = vmatprep.subr.bf16.mxu1 %v7710_v46  ;;  %v7720_v7 = vld [vmem:[#allocation21_spill] sm:$0xff]  ;;  %v7721_v46 = vld [vmem:[#allocation22_spill] sm:$0xff] }
 0x618   :  { %4412 = vmatpush1.bf16.msra.mxu0 %v7711_v53  ;;  %4476 = vmatpush1.bf16.msra.mxu1 %v7712_v54  ;;  %v7722_v53 = vld [vmem:[#allocation23_spill] sm:$0xff]  ;;  %v7723_v54 = vld [vmem:[#allocation24_spill] sm:$0xff] }
 0x619   :  { %4414 = vmatprep.subr.bf16.mxu0 %v7713_v45  ;;  %4478 = vmatprep.subr.bf16.mxu1 %v7714_v40  ;;  %v7724_v45 = vld [vmem:[#allocation25_spill] sm:$0xff]  ;;  %v7725_v40 = vld [vmem:[#allocation26_spill] sm:$0xff] }
 0x61c   :  { %4416 = vmatpush1.bf16.msra.mxu0 %v7715_v13  ;;  %4480 = vmatpush1.bf16.msra.mxu1 %v7716_v17  ;;  %v7726_v13 = vld [vmem:[#allocation27_spill] sm:$0xff]  ;;  %v7727_v17 = vld [vmem:[#allocation28_spill] sm:$0xff] }
 0x61d   :  { %4418 = vmatprep.subr.bf16.mxu0 %v7717_v50  ;;  %4482 = vmatprep.subr.bf16.mxu1 %v7718_v41  ;;  %v7728_v50 = vld [vmem:[#allocation29_spill] sm:$0xff]  ;;  %v7729_v41 = vld [vmem:[#allocation30_spill] sm:$0xff] }
 0x620   :  { %4420 = vmatpush1.bf16.msra.mxu0 %v7719_v37  ;;  %4484 = vmatpush1.bf16.msra.mxu1 %v7720_v7  ;;  %v7730_v37 = vld [vmem:[#allocation31_spill] sm:$0xff]  ;;  %v7731_v7 = vld [vmem:[#allocation32_spill] sm:$0xff] }
 0x621   :  { %4422 = vmatprep.subr.bf16.mxu0 %v7721_v46  ;;  %4486 = vmatprep.subr.bf16.mxu1 %v7722_v53  ;;  %v7732_v46 = vld [vmem:[#allocation33_spill] sm:$0xff]  ;;  %v7733_v53 = vld [vmem:[#allocation34_spill] sm:$0xff] }
 0x624   :  { %4424 = vmatpush1.bf16.msra.mxu0 %v7723_v54  ;;  %4488 = vmatpush1.bf16.msra.mxu1 %v7724_v45  ;;  %v7734_v54 = vld [vmem:[#allocation35_spill] sm:$0xff]  ;;  %v7735_v45 = vld [vmem:[#allocation36_spill] sm:$0xff] }
 0x625   :  { %4426 = vmatprep.subr.bf16.mxu0 %v7725_v40  ;;  %4490 = vmatprep.subr.bf16.mxu1 %v7726_v13  ;;  %v7736_v40 = vld [vmem:[#allocation37_spill] sm:$0xff]  ;;  %v7737_v13 = vld [vmem:[#allocation38_spill] sm:$0xff] }
 0x628   :  { %4428 = vmatpush1.bf16.msra.mxu0 %v7727_v17  ;;  %4492 = vmatpush1.bf16.msra.mxu1 %v7728_v50  ;;  %v7738_v17 = vld [vmem:[#allocation39_spill] sm:$0xff]  ;;  %v7739_v50 = vld [vmem:[#allocation40_spill] sm:$0xff] }
 0x629   :  { %4430 = vmatprep.subr.bf16.mxu0 %v7729_v41  ;;  %4494 = vmatprep.subr.bf16.mxu1 %v7730_v37  ;;  %v7740_v41 = vld [vmem:[#allocation41_spill] sm:$0xff]  ;;  %v7741_v37 = vld [vmem:[#allocation42_spill] sm:$0xff] }
 0x62c   :  { %4432 = vmatpush1.bf16.msra.mxu0 %v7731_v7  ;;  %4496 = vmatpush1.bf16.msra.mxu1 %v7732_v46  ;;  %v7742_v7 = vld [vmem:[#allocation43_spill] sm:$0xff]  ;;  %v7743_v46 = vld [vmem:[#allocation44_spill] sm:$0xff] }
 0x62d   :  { %4434 = vmatprep.subr.bf16.mxu0 %v7733_v53  ;;  %4498 = vmatprep.subr.bf16.mxu1 %v7734_v54  ;;  %v7744_v53 = vld [vmem:[#allocation45_spill] sm:$0xff]  ;;  %v7745_v54 = vld [vmem:[#allocation46_spill] sm:$0xff] }
 0x630   :  { %4436 = vmatpush1.bf16.msra.mxu0 %v7735_v45  ;;  %4500 = vmatpush1.bf16.msra.mxu1 %v7736_v40  ;;  %v7746_v45 = vld [vmem:[#allocation47_spill] sm:$0xff]  ;;  %v7747_v40 = vld [vmem:[#allocation48_spill] sm:$0xff] }
 0x631   :  { %4438 = vmatprep.subr.bf16.mxu0 %v7737_v13  ;;  %4502 = vmatprep.subr.bf16.mxu1 %v7738_v17  ;;  %v7748_v13 = vld [vmem:[#allocation49_spill] sm:$0xff]  ;;  %v7749_v17 = vld [vmem:[#allocation50_spill] sm:$0xff] }
 0x634   :  { %4440 = vmatpush1.bf16.msra.mxu0 %v7739_v50  ;;  %4504 = vmatpush1.bf16.msra.mxu1 %v7740_v41  ;;  %v7750_v50 = vld [vmem:[#allocation51_spill] sm:$0xff]  ;;  %v7751_v41 = vld [vmem:[#allocation52_spill] sm:$0xff] }
 0x635   :  { %4442 = vmatprep.subr.bf16.mxu0 %v7741_v37  ;;  %4506 = vmatprep.subr.bf16.mxu1 %v7742_v7  ;;  %v7752_v37 = vld [vmem:[#allocation53_spill] sm:$0xff]  ;;  %v7753_v7 = vld [vmem:[#allocation54_spill] sm:$0xff] }
 0x638   :  { %4444 = vmatpush1.bf16.msra.mxu0 %v7743_v46  ;;  %4508 = vmatpush1.bf16.msra.mxu1 %v7744_v53  ;;  %v7754_v46 = vld [vmem:[#allocation55_spill] sm:$0xff]  ;;  %v7755_v53 = vld [vmem:[#allocation56_spill] sm:$0xff] }
 0x639   :  { %4446 = vmatprep.subr.bf16.mxu0 %v7745_v54  ;;  %4510 = vmatprep.subr.bf16.mxu1 %v7746_v45  ;;  %v7756_v54 = vld [vmem:[#allocation57_spill] sm:$0xff]  ;;  %v7757_v45 = vld [vmem:[#allocation58_spill] sm:$0xff] }
 0x63c   :  { %4448 = vmatpush1.bf16.msra.mxu0 %v7747_v40  ;;  %4512 = vmatpush1.bf16.msra.mxu1 %v7748_v13  ;;  %v7758_v40 = vld [vmem:[#allocation59_spill] sm:$0xff]  ;;  %v7759_v13 = vld [vmem:[#allocation60_spill] sm:$0xff] }
 0x63d   :  { %4450 = vmatprep.subr.bf16.mxu0 %v7749_v17  ;;  %4514 = vmatprep.subr.bf16.mxu1 %v7750_v50  ;;  %v7760_v17 = vld [vmem:[#allocation61_spill] sm:$0xff]  ;;  %v7761_v50 = vld [vmem:[#allocation62_spill] sm:$0xff] }
 0x640   :  { %4452 = vmatpush1.bf16.msra.mxu0 %v7751_v41  ;;  %4516 = vmatpush1.bf16.msra.mxu1 %v7752_v37  ;;  %v7762_v41 = vld [vmem:[#allocation63_spill] sm:$0xff]  ;;  %v7763_v37 = vld [vmem:[#allocation64_spill] sm:$0xff] }
 0x641   :  { %4454 = vmatprep.subr.bf16.mxu0 %v7753_v7  ;;  %4518 = vmatprep.subr.bf16.mxu1 %v7754_v46  ;;  %v7764_v7 = vld [vmem:[#allocation65_spill] sm:$0xff]  ;;  %v7765_v46 = vld [vmem:[#allocation66_spill] sm:$0xff] }
 0x644   :  { %4456 = vmatpush1.bf16.msra.mxu0 %v7755_v53  ;;  %4520 = vmatpush1.bf16.msra.mxu1 %v7756_v54  ;;  %v7766_v53 = vld [vmem:[#allocation67_spill] sm:$0xff]  ;;  %v7767_v54 = vld [vmem:[#allocation68_spill] sm:$0xff] }
 0x645   :  { %4458 = vmatprep.subr.bf16.mxu0 %v7757_v45  ;;  %4522 = vmatprep.subr.bf16.mxu1 %v7758_v40  ;;  %v7768_v45 = vld [vmem:[#allocation69_spill] sm:$0xff]  ;;  %v7769_v40 = vld [vmem:[#allocation70_spill] sm:$0xff] }
 0x648   :  { %4460 = vmatpush1.bf16.msra.mxu0 %v7759_v13  ;;  %4524 = vmatpush1.bf16.msra.mxu1 %v7760_v17  ;;  %v7770_v13 = vld [vmem:[#allocation71_spill] sm:$0xff]  ;;  %v79_v17 = vpop.permute.xlu1 %78 }
 0x649   :  { %4462 = vmatprep.subr.bf16.mxu0 %v7761_v50  ;;  %4526 = vmatprep.subr.bf16.mxu1 %v7762_v41  ;;  %v7771_v50 = vld [vmem:[#allocation74_spill] sm:$0xff]  ;;  %v7772_v41 = vld [vmem:[#allocation75_spill] sm:$0xff] }
 0x64a   :  { %v132_v12 = vmul.f32 %v7771_v50, %v79_v17  ;;  %v133_v60 = vmul.f32 %v7772_v41, %v79_v17 }
 0x64c   :  { %4464 = vmatpush1.bf16.msra.mxu0 %v7763_v37  ;;  %4528 = vmatpush1.bf16.msra.mxu1 %v7764_v7  ;;  %v7773_v37 = vld [vmem:[#allocation77_spill] sm:$0xff] }
 0x64d   :  { %4466 = vmatprep.subr.bf16.mxu0 %v7765_v46  ;;  %4530 = vmatprep.subr.bf16.mxu1 %v7766_v53  ;;  %v186_v19 = vadd.f32 %v7773_v37, %v132_v12  ;;  %v187_v46 = vadd.f32 %v7578_v24, %v133_v60 }
 0x650   :  { %4468 = vmatpush1.bf16.msra.mxu0 %v7767_v54  ;;  %4532 = vmatpush1.bf16.msra.mxu1 %v7768_v45 }
 0x651   :  { %4534 = vmatprep.subr.bf16.mxu0 %v7769_v40  ;;  %4598 = vmatprep.subr.bf16.mxu1 %v7770_v13  ;;  %v134_v13 = vmul.f32 %v7480_v9, %v79_v17 }
 0x653   :  { %v188_v50 = vadd.f32 %v7579_v6, %v134_v13  ;;  %v135_v13 = vmul.f32 %v7482_v5, %v79_v17 }
 0x6a6   :  { %v1926_v7 = vpop.f32.mrb[16].mxu0  ;;  %v1997_v61 = vpop.f32.mrb[16].mxu1 }
 0x6a7   :  { %v2148_v53 = vadd.f32 %v1926_v7, %v186_v19  ;;  %v1928_v35 = vpop.f32.mrb[17].mxu0  ;;  %v1999_v54 = vpop.f32.mrb[17].mxu1  ;;  %v2150_v40 = vadd.f32 %v1997_v61, %v188_v50  ;;  %v189_v50 = vadd.f32 %v7386_v33, %v135_v13 }
 0x6a8   :  { %v2149_v18 = vadd.f32 %v1928_v35, %v187_v46 }
 0x6a9   :  { %v3103_v45 = vmul.f32 -1.442695, %v2148_v53 }
 0x6aa   :  { %v3105_v49 = vmul.f32 -1.442695, %v2149_v18 }
 0x6ab   :  { %5196 = vpow2.f32 %v3103_v45 }
 0x6ac   :  { %5198 = vpow2.f32 %v3105_v49 }
 0x6ad   :  { %5200 = vtanh.f32 %v2150_v40 }
 0x6b5   :  { %v5197_v41 = vpop.eup %5196 }
 0x6b6   :  { %v5199_v52 = vpop.eup %5198  ;;  %v2159_v12 = vadd.f32 1.0, %v5197_v41 }
 0x6b7   :  { %v2171_v37 = vadd.f32 1.0, %v5199_v52  ;;  %v5201_v19 = vpop.eup %5200 }
 0x6b8   :  { %5202 = vrcp.f32 %v2159_v12  ;;  %v2151_v12 = vadd.f32 %v1999_v54, %v189_v50 }
 0x6b9   :  { %5204 = vrcp.f32 %v2171_v37 }
 0x6c2   :  { %v5203_v60 = vpop.eup %5202 }
 0x6c3   :  { %v5205_v7 = vpop.eup %5204  ;;  %v2193_v35 = vmul.f32 %v5203_v60, %v5201_v19  ;;  %v3107_v19 = vmul.f32 -1.442695, %v2151_v12 }
 0x6c4   :  { %v2191_v18 = vmul.f32 %v5205_v7, %v6408_v23 }
 0x6c6   :  { %v6562_v46 = vadd.f32 %v2193_v35, %v2191_v18 }
 0x6e6   :  { %v2068_v49 = vpop.f32.mrb[18].mxu0  ;;  %v2139_v53 = vpop.f32.mrb[18].mxu1 }
 0x6e7   :  { %v2144_v61 = vadd.f32 %v2068_v49, %v7483_v56  ;;  %v2070_v45 = vpop.f32.mrb[19].mxu0  ;;  %v2141_v41 = vpop.f32.mrb[19].mxu1  ;;  %v2146_v7 = vadd.f32 %v2139_v53, %v5952_v14 }
 0x6e8   :  { %v2145_v52 = vadd.f32 %v2070_v45, %v5941_v36  ;;  %v2147_v23 = vadd.f32 %v2141_v41, %v5947_v8 }
 0x6e9   :  { %v3102_v40 = vmul.f32 -1.442695, %v2144_v61 }
 0x6ea   :  { %v3104_v37 = vmul.f32 -1.442695, %v2145_v52  ;;  %v3106_v60 = vmul.f32 -1.442695, %v2147_v23 }
 0x6eb   :  { %5206 = vpow2.f32 %v3102_v40 }
 0x6ec   :  { %5208 = vpow2.f32 %v3104_v37 }
 0x6ed   :  { %5210 = vpow2.f32 %v3107_v19 }
 0x6ee   :  { %5212 = vpow2.f32 %v3106_v60 }
 0x6ef   :  { %5214 = vtanh.f32 %v2146_v7 }
 0x6f5   :  { %v5207_v17 = vpop.eup %5206 }
 0x6f6   :  { %v5209_v35 = vpop.eup %5208  ;;  %v2158_v18 = vadd.f32 1.0, %v5207_v17 }
 0x6f7   :  { %v2170_v49 = vadd.f32 1.0, %v5209_v35  ;;  %v5211_v61 = vpop.eup %5210  ;;  %v7775_v35 = vld [vmem:[#allocation120_spill] sm:$0xff] }
 0x6f8   :  { %5216 = vrcp.f32 %v2158_v18  ;;  %v5213_v13 = vpop.eup %5212  ;;  %v2185_v50 = vadd.f32 1.0, %v5211_v61  ;;  %v7776_v18 = vld [vmem:[#allocation121_spill] sm:$0xff]  ;;  %v7778_v61 = vld [vmem:[#allocation123_spill] sm:$0xff] }
 0x6f9   :  { %5218 = vrcp.f32 %v2170_v49  ;;  %v5215_v45 = vpop.eup %5214  ;;  %v2184_v41 = vadd.f32 1.0, %v5213_v13  ;;  %v7777_v49 = vld [vmem:[#allocation122_spill] sm:$0xff]  ;;  %v7779_v13 = vld [vmem:[#allocation124_spill] sm:$0xff] }
 0x6fa   :  { %5220 = vtanh.f32 %v6562_v46 }
 0x6fb   :  { %5222 = vrcp.f32 %v2184_v41  ;;  %v7784_v41 = vld [vmem:[#allocation129_spill] sm:$0xff] }
 0x702   :  { %v5217_v52 = vpop.eup %5216 }
 0x703   :  { %v5219_v54 = vpop.eup %5218  ;;  %v2192_v40 = vmul.f32 %v5217_v52, %v5215_v45  ;;  %v7780_v45 = vld [vmem:[#allocation125_spill] sm:$0xff]  ;;  %v7781_v52 = vld [vmem:[#allocation126_spill] sm:$0xff] }
 0x704   :  { %v2190_v37 = vmul.f32 %v5219_v54, %v6417_v27  ;;  %v5221_v12 = vpop.eup %5220  ;;  %v7774_v27 = vld [vmem:[#allocation119_spill] sm:$0xff] }
 0x705   :  { %v5223_v23 = vpop.eup %5222  ;;  %v7782_v54 = vld [vmem:[#allocation127_spill] sm:$0xff] }
 0x706   :  { %v6571_v53 = vadd.f32 %v2192_v40, %v2190_v37  ;;  %v7783_v40 = vld [vmem:[#allocation128_spill] sm:$0xff]  ;;  %v7785_v37 = vld [vmem:[#allocation130_spill] sm:$0xff] }
 0x708   :  { %5224 = vtanh.f32 %v6571_v53 }
 0x709   :  { %5226 = vrcp.f32 %v2185_v50  ;;  %v7786_v50 = vld [vmem:[#allocation131_spill] sm:$0xff] }
 0x712   :  { %v5225_v19 = vpop.eup %5224 }
 0x713   :  { %v5227_v60 = vpop.eup %5226  ;;  %v2198_v7 = vmul.f32 %v5225_v19, %v5223_v23  ;;  %v7788_v23 = vld [vmem:[#allocation133_spill] sm:$0xff]  ;;  %v7789_v19 = vld [vmem:[#allocation134_spill] sm:$0xff] }
 0x714   :  { %v6575_v17 = vmul.f32 %v5227_v60, %v5221_v12  ;;  %v7787_v12 = vld [vmem:[#allocation132_spill] sm:$0xff]  ;;  %v7790_v60 = vld [vmem:[#allocation135_spill] sm:$0xff] }
 0x715   :  { %2264 = vmatprep.mubr.f32.mxu0 %v2198_v7  ;;  %2335 = vmatprep.mubr.f32.mxu1 %v2198_v7 }
 0x716   :  { %2265 = vmatmul.mubr.f32.vlgmr.msra.gmra.mrb[20].mxu0 %v6575_v17  ;;  %2336 = vmatmul.mubr.f32.vlgmr.msra.gmra.mrb[20].mxu1 %v6575_v17 }
 0x717   :  { %4536 = vmatpush1.bf16.msra.mxu0 %v7389_v63  ;;  %4600 = vmatpush1.bf16.msra.mxu1 %v7390_v62 }
 0x718   :  { %2406 = vmatprep.mubr.f32.mxu0 %v2198_v7  ;;  %2477 = vmatprep.mubr.f32.mxu1 %v2198_v7  ;;  %v7791_v7 = vld [vmem:[#allocation136_spill] sm:$0xff] }
 0x719   :  { %4538 = vmatprep.subr.bf16.mxu0 %v7391_v32  ;;  %4602 = vmatprep.subr.bf16.mxu1 %v7392_v1 }
 0x71b   :  { %4540 = vmatpush1.bf16.msra.mxu0 %v7393_v55  ;;  %4604 = vmatpush1.bf16.msra.mxu1 %v7484_v3 }
 0x71c   :  { %4542 = vmatprep.subr.bf16.mxu0 %v7485_v44  ;;  %4606 = vmatprep.subr.bf16.mxu1 %v7486_v42 }
 0x71f   :  { %4544 = vmatpush1.bf16.msra.mxu0 %v7487_v43  ;;  %4608 = vmatpush1.bf16.msra.mxu1 %v7488_v22 }
 0x720   :  { %4546 = vmatprep.subr.bf16.mxu0 %v7489_v34  ;;  %4610 = vmatprep.subr.bf16.mxu1 %v7580_v11 }
 0x723   :  { %4548 = vmatpush1.bf16.msra.mxu0 %v7581_v31  ;;  %4612 = vmatpush1.bf16.msra.mxu1 %v7582_v25 }
 0x724   :  { %4550 = vmatprep.subr.bf16.mxu0 %v7583_v2  ;;  %4614 = vmatprep.subr.bf16.mxu1 %v7584_v58 }
 0x727   :  { %4552 = vmatpush1.bf16.msra.mxu0 %v7585_v10  ;;  %4616 = vmatpush1.bf16.msra.mxu1 %v7586_v51 }
 0x728   :  { %4554 = vmatprep.subr.bf16.mxu0 %v7587_v0  ;;  %4618 = vmatprep.subr.bf16.mxu1 %v7588_v29 }
 0x72b   :  { %4556 = vmatpush1.bf16.msra.mxu0 %v7589_v26  ;;  %4620 = vmatpush1.bf16.msra.mxu1 %v7590_v15 }
 0x72c   :  { %4558 = vmatprep.subr.bf16.mxu0 %v7591_v28  ;;  %4622 = vmatprep.subr.bf16.mxu1 %v7592_v47 }
 0x72f   :  { %4560 = vmatpush1.bf16.msra.mxu0 %v7593_v59  ;;  %4624 = vmatpush1.bf16.msra.mxu1 %v7594_v57 }
 0x730   :  { %4562 = vmatprep.subr.bf16.mxu0 %v7595_v16  ;;  %4626 = vmatprep.subr.bf16.mxu1 %v7596_v20 }
 0x733   :  { %4564 = vmatpush1.bf16.msra.mxu0 %v7507_v38  ;;  %4628 = vmatpush1.bf16.msra.mxu1 %v7508_v30 }
 0x734   :  { %4566 = vmatprep.subr.bf16.mxu0 %v7509_v39  ;;  %4630 = vmatprep.subr.bf16.mxu1 %v7510_v21 }
 0x737   :  { %4568 = vmatpush1.bf16.msra.mxu0 %v7511_v48  ;;  %4632 = vmatpush1.bf16.msra.mxu1 %v7512_v4 }
 0x738   :  { %4570 = vmatprep.subr.bf16.mxu0 %v7774_v27  ;;  %4634 = vmatprep.subr.bf16.mxu1 %v7775_v35 }
 0x73b   :  { %4572 = vmatpush1.bf16.msra.mxu0 %v7776_v18  ;;  %4636 = vmatpush1.bf16.msra.mxu1 %v7777_v49 }
 0x73c   :  { %4574 = vmatprep.subr.bf16.mxu0 %v7778_v61  ;;  %4638 = vmatprep.subr.bf16.mxu1 %v7779_v13 }
 0x73f   :  { %4576 = vmatpush1.bf16.msra.mxu0 %v7780_v45  ;;  %4640 = vmatpush1.bf16.msra.mxu1 %v7781_v52  ;;  %v7792_v52 = vld [vmem:[#allocation137_spill] sm:$0xff] }
 0x740   :  { %4578 = vmatprep.subr.bf16.mxu0 %v7782_v54  ;;  %4642 = vmatprep.subr.bf16.mxu1 %v7783_v40  ;;  %v7793_v54 = vld [vmem:[#allocation138_spill] sm:$0xff]  ;;  %v7794_v40 = vld [vmem:[#allocation139_spill] sm:$0xff] }
 0x743   :  { %4580 = vmatpush1.bf16.msra.mxu0 %v7784_v41  ;;  %4644 = vmatpush1.bf16.msra.mxu1 %v7785_v37  ;;  %v7795_v41 = vld [vmem:[#allocation140_spill] sm:$0xff]  ;;  %v7796_v37 = vld [vmem:[#allocation141_spill] sm:$0xff] }
 0x744   :  { %4582 = vmatprep.subr.bf16.mxu0 %v7786_v50  ;;  %4646 = vmatprep.subr.bf16.mxu1 %v7787_v12  ;;  %v7797_v50 = vld [vmem:[#allocation142_spill] sm:$0xff]  ;;  %v7798_v12 = vld [vmem:[#allocation143_spill] sm:$0xff] }
 0x747   :  { %4584 = vmatpush1.bf16.msra.mxu0 %v7788_v23  ;;  %4648 = vmatpush1.bf16.msra.mxu1 %v7789_v19  ;;  %v7799_v23 = vld [vmem:[#allocation144_spill] sm:$0xff]  ;;  %v7800_v19 = vld [vmem:[#allocation145_spill] sm:$0xff] }
 0x748   :  { %4586 = vmatprep.subr.bf16.mxu0 %v7790_v60  ;;  %4650 = vmatprep.subr.bf16.mxu1 %v7791_v7  ;;  %v7801_v60 = vld [vmem:[#allocation146_spill] sm:$0xff] }
 0x749   :  { %v7802_v7 = vld [vmem:[#allocation6_spill] sm:$0xff] }
 0x74b   :  { %4588 = vmatpush1.bf16.msra.mxu0 %v7792_v52  ;;  %4652 = vmatpush1.bf16.msra.mxu1 %v7793_v54  ;;  %v7803_v52 = vld [vmem:[#allocation7_spill] sm:$0xff] }
 0x74c   :  { %4590 = vmatprep.subr.bf16.mxu0 %v7794_v40  ;;  %4654 = vmatprep.subr.bf16.mxu1 %v7795_v41  ;;  %v7804_v41 = vld [vmem:[#allocation8_spill] sm:$0xff]  ;;  %v7813_v40 = vld [vmem:[#allocation17_spill] sm:$0xff] }
 0x74f   :  { %4592 = vmatpush1.bf16.msra.mxu0 %v7796_v37  ;;  %4656 = vmatpush1.bf16.msra.mxu1 %v7797_v50  ;;  %v7805_v37 = vld [vmem:[#allocation9_spill] sm:$0xff]  ;;  %v7806_v50 = vld [vmem:[#allocation10_spill] sm:$0xff] }
 0x750   :  { %4594 = vmatprep.subr.bf16.mxu0 %v7798_v12  ;;  %4658 = vmatprep.subr.bf16.mxu1 %v7799_v23  ;;  %v7807_v12 = vld [vmem:[#allocation11_spill] sm:$0xff]  ;;  %v7808_v23 = vld [vmem:[#allocation12_spill] sm:$0xff] }
 0x753   :  { %4596 = vmatpush1.bf16.msra.mxu0 %v7800_v19  ;;  %4660 = vmatpush1.bf16.msra.mxu1 %v7801_v60  ;;  %v7809_v19 = vld [vmem:[#allocation13_spill] sm:$0xff]  ;;  %v7810_v60 = vld [vmem:[#allocation14_spill] sm:$0xff] }
 0x754   :  { %4662 = vmatprep.subr.bf16.mxu0 %v7802_v7  ;;  %4726 = vmatprep.subr.bf16.mxu1 %v7803_v52  ;;  %v7811_v7 = vld [vmem:[#allocation15_spill] sm:$0xff]  ;;  %v7812_v52 = vld [vmem:[#allocation16_spill] sm:$0xff] }
 0x756   :  { %2407 = vmatmul.mubr.f32.vlgmr.msra.gmra.mrb[22].mxu0 %v6575_v17  ;;  %2478 = vmatmul.mubr.f32.vlgmr.msra.gmra.mrb[22].mxu1 %v6575_v17  ;;  %v7814_v17 = vld [vmem:[#allocation18_spill] sm:$0xff] }
 0x757   :  { %4664 = vmatpush1.bf16.msra.mxu0 %v7804_v41  ;;  %4728 = vmatpush1.bf16.msra.mxu1 %v7805_v37  ;;  %v7815_v41 = vld [vmem:[#allocation19_spill] sm:$0xff]  ;;  %v7816_v37 = vld [vmem:[#allocation20_spill] sm:$0xff] }
 0x758   :  { %4666 = vmatprep.subr.bf16.mxu0 %v7806_v50  ;;  %4730 = vmatprep.subr.bf16.mxu1 %v7807_v12  ;;  %v7817_v50 = vld [vmem:[#allocation21_spill] sm:$0xff]  ;;  %v7818_v12 = vld [vmem:[#allocation22_spill] sm:$0xff] }
 0x75b   :  { %4668 = vmatpush1.bf16.msra.mxu0 %v7808_v23  ;;  %4732 = vmatpush1.bf16.msra.mxu1 %v7809_v19  ;;  %v7819_v23 = vld [vmem:[#allocation23_spill] sm:$0xff]  ;;  %v7820_v19 = vld [vmem:[#allocation24_spill] sm:$0xff] }
 0x75c   :  { %4670 = vmatprep.subr.bf16.mxu0 %v7810_v60  ;;  %4734 = vmatprep.subr.bf16.mxu1 %v7811_v7  ;;  %v7821_v60 = vld [vmem:[#allocation25_spill] sm:$0xff]  ;;  %v7822_v7 = vld [vmem:[#allocation26_spill] sm:$0xff] }
 0x75f   :  { %4672 = vmatpush1.bf16.msra.mxu0 %v7812_v52  ;;  %4736 = vmatpush1.bf16.msra.mxu1 %v7813_v40  ;;  %v7823_v52 = vld [vmem:[#allocation27_spill] sm:$0xff]  ;;  %v7824_v40 = vld [vmem:[#allocation28_spill] sm:$0xff] }
 0x760   :  { %4674 = vmatprep.subr.bf16.mxu0 %v7814_v17  ;;  %4738 = vmatprep.subr.bf16.mxu1 %v7815_v41  ;;  %v7825_v17 = vld [vmem:[#allocation29_spill] sm:$0xff]  ;;  %v7826_v41 = vld [vmem:[#allocation30_spill] sm:$0xff] }
 0x763   :  { %4676 = vmatpush1.bf16.msra.mxu0 %v7816_v37  ;;  %4740 = vmatpush1.bf16.msra.mxu1 %v7817_v50  ;;  %v7827_v37 = vld [vmem:[#allocation31_spill] sm:$0xff]  ;;  %v7828_v50 = vld [vmem:[#allocation32_spill] sm:$0xff] }
 0x764   :  { %4678 = vmatprep.subr.bf16.mxu0 %v7818_v12  ;;  %4742 = vmatprep.subr.bf16.mxu1 %v7819_v23  ;;  %v7829_v12 = vld [vmem:[#allocation33_spill] sm:$0xff]  ;;  %v7830_v23 = vld [vmem:[#allocation34_spill] sm:$0xff] }
 0x767   :  { %4680 = vmatpush1.bf16.msra.mxu0 %v7820_v19  ;;  %4744 = vmatpush1.bf16.msra.mxu1 %v7821_v60  ;;  %v7831_v19 = vld [vmem:[#allocation35_spill] sm:$0xff]  ;;  %v7832_v60 = vld [vmem:[#allocation36_spill] sm:$0xff] }
 0x768   :  { %4682 = vmatprep.subr.bf16.mxu0 %v7822_v7  ;;  %4746 = vmatprep.subr.bf16.mxu1 %v7823_v52  ;;  %v7833_v7 = vld [vmem:[#allocation37_spill] sm:$0xff]  ;;  %v7834_v52 = vld [vmem:[#allocation38_spill] sm:$0xff] }
 0x76b   :  { %4684 = vmatpush1.bf16.msra.mxu0 %v7824_v40  ;;  %4748 = vmatpush1.bf16.msra.mxu1 %v7825_v17  ;;  %v7835_v40 = vld [vmem:[#allocation39_spill] sm:$0xff]  ;;  %v7836_v17 = vld [vmem:[#allocation40_spill] sm:$0xff] }
 0x76c   :  { %4686 = vmatprep.subr.bf16.mxu0 %v7826_v41  ;;  %4750 = vmatprep.subr.bf16.mxu1 %v7827_v37  ;;  %v7837_v41 = vld [vmem:[#allocation41_spill] sm:$0xff]  ;;  %v7838_v37 = vld [vmem:[#allocation42_spill] sm:$0xff] }
 0x76f   :  { %4688 = vmatpush1.bf16.msra.mxu0 %v7828_v50  ;;  %4752 = vmatpush1.bf16.msra.mxu1 %v7829_v12  ;;  %v7839_v50 = vld [vmem:[#allocation43_spill] sm:$0xff]  ;;  %v7840_v12 = vld [vmem:[#allocation44_spill] sm:$0xff] }
 0x770   :  { %4690 = vmatprep.subr.bf16.mxu0 %v7830_v23  ;;  %4754 = vmatprep.subr.bf16.mxu1 %v7831_v19  ;;  %v7841_v23 = vld [vmem:[#allocation45_spill] sm:$0xff]  ;;  %v7842_v19 = vld [vmem:[#allocation46_spill] sm:$0xff] }
 0x773   :  { %4692 = vmatpush1.bf16.msra.mxu0 %v7832_v60  ;;  %4756 = vmatpush1.bf16.msra.mxu1 %v7833_v7  ;;  %v7843_v60 = vld [vmem:[#allocation47_spill] sm:$0xff]  ;;  %v7844_v7 = vld [vmem:[#allocation48_spill] sm:$0xff] }
 0x774   :  { %4694 = vmatprep.subr.bf16.mxu0 %v7834_v52  ;;  %4758 = vmatprep.subr.bf16.mxu1 %v7835_v40  ;;  %v7845_v52 = vld [vmem:[#allocation49_spill] sm:$0xff]  ;;  %v7846_v40 = vld [vmem:[#allocation50_spill] sm:$0xff] }
 0x777   :  { %4696 = vmatpush1.bf16.msra.mxu0 %v7836_v17  ;;  %4760 = vmatpush1.bf16.msra.mxu1 %v7837_v41  ;;  %v7847_v17 = vld [vmem:[#allocation51_spill] sm:$0xff]  ;;  %v7848_v41 = vld [vmem:[#allocation52_spill] sm:$0xff] }
 0x778   :  { %4698 = vmatprep.subr.bf16.mxu0 %v7838_v37  ;;  %4762 = vmatprep.subr.bf16.mxu1 %v7839_v50  ;;  %v7849_v37 = vld [vmem:[#allocation53_spill] sm:$0xff]  ;;  %v7850_v50 = vld [vmem:[#allocation54_spill] sm:$0xff] }
 0x77b   :  { %4700 = vmatpush1.bf16.msra.mxu0 %v7840_v12  ;;  %4764 = vmatpush1.bf16.msra.mxu1 %v7841_v23  ;;  %v7851_v12 = vld [vmem:[#allocation55_spill] sm:$0xff]  ;;  %v7852_v23 = vld [vmem:[#allocation56_spill] sm:$0xff] }
 0x77c   :  { %4702 = vmatprep.subr.bf16.mxu0 %v7842_v19  ;;  %4766 = vmatprep.subr.bf16.mxu1 %v7843_v60  ;;  %v7853_v19 = vld [vmem:[#allocation57_spill] sm:$0xff]  ;;  %v7854_v60 = vld [vmem:[#allocation58_spill] sm:$0xff] }
 0x77f   :  { %4704 = vmatpush1.bf16.msra.mxu0 %v7844_v7  ;;  %4768 = vmatpush1.bf16.msra.mxu1 %v7845_v52  ;;  %v7855_v7 = vld [vmem:[#allocation59_spill] sm:$0xff]  ;;  %v7856_v52 = vld [vmem:[#allocation60_spill] sm:$0xff] }
 0x780   :  { %4706 = vmatprep.subr.bf16.mxu0 %v7846_v40  ;;  %4770 = vmatprep.subr.bf16.mxu1 %v7847_v17  ;;  %v7857_v40 = vld [vmem:[#allocation61_spill] sm:$0xff]  ;;  %v7858_v17 = vld [vmem:[#allocation62_spill] sm:$0xff] }
 0x783   :  { %4708 = vmatpush1.bf16.msra.mxu0 %v7848_v41  ;;  %4772 = vmatpush1.bf16.msra.mxu1 %v7849_v37  ;;  %v7859_v41 = vld [vmem:[#allocation63_spill] sm:$0xff]  ;;  %v7860_v37 = vld [vmem:[#allocation64_spill] sm:$0xff] }
 0x784   :  { %4710 = vmatprep.subr.bf16.mxu0 %v7850_v50  ;;  %4774 = vmatprep.subr.bf16.mxu1 %v7851_v12  ;;  %v7861_v50 = vld [vmem:[#allocation65_spill] sm:$0xff]  ;;  %v7862_v12 = vld [vmem:[#allocation66_spill] sm:$0xff] }
 0x787   :  { %4712 = vmatpush1.bf16.msra.mxu0 %v7852_v23  ;;  %4776 = vmatpush1.bf16.msra.mxu1 %v7853_v19  ;;  %v7863_v23 = vld [vmem:[#allocation67_spill] sm:$0xff]  ;;  %v7864_v19 = vld [vmem:[#allocation68_spill] sm:$0xff] }
 0x788   :  { %4714 = vmatprep.subr.bf16.mxu0 %v7854_v60  ;;  %4778 = vmatprep.subr.bf16.mxu1 %v7855_v7  ;;  %v7865_v60 = vld [vmem:[#allocation69_spill] sm:$0xff]  ;;  %v7866_v7 = vld [vmem:[#allocation70_spill] sm:$0xff] }
 0x78b   :  { %4716 = vmatpush1.bf16.msra.mxu0 %v7856_v52  ;;  %4780 = vmatpush1.bf16.msra.mxu1 %v7857_v40  ;;  %v7867_v52 = vld [vmem:[#allocation71_spill] sm:$0xff]  ;;  %v84_v40 = vpop.permute.xlu0 %83 }
 0x78c   :  { %4718 = vmatprep.subr.bf16.mxu0 %v7858_v17  ;;  %4782 = vmatprep.subr.bf16.mxu1 %v7859_v41  ;;  %v7868_v17 = vld [vmem:[#allocation74_spill] sm:$0xff]  ;;  %v7869_v41 = vld [vmem:[#allocation75_spill] sm:$0xff] }
 0x78d   :  { %v136_v54 = vmul.f32 %v7868_v17, %v84_v40  ;;  %v137_v45 = vmul.f32 %v7869_v41, %v84_v40 }
 0x78f   :  { %4720 = vmatpush1.bf16.msra.mxu0 %v7860_v37  ;;  %4784 = vmatpush1.bf16.msra.mxu1 %v7861_v50  ;;  %v7870_v37 = vld [vmem:[#allocation77_spill] sm:$0xff] }
 0x790   :  { %4722 = vmatprep.subr.bf16.mxu0 %v7862_v12  ;;  %4786 = vmatprep.subr.bf16.mxu1 %v7863_v23  ;;  %v190_v13 = vadd.f32 %v7870_v37, %v136_v54  ;;  %v191_v12 = vadd.f32 %v7578_v24, %v137_v45  ;;  %v7901_v24 = vld [vmem:[#allocation70_spill] sm:$0xff] }
 0x793   :  { %4724 = vmatpush1.bf16.msra.mxu0 %v7864_v19  ;;  %4788 = vmatpush1.bf16.msra.mxu1 %v7865_v60 }
 0x794   :  { %4790 = vmatprep.subr.bf16.mxu0 %v7866_v7  ;;  %4854 = vmatprep.subr.bf16.mxu1 %v7867_v52  ;;  %v138_v52 = vmul.f32 %v7480_v9, %v84_v40  ;;  %v7898_v9 = vld [vmem:[#allocation144_spill] sm:$0xff] }
 0x796   :  { %v192_v17 = vadd.f32 %v7579_v6, %v138_v52  ;;  %v139_v52 = vmul.f32 %v7482_v5, %v84_v40  ;;  %v7897_v6 = vld [vmem:[#allocation143_spill] sm:$0xff]  ;;  %v7900_v5 = vld [vmem:[#allocation146_spill] sm:$0xff] }
 0x7e9   :  { %v2266_v50 = vpop.f32.mrb[20].mxu0  ;;  %v2337_v61 = vpop.f32.mrb[20].mxu1 }
 0x7ea   :  { %v2488_v23 = vadd.f32 %v2266_v50, %v190_v13  ;;  %v2268_v49 = vpop.f32.mrb[21].mxu0  ;;  %v2339_v19 = vpop.f32.mrb[21].mxu1  ;;  %v2490_v7 = vadd.f32 %v2337_v61, %v192_v17 }
 0x7eb   :  { %v2489_v18 = vadd.f32 %v2268_v49, %v191_v12 }
 0x7ec   :  { %v3109_v60 = vmul.f32 -1.442695, %v2488_v23 }
 0x7ed   :  { %v3111_v35 = vmul.f32 -1.442695, %v2489_v18 }
 0x7ee   :  { %5228 = vpow2.f32 %v3109_v60  ;;  %v193_v60 = vadd.f32 %v7386_v33, %v139_v52  ;;  %v7899_v33 = vld [vmem:[#allocation145_spill] sm:$0xff] }
 0x7ef   :  { %5230 = vpow2.f32 %v3111_v35 }
 0x7f0   :  { %5232 = vtanh.f32 %v2490_v7 }
 0x7f8   :  { %v5229_v41 = vpop.eup %5228 }
 0x7f9   :  { %v5231_v27 = vpop.eup %5230  ;;  %v2499_v54 = vadd.f32 1.0, %v5229_v41 }
 0x7fa   :  { %v2511_v37 = vadd.f32 1.0, %v5231_v27  ;;  %v5233_v13 = vpop.eup %5232 }
 0x7fb   :  { %5234 = vrcp.f32 %v2499_v54  ;;  %v2491_v54 = vadd.f32 %v2339_v19, %v193_v60 }
 0x7fc   :  { %5236 = vrcp.f32 %v2511_v37 }
 0x805   :  { %v5235_v45 = vpop.eup %5234 }
 0x806   :  { %v5237_v50 = vpop.eup %5236  ;;  %v2533_v49 = vmul.f32 %v5235_v45, %v5233_v13  ;;  %v3113_v13 = vmul.f32 -1.442695, %v2491_v54 }
 0x807   :  { %v2531_v18 = vmul.f32 %v5237_v50, %v6562_v46 }
 0x809   :  { %v6716_v12 = vadd.f32 %v2533_v49, %v2531_v18 }
 0x80b   :  { %7871 = vst [vmem:[#allocation80_spill] sm:$0xff] %v6716_v12 }
 0x829   :  { %v2408_v35 = vpop.f32.mrb[22].mxu0  ;;  %v2479_v23 = vpop.f32.mrb[22].mxu1 }
 0x82a   :  { %v2484_v61 = vadd.f32 %v2408_v35, %v7483_v56  ;;  %v2410_v17 = vpop.f32.mrb[23].mxu0  ;;  %v2481_v41 = vpop.f32.mrb[23].mxu1  ;;  %v2486_v50 = vadd.f32 %v2479_v23, %v5952_v14  ;;  %v7892_v14 = vld [vmem:[#allocation138_spill] sm:$0xff]  ;;  %v7895_v56 = vld [vmem:[#allocation141_spill] sm:$0xff] }
 0x82b   :  { %v2485_v27 = vadd.f32 %v2410_v17, %v5941_v36  ;;  %v2487_v46 = vadd.f32 %v2481_v41, %v5947_v8  ;;  %v7893_v8 = vld [vmem:[#allocation139_spill] sm:$0xff]  ;;  %v7894_v36 = vld [vmem:[#allocation140_spill] sm:$0xff] }
 0x82c   :  { %v3108_v7 = vmul.f32 -1.442695, %v2484_v61 }
 0x82d   :  { %v3110_v37 = vmul.f32 -1.442695, %v2485_v27  ;;  %v3112_v45 = vmul.f32 -1.442695, %v2487_v46 }
 0x82e   :  { %5238 = vpow2.f32 %v3108_v7 }
 0x82f   :  { %5240 = vpow2.f32 %v3110_v37 }
 0x830   :  { %5242 = vpow2.f32 %v3113_v13 }
 0x831   :  { %5244 = vpow2.f32 %v3112_v45 }
 0x832   :  { %5246 = vtanh.f32 %v2486_v50 }
 0x838   :  { %v5239_v40 = vpop.eup %5238 }
 0x839   :  { %v5241_v49 = vpop.eup %5240  ;;  %v2498_v18 = vadd.f32 1.0, %v5239_v40 }
 0x83a   :  { %v2510_v35 = vadd.f32 1.0, %v5241_v49  ;;  %v5243_v61 = vpop.eup %5242  ;;  %v7874_v49 = vld [vmem:[#allocation120_spill] sm:$0xff] }
 0x83b   :  { %5248 = vrcp.f32 %v2498_v18  ;;  %v5245_v52 = vpop.eup %5244  ;;  %v2525_v60 = vadd.f32 1.0, %v5243_v61  ;;  %v7875_v18 = vld [vmem:[#allocation121_spill] sm:$0xff]  ;;  %v7877_v61 = vld [vmem:[#allocation123_spill] sm:$0xff] }
 0x83c   :  { %5250 = vrcp.f32 %v2510_v35  ;;  %v5247_v17 = vpop.eup %5246  ;;  %v2524_v41 = vadd.f32 1.0, %v5245_v52  ;;  %v7876_v35 = vld [vmem:[#allocation122_spill] sm:$0xff]  ;;  %v7878_v52 = vld [vmem:[#allocation124_spill] sm:$0xff] }
 0x83d   :  { %5252 = vtanh.f32 %v6716_v12  ;;  %v7896_v12 = vld [vmem:[#allocation142_spill] sm:$0xff] }
 0x83e   :  { %5254 = vrcp.f32 %v2524_v41  ;;  %v7883_v41 = vld [vmem:[#allocation129_spill] sm:$0xff] }
 0x845   :  { %v5249_v27 = vpop.eup %5248 }
 0x846   :  { %v5251_v19 = vpop.eup %5250  ;;  %v2532_v7 = vmul.f32 %v5249_v27, %v5247_v17  ;;  %v7879_v17 = vld [vmem:[#allocation125_spill] sm:$0xff]  ;;  %v7880_v27 = vld [vmem:[#allocation126_spill] sm:$0xff] }
 0x847   :  { %v2530_v37 = vmul.f32 %v5251_v19, %v6571_v53  ;;  %v5253_v54 = vpop.eup %5252  ;;  %v7873_v53 = vld [vmem:[#allocation119_spill] sm:$0xff] }
 0x848   :  { %v5255_v46 = vpop.eup %5254  ;;  %v7881_v19 = vld [vmem:[#allocation127_spill] sm:$0xff] }
 0x849   :  { %v6725_v23 = vadd.f32 %v2532_v7, %v2530_v37  ;;  %v7882_v7 = vld [vmem:[#allocation128_spill] sm:$0xff]  ;;  %v7884_v37 = vld [vmem:[#allocation130_spill] sm:$0xff] }
 0x84b   :  { %7872 = vst [vmem:[#allocation85_spill] sm:$0xff] %v6725_v23  ;;  %5256 = vtanh.f32 %v6725_v23  ;;  %v7891_v23 = vld [vmem:[#allocation137_spill] sm:$0xff] }
 0x84c   :  { %5258 = vrcp.f32 %v2525_v60  ;;  %v7885_v60 = vld [vmem:[#allocation131_spill] sm:$0xff] }
 0x855   :  { %v5257_v13 = vpop.eup %5256 }
 0x856   :  { %v5259_v45 = vpop.eup %5258  ;;  %v2538_v50 = vmul.f32 %v5257_v13, %v5255_v46  ;;  %v7887_v46 = vld [vmem:[#allocation133_spill] sm:$0xff]  ;;  %v7888_v13 = vld [vmem:[#allocation134_spill] sm:$0xff] }
 0x857   :  { %v6729_v40 = vmul.f32 %v5259_v45, %v5253_v54  ;;  %v7886_v54 = vld [vmem:[#allocation132_spill] sm:$0xff]  ;;  %v7889_v45 = vld [vmem:[#allocation135_spill] sm:$0xff] }
 0x858   :  { %2604 = vmatprep.mubr.f32.mxu0 %v2538_v50  ;;  %2675 = vmatprep.mubr.f32.mxu1 %v2538_v50 }
 0x859   :  { %2605 = vmatmul.mubr.f32.vlgmr.msra.gmra.mrb[24].mxu0 %v6729_v40  ;;  %2676 = vmatmul.mubr.f32.vlgmr.msra.gmra.mrb[24].mxu1 %v6729_v40 }
 0x85a   :  { %4792 = vmatpush1.bf16.msra.mxu0 %v7389_v63  ;;  %4856 = vmatpush1.bf16.msra.mxu1 %v7390_v62 }
 0x85b   :  { %2746 = vmatprep.mubr.f32.mxu0 %v2538_v50  ;;  %2817 = vmatprep.mubr.f32.mxu1 %v2538_v50  ;;  %v7890_v50 = vld [vmem:[#allocation136_spill] sm:$0xff] }
 0x85c   :  { %4794 = vmatprep.subr.bf16.mxu0 %v7391_v32  ;;  %4858 = vmatprep.subr.bf16.mxu1 %v7392_v1 }
 0x85e   :  { %4796 = vmatpush1.bf16.msra.mxu0 %v7393_v55  ;;  %4860 = vmatpush1.bf16.msra.mxu1 %v7484_v3 }
 0x85f   :  { %4798 = vmatprep.subr.bf16.mxu0 %v7485_v44  ;;  %4862 = vmatprep.subr.bf16.mxu1 %v7486_v42 }
 0x862   :  { %4800 = vmatpush1.bf16.msra.mxu0 %v7487_v43  ;;  %4864 = vmatpush1.bf16.msra.mxu1 %v7488_v22 }
 0x863   :  { %4802 = vmatprep.subr.bf16.mxu0 %v7489_v34  ;;  %4866 = vmatprep.subr.bf16.mxu1 %v7580_v11 }
 0x866   :  { %4804 = vmatpush1.bf16.msra.mxu0 %v7581_v31  ;;  %4868 = vmatpush1.bf16.msra.mxu1 %v7582_v25 }
 0x867   :  { %4806 = vmatprep.subr.bf16.mxu0 %v7583_v2  ;;  %4870 = vmatprep.subr.bf16.mxu1 %v7584_v58 }
 0x86a   :  { %4808 = vmatpush1.bf16.msra.mxu0 %v7585_v10  ;;  %4872 = vmatpush1.bf16.msra.mxu1 %v7586_v51 }
 0x86b   :  { %4810 = vmatprep.subr.bf16.mxu0 %v7587_v0  ;;  %4874 = vmatprep.subr.bf16.mxu1 %v7588_v29 }
 0x86e   :  { %4812 = vmatpush1.bf16.msra.mxu0 %v7589_v26  ;;  %4876 = vmatpush1.bf16.msra.mxu1 %v7590_v15 }
 0x86f   :  { %4814 = vmatprep.subr.bf16.mxu0 %v7591_v28  ;;  %4878 = vmatprep.subr.bf16.mxu1 %v7592_v47 }
 0x872   :  { %4816 = vmatpush1.bf16.msra.mxu0 %v7593_v59  ;;  %4880 = vmatpush1.bf16.msra.mxu1 %v7594_v57 }
 0x873   :  { %4818 = vmatprep.subr.bf16.mxu0 %v7595_v16  ;;  %4882 = vmatprep.subr.bf16.mxu1 %v7596_v20 }
 0x876   :  { %4820 = vmatpush1.bf16.msra.mxu0 %v7507_v38  ;;  %4884 = vmatpush1.bf16.msra.mxu1 %v7508_v30 }
 0x877   :  { %4822 = vmatprep.subr.bf16.mxu0 %v7509_v39  ;;  %4886 = vmatprep.subr.bf16.mxu1 %v7510_v21 }
 0x87a   :  { %4824 = vmatpush1.bf16.msra.mxu0 %v7511_v48  ;;  %4888 = vmatpush1.bf16.msra.mxu1 %v7512_v4 }
 0x87b   :  { %4826 = vmatprep.subr.bf16.mxu0 %v7873_v53  ;;  %4890 = vmatprep.subr.bf16.mxu1 %v7874_v49 }
 0x87e   :  { %4828 = vmatpush1.bf16.msra.mxu0 %v7875_v18  ;;  %4892 = vmatpush1.bf16.msra.mxu1 %v7876_v35 }
 0x87f   :  { %4830 = vmatprep.subr.bf16.mxu0 %v7877_v61  ;;  %4894 = vmatprep.subr.bf16.mxu1 %v7878_v52 }
 0x882   :  { %4832 = vmatpush1.bf16.msra.mxu0 %v7879_v17  ;;  %4896 = vmatpush1.bf16.msra.mxu1 %v7880_v27 }
 0x883   :  { %4834 = vmatprep.subr.bf16.mxu0 %v7881_v19  ;;  %4898 = vmatprep.subr.bf16.mxu1 %v7882_v7 }
 0x886   :  { %4836 = vmatpush1.bf16.msra.mxu0 %v7883_v41  ;;  %4900 = vmatpush1.bf16.msra.mxu1 %v7884_v37 }
 0x887   :  { %4838 = vmatprep.subr.bf16.mxu0 %v7885_v60  ;;  %4902 = vmatprep.subr.bf16.mxu1 %v7886_v54 }
 0x88a   :  { %4840 = vmatpush1.bf16.msra.mxu0 %v7887_v46  ;;  %4904 = vmatpush1.bf16.msra.mxu1 %v7888_v13 }
 0x88b   :  { %4842 = vmatprep.subr.bf16.mxu0 %v7889_v45  ;;  %4906 = vmatprep.subr.bf16.mxu1 %v7890_v50 }
 0x88e   :  { %4844 = vmatpush1.bf16.msra.mxu0 %v7891_v23  ;;  %4908 = vmatpush1.bf16.msra.mxu1 %v7892_v14  ;;  %v7902_v23 = vld [vmem:[#allocation71_spill] sm:$0xff] }
 0x88f   :  { %4846 = vmatprep.subr.bf16.mxu0 %v7893_v8  ;;  %4910 = vmatprep.subr.bf16.mxu1 %v7894_v36 }
 0x892   :  { %4848 = vmatpush1.bf16.msra.mxu0 %v7895_v56  ;;  %4912 = vmatpush1.bf16.msra.mxu1 %v7896_v12 }
 0x893   :  { %4850 = vmatprep.subr.bf16.mxu0 %v7897_v6  ;;  %4914 = vmatprep.subr.bf16.mxu1 %v7898_v9 }
 0x896   :  { %4852 = vmatpush1.bf16.msra.mxu0 %v7899_v33  ;;  %4916 = vmatpush1.bf16.msra.mxu1 %v7900_v5 }
 0x897   :  { %4918 = vmatprep.subr.bf16.mxu0 %v7901_v24  ;;  %4982 = vmatprep.subr.bf16.mxu1 %v7902_v23  ;;  %v7903_v24 = vld [vmem:[#allocation137_spill] sm:$0xff] }
 0x899   :  { %2747 = vmatmul.mubr.f32.vlgmr.msra.gmra.mrb[26].mxu0 %v6729_v40  ;;  %2818 = vmatmul.mubr.f32.vlgmr.msra.gmra.mrb[26].mxu1 %v6729_v40 }
 0x89a   :  { %4920 = vmatpush1.bf16.msra.mxu0 %v7389_v63  ;;  %4984 = vmatpush1.bf16.msra.mxu1 %v7390_v62  ;;  %v89_v63 = vpop.permute.xlu1 %88  ;;  %v7904_v62 = vld [vmem:[#allocation74_spill] sm:$0xff] }
 0x89b   :  { %4922 = vmatprep.subr.bf16.mxu0 %v7391_v32  ;;  %4986 = vmatprep.subr.bf16.mxu1 %v7392_v1  ;;  %v140_v32 = vmul.f32 %v7904_v62, %v89_v63 }
 0x89e   :  { %4924 = vmatpush1.bf16.msra.mxu0 %v7393_v55  ;;  %4988 = vmatpush1.bf16.msra.mxu1 %v7484_v3 }
 0x89f   :  { %4926 = vmatprep.subr.bf16.mxu0 %v7485_v44  ;;  %4990 = vmatprep.subr.bf16.mxu1 %v7486_v42 }
 0x8a2   :  { %4928 = vmatpush1.bf16.msra.mxu0 %v7487_v43  ;;  %4992 = vmatpush1.bf16.msra.mxu1 %v7488_v22  ;;  %v7908_v22 = vld [vmem:[#allocation79_spill] sm:$0xff] }
 0x8a3   :  { %4930 = vmatprep.subr.bf16.mxu0 %v7489_v34  ;;  %4994 = vmatprep.subr.bf16.mxu1 %v7580_v11 }
 0x8a6   :  { %4932 = vmatpush1.bf16.msra.mxu0 %v7581_v31  ;;  %4996 = vmatpush1.bf16.msra.mxu1 %v7582_v25 }
 0x8a7   :  { %4934 = vmatprep.subr.bf16.mxu0 %v7583_v2  ;;  %4998 = vmatprep.subr.bf16.mxu1 %v7584_v58 }
 0x8aa   :  { %4936 = vmatpush1.bf16.msra.mxu0 %v7585_v10  ;;  %5000 = vmatpush1.bf16.msra.mxu1 %v7586_v51 }
 0x8ab   :  { %4938 = vmatprep.subr.bf16.mxu0 %v7587_v0  ;;  %5002 = vmatprep.subr.bf16.mxu1 %v7588_v29 }
 0x8ae   :  { %4940 = vmatpush1.bf16.msra.mxu0 %v7589_v26  ;;  %5004 = vmatpush1.bf16.msra.mxu1 %v7590_v15 }
 0x8af   :  { %4942 = vmatprep.subr.bf16.mxu0 %v7591_v28  ;;  %5006 = vmatprep.subr.bf16.mxu1 %v7592_v47 }
 0x8b2   :  { %4944 = vmatpush1.bf16.msra.mxu0 %v7593_v59  ;;  %5008 = vmatpush1.bf16.msra.mxu1 %v7594_v57  ;;  %v7912_v59 = vld [vmem:[#allocation80_spill] sm:$0xff] }
 0x8b3   :  { %4946 = vmatprep.subr.bf16.mxu0 %v7595_v16  ;;  %5010 = vmatprep.subr.bf16.mxu1 %v7596_v20 }
 0x8b6   :  { %4948 = vmatpush1.bf16.msra.mxu0 %v7507_v38  ;;  %5012 = vmatpush1.bf16.msra.mxu1 %v7508_v30  ;;  %v7910_v30 = vld [vmem:[#allocation82_spill] sm:$0xff] }
 0x8b7   :  { %4950 = vmatprep.subr.bf16.mxu0 %v7509_v39  ;;  %5014 = vmatprep.subr.bf16.mxu1 %v7510_v21  ;;  %v142_v39 = vmul.f32 %v7910_v30, %v89_v63 }
 0x8ba   :  { %4952 = vmatpush1.bf16.msra.mxu0 %v7511_v48  ;;  %5016 = vmatpush1.bf16.msra.mxu1 %v7512_v4  ;;  %v7911_v48 = vld [vmem:[#allocation83_spill] sm:$0xff] }
 0x8bb   :  { %4954 = vmatprep.subr.bf16.mxu0 %v7873_v53  ;;  %5018 = vmatprep.subr.bf16.mxu1 %v7874_v49  ;;  %v196_v11 = vadd.f32 %v7911_v48, %v142_v39  ;;  %v7913_v49 = vld [vmem:[#allocation84_spill] sm:$0xff] }
 0x8be   :  { %4956 = vmatpush1.bf16.msra.mxu0 %v7875_v18  ;;  %5020 = vmatpush1.bf16.msra.mxu1 %v7876_v35 }
 0x8bf   :  { %4958 = vmatprep.subr.bf16.mxu0 %v7877_v61  ;;  %5022 = vmatprep.subr.bf16.mxu1 %v7878_v52  ;;  %v7914_v52 = vld [vmem:[#allocation72_spill] sm:$0xff] }
 0x8c2   :  { %4960 = vmatpush1.bf16.msra.mxu0 %v7879_v17  ;;  %5024 = vmatpush1.bf16.msra.mxu1 %v7880_v27 }
 0x8c3   :  { %4962 = vmatprep.subr.bf16.mxu0 %v7881_v19  ;;  %5026 = vmatprep.subr.bf16.mxu1 %v7882_v7  ;;  %v7915_v7 = vld [vmem:[#allocation73_spill] sm:$0xff] }
 0x8c6   :  { %4964 = vmatpush1.bf16.msra.mxu0 %v7883_v41  ;;  %5028 = vmatpush1.bf16.msra.mxu1 %v7884_v37 }
 0x8c7   :  { %4966 = vmatprep.subr.bf16.mxu0 %v7885_v60  ;;  %5030 = vmatprep.subr.bf16.mxu1 %v7886_v54  ;;  %v7916_v60 = vld [vmem:[#allocation76_spill] sm:$0xff] }
 0x8ca   :  { %4968 = vmatpush1.bf16.msra.mxu0 %v7887_v46  ;;  %5032 = vmatpush1.bf16.msra.mxu1 %v7888_v13 }
 0x8cb   :  { %4970 = vmatprep.subr.bf16.mxu0 %v7889_v45  ;;  %5034 = vmatprep.subr.bf16.mxu1 %v7890_v50 }
 0x8ce   :  { %4972 = vmatpush1.bf16.msra.mxu0 %v7903_v24  ;;  %5036 = vmatpush1.bf16.msra.mxu1 %v7892_v14  ;;  %v7905_v14 = vld [vmem:[#allocation75_spill] sm:$0xff] }
 0x8cf   :  { %4974 = vmatprep.subr.bf16.mxu0 %v7893_v8  ;;  %5038 = vmatprep.subr.bf16.mxu1 %v7894_v36  ;;  %v141_v1 = vmul.f32 %v7905_v14, %v89_v63  ;;  %v7906_v8 = vld [vmem:[#allocation77_spill] sm:$0xff] }
 0x8d0   :  { %v194_v55 = vadd.f32 %v7906_v8, %v140_v32  ;;  %v7917_v8 = vld [vmem:[#allocation85_spill] sm:$0xff] }
 0x8d2   :  { %4976 = vmatpush1.bf16.msra.mxu0 %v7895_v56  ;;  %5040 = vmatpush1.bf16.msra.mxu1 %v7896_v12  ;;  %v7907_v56 = vld [vmem:[#allocation78_spill] sm:$0xff] }
 0x8d3   :  { %4978 = vmatprep.subr.bf16.mxu0 %v7897_v6  ;;  %5042 = vmatprep.subr.bf16.mxu1 %v7898_v9  ;;  %v195_v44 = vadd.f32 %v7907_v56, %v141_v1  ;;  %v143_v9 = vmul.f32 %v7908_v22, %v89_v63 }
 0x8d6   :  { %4980 = vmatpush1.bf16.msra.mxu0 %v7899_v33  ;;  %5044 = vmatpush1.bf16.msra.mxu1 %v7900_v5  ;;  %v7909_v5 = vld [vmem:[#allocation81_spill] sm:$0xff] }
 0x8d7   :  { %v197_v38 = vadd.f32 %v7909_v5, %v143_v9 }
 0x92c   :  { %v2606_v36 = vpop.f32.mrb[24].mxu0  ;;  %v2677_v3 = vpop.f32.mrb[24].mxu1 }
 0x92d   :  { %v2828_v42 = vadd.f32 %v2606_v36, %v194_v55  ;;  %v2608_v43 = vpop.f32.mrb[25].mxu0  ;;  %v2679_v6 = vpop.f32.mrb[25].mxu1  ;;  %v2830_v25 = vadd.f32 %v2677_v3, %v196_v11 }
 0x92e   :  { %v2829_v34 = vadd.f32 %v2608_v43, %v195_v44  ;;  %v2831_v21 = vadd.f32 %v2679_v6, %v197_v38 }
 0x92f   :  { %v3115_v33 = vmul.f32 -1.442695, %v2828_v42 }
 0x930   :  { %v3117_v4 = vmul.f32 -1.442695, %v2829_v34  ;;  %v3119_v31 = vmul.f32 -1.442695, %v2831_v21 }
 0x931   :  { %5260 = vpow2.f32 %v3115_v33 }
 0x932   :  { %5262 = vpow2.f32 %v3117_v4 }
 0x933   :  { %5264 = vpow2.f32 %v3119_v31 }
 0x934   :  { %5266 = vtanh.f32 %v2830_v25 }
 0x93b   :  { %v5261_v2 = vpop.eup %5260 }
 0x93c   :  { %v5263_v58 = vpop.eup %5262  ;;  %v2839_v10 = vadd.f32 1.0, %v5261_v2 }
 0x93d   :  { %v2851_v51 = vadd.f32 1.0, %v5263_v58  ;;  %v5265_v0 = vpop.eup %5264 }
 0x93e   :  { %5268 = vrcp.f32 %v2839_v10  ;;  %v5267_v29 = vpop.eup %5266  ;;  %v2865_v47 = vadd.f32 1.0, %v5265_v0 }
 0x93f   :  { %5270 = vrcp.f32 %v2851_v51 }
 0x940   :  { %5272 = vrcp.f32 %v2865_v47 }
 0x948   :  { %v5269_v26 = vpop.eup %5268 }
 0x949   :  { %v5271_v15 = vpop.eup %5270  ;;  %v2873_v28 = vmul.f32 %v5269_v26, %v5267_v29 }
 0x94a   :  { %v2871_v57 = vmul.f32 %v5271_v15, %v7912_v59  ;;  %v5273_v20 = vpop.eup %5272 }
 0x94c   :  { %v2875_v16 = vadd.f32 %v2873_v28, %v2871_v57  ;;  %v3123_v28 = vld [vmem:[%s6890_s5] ss:$0 sm:$0xff] }
 0x94d   :  { %v3124_v57 = vld [vmem:[#allocation2] ss:$0 sm:$0xff] }
 0x94e   :  { %5274 = vtanh.f32 %v2875_v16 }
 0x958   :  { %v5275_v12 = vpop.eup %5274 }
 0x959   :  { %v2879_v23 = vmul.f32 %v5275_v12, %v5273_v20 }
 0x96c   :  { %v2748_v40 = vpop.f32.mrb[26].mxu0  ;;  %v2819_v53 = vpop.f32.mrb[26].mxu1 }
 0x96d   :  { %v2824_v18 = vadd.f32 %v2748_v40, %v7913_v49  ;;  %v2750_v35 = vpop.f32.mrb[27].mxu0  ;;  %v2821_v61 = vpop.f32.mrb[27].mxu1  ;;  %v2826_v54 = vadd.f32 %v2819_v53, %v7916_v60 }
 0x96e   :  { %v2825_v17 = vadd.f32 %v2750_v35, %v7914_v52  ;;  %v2827_v41 = vadd.f32 %v2821_v61, %v7915_v7 }
 0x96f   :  { %v3114_v27 = vmul.f32 -1.442695, %v2824_v18 }
 0x970   :  { %v3116_v19 = vmul.f32 -1.442695, %v2825_v17  ;;  %v3118_v37 = vmul.f32 -1.442695, %v2827_v41 }
 0x971   :  { %5276 = vpow2.f32 %v3114_v27 }
 0x972   :  { %5278 = vpow2.f32 %v3116_v19 }
 0x973   :  { %5280 = vpow2.f32 %v3118_v37 }
 0x974   :  { %5282 = vtanh.f32 %v2826_v54 }
 0x97b   :  { %v5277_v46 = vpop.eup %5276 }
 0x97c   :  { %v5279_v13 = vpop.eup %5278  ;;  %v2838_v45 = vadd.f32 1.0, %v5277_v46 }
 0x97d   :  { %v2850_v50 = vadd.f32 1.0, %v5279_v13  ;;  %v5281_v24 = vpop.eup %5280 }
 0x97e   :  { %5284 = vrcp.f32 %v2838_v45  ;;  %v5283_v63 = vpop.eup %5282  ;;  %v2864_v1 = vadd.f32 1.0, %v5281_v24 }
 0x97f   :  { %5286 = vrcp.f32 %v2850_v50 }
 0x980   :  { %5288 = vrcp.f32 %v2864_v1 }
 0x988   :  { %v5285_v62 = vpop.eup %5284 }
 0x989   :  { %v5287_v32 = vpop.eup %5286  ;;  %v2872_v14 = vmul.f32 %v5285_v62, %v5283_v63 }
 0x98a   :  { %v2870_v55 = vmul.f32 %v5287_v32, %v7917_v8  ;;  %v5289_v3 = vpop.eup %5288 }
 0x98c   :  { %v2874_v36 = vadd.f32 %v2872_v14, %v2870_v55 }
 0x98e   :  { %5290 = vtanh.f32 %v2874_v36 }
 0x998   :  { %v5291_v56 = vpop.eup %5290 }
 0x999   :  { %v2878_v44 = vmul.f32 %v5291_v56, %v5289_v3 }
 0x99b   :  { %2944 = vmatprep.mubr.f32.mxu0 %v2878_v44  ;;  %3015 = vmatprep.mubr.f32.mxu1 %v2878_v44 }
 0x99c   :  { %2945 = vmatmul.mubr.f32.vlgmr.msra.gmra.mrb[28].mxu0 %v2879_v23  ;;  %3016 = vmatmul.mubr.f32.vlgmr.msra.gmra.mrb[28].mxu1 %v2879_v23 }
 0xa6f   :  { %v2946_v42 = vpop.f32.mrb[28].mxu0  ;;  %v3017_v43 = vpop.f32.mrb[28].mxu1 }
 0xa70   :  { %v3022_v6 = vadd.f32 %v2946_v42, %v7913_v49  ;;  %v2948_v22 = vpop.f32.mrb[29].mxu0  ;;  %v3019_v9 = vpop.f32.mrb[29].mxu1  ;;  %v3024_v30 = vadd.f32 %v3017_v43, %v7916_v60 }
 0xa71   :  { %v3023_v34 = vadd.f32 %v2948_v22, %v7914_v52  ;;  %v3025_v5 = vadd.f32 %v3019_v9, %v7915_v7 }
 0xa72   :  { %v3120_v33 = vmul.f32 -1.442695, %v3022_v6 }
 0xa73   :  { %v3121_v4 = vmul.f32 -1.442695, %v3023_v34  ;;  %v3122_v38 = vmul.f32 -1.442695, %v3025_v5 }
 0xa74   :  { %5292 = vpow2.f32 %v3120_v33 }
 0xa75   :  { %5294 = vpow2.f32 %v3121_v4 }
 0xa76   :  { %5296 = vpow2.f32 %v3122_v38 }
 0xa77   :  { %5298 = vtanh.f32 %v3024_v30 }
 0xa7e   :  { %v5293_v39 = vpop.eup %5292 }
 0xa7f   :  { %v5295_v21 = vpop.eup %5294  ;;  %v3029_v48 = vadd.f32 1.0, %v5293_v39 }
 0xa80   :  { %v3035_v11 = vadd.f32 1.0, %v5295_v21  ;;  %v5297_v31 = vpop.eup %5296 }
 0xa81   :  { %5300 = vrcp.f32 %v3029_v48  ;;  %v5299_v25 = vpop.eup %5298  ;;  %v3042_v51 = vadd.f32 1.0, %v5297_v31 }
 0xa82   :  { %5302 = vrcp.f32 %v3035_v11 }
 0xa83   :  { %5304 = vrcp.f32 %v3042_v51 }
 0xa8b   :  { %v5301_v2 = vpop.eup %5300 }
 0xa8c   :  { %v5303_v58 = vpop.eup %5302  ;;  %v3046_v10 = vmul.f32 %v5301_v2, %v5299_v25 }
 0xa8d   :  { %v3045_v0 = vmul.f32 %v5303_v58, %v2874_v36  ;;  %v5305_v26 = vpop.eup %5304 }
 0xa8f   :  { %v3047_v29 = vadd.f32 %v3046_v10, %v3045_v0 }
 0xa91   :  { %5306 = vtanh.f32 %v3047_v29 }
 0xa9b   :  { %v5307_v15 = vpop.eup %5306 }
 0xa9c   :  { %v3049_v47 = vmul.f32 %v5307_v15, %v5305_v26 }
 0xa9e   :  { %v3057_v59 = vmul.f32 %v3123_v28, %v3049_v47 }
 0xaa0   :  { %3058 = vadd.xlane.f32.xlu0 %v3057_v59 }
 0xb2d   :  { %v3059_v16 = vpop.xlane.xlu0 %3058 }
 0xb2e   :  { %v3067_v20 = vadd.f32 %v3124_v57, %v3059_v16 }
 0xb30   :  { %3069 = vst.msk [vmem:[%s6892_s7] sm:$0xff] %vm3068_vm0, %v3067_v20 }
 0xb31   :  { %3074 = vsyncpa [#allocation4], 1 }

</bundles_post_ra>
